<compile_context>
chip_gen: v7x
topology: tpu7x:2x2x1
jax: 0.10.0
libtpu: 0.0.40
codegen_flags: <defaults>
</compile_context>

<pallas_src>
import jax
import jax.numpy as jnp
from jax.experimental import pallas as pl
from jax.experimental.pallas import tpu as pltpu


def _matmul_kernel(w_ref, x_ref, o_ref):
    # grid = (Cout // tn, K // tk); K (reduction) is the trailing axis.
    @pl.when(pl.program_id(1) == 0)
    def _():
        o_ref[...] = jnp.zeros_like(o_ref)

    o_ref[...] += jnp.dot(
        w_ref[...], x_ref[...], preferred_element_type=jnp.float32
    )


def _default_tn(cout):
    """Full-Cout tile on 1-TC chips; split in two on v7x to feed both cores."""
    try:
        kind = jax.devices()[0].device_kind.lower()
    except Exception:
        kind = ""
    if "v7" in kind and cout % 2 == 0 and (cout // 2) % 128 == 0:
        return cout // 2
    return cout


def conv1x1_matmul(w2d, x2d, *, tn=None, tk=512):
    """w2d: [Cout, K], x2d: [K, M] -> [Cout, M] via Pallas tiled matmul."""
    Cout, K = w2d.shape
    K2, M = x2d.shape
    assert K == K2
    if tn is None:
        tn = _default_tn(Cout)
    assert K % tk == 0 and Cout % tn == 0

    return pl.pallas_call(
        _matmul_kernel,
        out_shape=jax.ShapeDtypeStruct((Cout, M), jnp.float32),
        grid_spec=pltpu.PrefetchScalarGridSpec(
            num_scalar_prefetch=0,
            grid=(Cout // tn, K // tk),
            in_specs=[
                pl.BlockSpec((tn, tk), lambda j, k: (j, k)),
                # M (=49) equals the full array dim, so it is a legal lane block.
                pl.BlockSpec((tk, M), lambda j, k: (k, 0)),
            ],
            out_specs=pl.BlockSpec((tn, M), lambda j, k: (j, 0)),
        ),
        compiler_params=pltpu.CompilerParams(
            dimension_semantics=("parallel", "arbitrary")
        ),
    )(w2d, x2d)


def conv2d_1x1_nchw(x_nchw, weight_oihw):
    """Equivalent of torch.nn.Conv2d(C_in, C_out, 1, 1, bias=False)(x_nchw)."""
    N, Cin, H, W = x_nchw.shape
    Cout = weight_oihw.shape[0]

    # NCHW consumed natively: for N == 1 this is a pure reshape (no transpose).
    if N == 1:
        x2d = x_nchw.reshape(Cin, H * W)
    else:
        x2d = jnp.transpose(x_nchw, (1, 0, 2, 3)).reshape(Cin, N * H * W)

    w2d = weight_oihw.reshape(Cout, Cin)          # [Cout, Cin], no transpose
    y2d = conv1x1_matmul(w2d, x2d)                # [Cout, N*H*W]

    if N == 1:
        return y2d.reshape(1, Cout, H, W)
    return jnp.transpose(y2d.reshape(Cout, N, H, W), (1, 0, 2, 3))


if __name__ == "__main__":
    key = jax.random.PRNGKey(0)
    kx, kw = jax.random.split(key)

    # Shapes implied by the module's forward: x332 = [1, 2048, 7, 7].
    N, Cin, H, W = 1, 2048, 7, 7
    Cout = 1024

    x = jax.random.normal(kx, (N, Cin, H, W), dtype=jnp.float32)
    # Deterministic weight init (uniform, PyTorch-like fan_in scaling).
    bound = 1.0 / (Cin ** 0.5)
    weight = jax.random.uniform(
        kw, (Cout, Cin, 1, 1), dtype=jnp.float32, minval=-bound, maxval=bound
    )

    y = conv2d_1x1_nchw(x, weight)
    y = jax.block_until_ready(y)

    # Silent correctness check against a plain-JAX reference.
    ref = jnp.einsum(
        "nchw,oc->nohw",
        x,
        weight.reshape(Cout, Cin),
        preferred_element_type=jnp.float32,
    )
    assert y.shape == (N, Cout, H, W)
    assert jnp.allclose(y, ref, atol=1e-3, rtol=1e-3)

    print("KERNEL_OK")
</pallas_src>

<mosaic_0001>
module attributes {stable_mosaic.version = 11 : i64} {
  func.func @_matmul_kernel(%arg0: i32, %arg1: i32, %arg2: memref<1024x512xf32, #tpu.memory_space<vmem>>, %arg3: memref<512x49xf32, #tpu.memory_space<vmem>>, %arg4: memref<1024x49xf32, #tpu.memory_space<vmem>>) attributes {dimension_semantics = [#tpu.dimension_semantics<parallel>, #tpu.dimension_semantics<arbitrary>], iteration_bounds = array<i64: 1, 4>, scalar_prefetch = 0 : i64, scratch_operands = 0 : i64, tpu.core_type = #tpu.core_type<tc>, window_params = [{transform_indices = @transform_0, window_bounds = array<i64: 1024, 512>}, {transform_indices = @transform_1, window_bounds = array<i64: 512, 49>}, {transform_indices = @transform_2, window_bounds = array<i64: 1024, 49>}]} {
    %c0_i32 = arith.constant 0 : i32
    %0 = arith.cmpi eq, %arg1, %c0_i32 : i32
    %1 = arith.extui %0 : i1 to i32
    %c0_i32_0 = arith.constant 0 : i32
    %2 = arith.cmpi ne, %1, %c0_i32_0 : i32
    scf.if %2 {
      %cst_8 = arith.constant 0.000000e+00 : f32
      %9 = vector.broadcast %cst_8 : f32 to vector<1024x49xf32>
      %c0_9 = arith.constant 0 : index
      %c0_10 = arith.constant 0 : index
      %10 = vector.load %arg4[%c0_9, %c0_10] : memref<1024x49xf32, #tpu.memory_space<vmem>>, vector<1024x49xf32>
      tpu.vector_store %arg4[%c0_9, %c0_10], %9 {strides = array<i32>} : memref<1024x49xf32, #tpu.memory_space<vmem>>, vector<1024x49xf32>,
    } else {
    }
    %c0 = arith.constant 0 : index
    %c0_1 = arith.constant 0 : index
    %3 = vector.load %arg4[%c0, %c0_1] : memref<1024x49xf32, #tpu.memory_space<vmem>>, vector<1024x49xf32>
    %c0_2 = arith.constant 0 : index
    %c0_3 = arith.constant 0 : index
    %4 = vector.load %arg2[%c0_2, %c0_3] : memref<1024x512xf32, #tpu.memory_space<vmem>>, vector<1024x512xf32>
    %c0_4 = arith.constant 0 : index
    %c0_5 = arith.constant 0 : index
    %5 = vector.load %arg3[%c0_4, %c0_5] : memref<512x49xf32, #tpu.memory_space<vmem>>, vector<512x49xf32>
    %cst = arith.constant dense<0.000000e+00> : vector<1024x49xf32>
    %6 = tpu.matmul %4, %5, %cst {dimension_numbers = #tpu.dot_dimension_numbers<[1], [0], [0], [1], [0, 0, 1, 1], [], []>} : vector<1024x512xf32>, vector<512x49xf32>, vector<1024x49xf32> -> vector<1024x49xf32>
    %7 = arith.addf %3, %6 : vector<1024x49xf32>
    %c0_6 = arith.constant 0 : index
    %c0_7 = arith.constant 0 : index
    %8 = vector.load %arg4[%c0_6, %c0_7] : memref<1024x49xf32, #tpu.memory_space<vmem>>, vector<1024x49xf32>
    tpu.vector_store %arg4[%c0_6, %c0_7], %7 {strides = array<i32>} : memref<1024x49xf32, #tpu.memory_space<vmem>>, vector<1024x49xf32>,
    return
  }
  func.func @transform_0(%arg0: i32, %arg1: i32) -> (i32, i32) {
    %c0_i32 = arith.constant 0 : i32
    return %arg0, %arg1 : i32, i32
  }
  func.func @transform_1(%arg0: i32, %arg1: i32) -> (i32, i32) {
    %c0_i32 = arith.constant 0 : i32
    %c0_i32_0 = arith.constant 0 : i32
    return %arg1, %c0_i32 : i32, i32
  }
  func.func @transform_2(%arg0: i32, %arg1: i32) -> (i32, i32) {
    %c0_i32 = arith.constant 0 : i32
    %c0_i32_0 = arith.constant 0 : i32
    return %arg0, %c0_i32 : i32, i32
  }
}

</mosaic_0001>

<bundles_post_ra>
// kernel: tpu_custom_call.1
= control target key start
LH: loop header
LB: loop body
LE: loop exit
PB: predicated region body
PF: predicated region fallthrough
CT: control target
= control target key end

     0   :  { %7 = vsyncpa [#allocation3], 0  ;;  %s5347_s0 = inlined_call_operand.hbm [shape: f32[1024,2048], index: 0, kind: input, shape index: {}]   ;;  %s5348_s1 = inlined_call_operand.vmem [shape: f32[2048,49], index: 1, kind: input, shape index: {}]   ;;  %s5349_s2 = inlined_call_operand.vmem [shape: f32[1024,49], index: 2, kind: output, shape index: {}]  }
   0x1   :  { %9 = vsyncpa [#allocation3 + $0x1], 0  ;;  %s3073_s9 = smov 0   ;;  %s3075_s10 = smov 0  }
   0x2   :  { %s3077_s11 = smov 0   ;;  %s3079_s12 = smov 0  }
   0x3   :  { %s3081_s13 = smov 0   ;;  %s3083_s14 = smov 0  }
   0x4 LB: > { %s2798_s15 = sadd.s32 4294967295, %s3050_s14   ;;  %s24_s16 = sadd.s32 1, %s3046_s13  ;;  %s3050_s14 = sphi %s3083_s14, %s15_s14   ;;  %s3046_s13 = sphi %s3081_s13, %s5358_s13   ;;  %s3042_s12 = sphi %s3079_s12, %s5357_s12   ;;  %s3038_s11 = sphi %s3077_s11, %s5356_s11   ;;  %s3034_s10 = sphi %s3075_s10, %s5355_s10   ;;  %s3030_s9 = sphi %s3073_s9, %s5354_s9  }
   0x5   : > { %p25_p0 = scmp.ge.s32.totalorder %s24_s16, 4  ;;  %s36_s17 = sadd.s32 1, %s3038_s11 }
   0x6   : > { %p43_p1 = scmp.ne.s32.totalorder %s3038_s11, %s3034_s10  ;;  %p44_p2 = scmp.eq.s32.totalorder %s3050_s14, 0 }
   0x7   : > { %s5360_s16 = smov (%p25_p0, %s24_s16), 0  ;;  %p49_p4 = scmp.ne.s32.totalorder %s3034_s10, %s3030_s9 }
   0x8   : > { %p3109_p3 = por %p44_p2, %p43_p1  ;;  %s32_s19 = ssub.s32 %s3046_s13, %s5360_s16 }
   0x9   : > { %p50_p5 = scmp.eq.s32.totalorder %s2798_s15, 0  ;;  %p34_p6 = scmp.eq.s32.totalorder %s32_s19, 0 }
   0xa   : > { %p2916_p8 = scmp.lt.s32.totalorder %s3050_s14, 4  ;;  %s125_s22 = sand.u32 1, %s3038_s11  }
   0xb   : > { %p3116_p7 = por %p50_p5, %p49_p4  ;;  %s2813_s23 = sshll.u32 %s3046_s13, 9 }
   0xc   : > { %s3122_s21 = scalar_select %p34_p6, %s3038_s11, %s36_s17  }
   0xd   : > { %s2801_s24 = sshll.u32 %s125_s22, 12  ;;  %s3129_s27 = scalar_lea.hbm %s5347_s0, %s2813_s23 }
   0xe   : > { %s129_s28 = scalar_lea.vmem [#allocation2], %s2801_s24  ;;  %p3133_p9 = pnand %p2916_p8, %p3109_p3 }
   0xf   : > { %s139_s29 = sshll.u32 %s129_s28, 4  ;;  %s3140_s3 = scalar_lea.sflag [#allocation3], %s125_s22  ;;  %s3137_s29 = int_to_ptr.vmem [resolvable:$true] %s139_s29 }
  0x10   : > { %s2970_s4 = scalar_lea.hbm %s3129_s27, 65536  ;;  %p2972_p12 = pneg %p3133_p9 }
  0x11   : > { %p2971_p11 = scmp.ne.s32.totalorder %s3129_s27, %s2970_s4  ;;  %s2975_s7 = scalar_lea.hbm %s5347_s0, 262144 }
  0x12   : > { %p2976_p1 = scmp.lt.u32.totalorder %s3129_s27, %s5347_s0  ;;  %p2977_p2 = scmp.lt.u32.totalorder %s2975_s7, %s2970_s4 }
  0x13   : > { %p2973_p13 = pnand %p2972_p12, %p2971_p11  ;;  %p2979_p4 = scmp.lt.u32.totalorder %s2970_s4, %s3129_s27 }
  0x14   : > { %p2978_p3 = por %p2977_p2, %p2976_p1 }
  0x15   : > { %p2974_p0 = pneg %p2973_p13 }
  0x16   : > { %p2980_p5 = por %p2979_p4, %p2978_p3 }
  0x18   : > { %p2981_p6 = pnand %p2980_p5, %p2974_p0 }
  0x1a   : > { %2984 = shalt.err (!%p2981_p6)
}
  0x1b   : > { %s2985_s15 = scalar_lea.vmem %s3137_s29, 65536  ;;  %s3052_s17 = smov [#allocation2]  }
  0x1c   : > { %p2986_p8 = scmp.ne.s32.totalorder %s3137_s29, %s2985_s15  ;;  %s2990_s18 = sshll.u32 %s3052_s17, 4  ;;  %s2991_s18 = int_to_ptr.vmem [resolvable:$false] %s2990_s18 }
  0x1d   : > { %s2992_s19 = scalar_lea.vmem %s2991_s18, 131072  ;;  %p2993_p10 = scmp.lt.s32.totalorder %s3137_s29, %s2991_s18 }
  0x1e   : > { %p2988_p11 = pnand %p2986_p8, %p2972_p12  ;;  %p2994_p1 = scmp.lt.s32.totalorder %s2992_s19, %s2985_s15 }
  0x20   : > { %p2989_p13 = pneg %p2988_p11  ;;  %p2995_p2 = por %p2994_p1, %p2993_p10 }
  0x22   : > { %p2996_p3 = pnand %p2995_p2, %p2989_p13 }
  0x24   : > { %2999 = shalt.err (!%p2996_p3)
}
  0x25   : > { %s3053_s22 = smov 2048   ;;  %s3054_s23 = smov 512  }
  0x26   : > { %s3055_s24 = smov 32   ;;  %p156_p12 = scmp.lt.s32.totalorder %s3050_s14, 5 }
  0x27   : > { %2915 = dma.hbm_to_vmem [thread:$0]  (!%p3133_p9), %s3129_s27, 65536, %s3137_s29, %s3140_s3, %s3053_s22, %s3054_s23, %s3055_s24  }
  0x28   : > { %p5353_p0 = scmp.ge.s32.totalorder %s3050_s14, 1 }
  0x2a   : > { %p157_p4 = pnand %p5353_p0, %p156_p12 }
  0x2b   : > { %s162_s25 = sand.u32 (!%p157_p4), 1, %s3034_s10  }
  0x2c   : > { %160 = sbr.rel (%p157_p4) target bundleno = 910 (0x38e), region = 28  ;;  %s2805_s26 = sshll.u32 (!%p157_p4), %s162_s25, 12 }
  0x2d   : > { %s163_s28 = scalar_lea.sflag (!%p157_p4), [#allocation3], %s162_s25  ;;  %s3172_s4 = scalar_lea.vmem (!%p157_p4), [#allocation2], %s2805_s26 }
  0x33   : > { %3025 = dma.done.wait (%p3116_p7), %s163_s28, 65536  }
  0x34   : > { %3027 = vsyncadd (%p3116_p7), %s163_s28, 4294901760  ;;  %s2806_s5 = sshll.u32 %s3042_s12, 6  ;;  %p2808_p9 = scmp.ne.s32.totalorder %s3042_s12, 0 }
  0x35   : > { %p195_p10 = scmp.lt.s32.totalorder %s2806_s5, 255  ;;  %vm210_vm0 = vcmask (!%p2808_p9), 400384   ;;  %v3056_v0 = vmov (!%p2808_p9), 0.0  }
  0x36   : > { %209 = sbr.rel (%p2808_p9) target bundleno = 118 (0x76), region = 36  ;;  %211 = vst.msk [vmem:[%s5349_s2] sm:$0xff] (!%p2808_p9), %vm210_vm0, %v3056_v0  ;;  %212 = vst.msk [vmem:[%s5349_s2 + $0x8] sm:$0xff] (!%p2808_p9), %vm210_vm0, %v3056_v0 }
  0x37   : > { %s5362_s5 = smov (!%p195_p10, %s2806_s5), 255  ;;  %213 = vst.msk [vmem:[%s5349_s2 + $0x10] sm:$0xff] (!%p2808_p9), %vm210_vm0, %v3056_v0  ;;  %214 = vst.msk [vmem:[%s5349_s2 + $0x18] sm:$0xff] (!%p2808_p9), %vm210_vm0, %v3056_v0 }
  0x38   : > { %s2807_s27 = sshll.u32 %s5362_s5, 3  ;;  %215 = vst.msk [vmem:[%s5349_s2 + $0x20] sm:$0xff] (!%p2808_p9), %vm210_vm0, %v3056_v0  ;;  %216 = vst.msk [vmem:[%s5349_s2 + $0x28] sm:$0xff] (!%p2808_p9), %vm210_vm0, %v3056_v0 }
  0x39   : > { %s3182_s3 = scalar_lea.vmem %s5348_s1, %s2807_s27  ;;  %217 = vst.msk [vmem:[%s5349_s2 + $0x30] sm:$0xff] (!%p2808_p9), %vm210_vm0, %v3056_v0  ;;  %218 = vst.msk [vmem:[%s5349_s2 + $0x38] sm:$0xff] (!%p2808_p9), %vm210_vm0, %v3056_v0 }
  0x3a   : > { %219 = vst.msk [vmem:[%s5349_s2 + $0x40] sm:$0xff] (!%p2808_p9), %vm210_vm0, %v3056_v0  ;;  %220 = vst.msk [vmem:[%s5349_s2 + $0x48] sm:$0xff] (!%p2808_p9), %vm210_vm0, %v3056_v0 }
  0x3b   : > { %221 = vst.msk [vmem:[%s5349_s2 + $0x50] sm:$0xff] (!%p2808_p9), %vm210_vm0, %v3056_v0  ;;  %222 = vst.msk [vmem:[%s5349_s2 + $0x58] sm:$0xff] (!%p2808_p9), %vm210_vm0, %v3056_v0 }
  0x3c   : > { %223 = vst.msk [vmem:[%s5349_s2 + $0x60] sm:$0xff] (!%p2808_p9), %vm210_vm0, %v3056_v0  ;;  %224 = vst.msk [vmem:[%s5349_s2 + $0x68] sm:$0xff] (!%p2808_p9), %vm210_vm0, %v3056_v0 }
  0x3d   : > { %225 = vst.msk [vmem:[%s5349_s2 + $0x70] sm:$0xff] %vm210_vm0, %v3056_v0  ;;  %226 = vst.msk [vmem:[%s5349_s2 + $0x78] sm:$0xff] %vm210_vm0, %v3056_v0 }
  0x3e   : > { %227 = vst.msk [vmem:[%s5349_s2 + $0x80] sm:$0xff] %vm210_vm0, %v3056_v0  ;;  %228 = vst.msk [vmem:[%s5349_s2 + $0x88] sm:$0xff] %vm210_vm0, %v3056_v0 }
  0x3f   : > { %229 = vst.msk [vmem:[%s5349_s2 + $0x90] sm:$0xff] %vm210_vm0, %v3056_v0  ;;  %230 = vst.msk [vmem:[%s5349_s2 + $0x98] sm:$0xff] %vm210_vm0, %v3056_v0 }
  0x40   : > { %231 = vst.msk [vmem:[%s5349_s2 + $0xa0] sm:$0xff] %vm210_vm0, %v3056_v0  ;;  %232 = vst.msk [vmem:[%s5349_s2 + $0xa8] sm:$0xff] %vm210_vm0, %v3056_v0 }
  0x41   : > { %233 = vst.msk [vmem:[%s5349_s2 + $0xb0] sm:$0xff] %vm210_vm0, %v3056_v0  ;;  %234 = vst.msk [vmem:[%s5349_s2 + $0xb8] sm:$0xff] %vm210_vm0, %v3056_v0 }
  0x42   : > { %235 = vst.msk [vmem:[%s5349_s2 + $0xc0] sm:$0xff] %vm210_vm0, %v3056_v0  ;;  %236 = vst.msk [vmem:[%s5349_s2 + $0xc8] sm:$0xff] %vm210_vm0, %v3056_v0 }
  0x43   : > { %237 = vst.msk [vmem:[%s5349_s2 + $0xd0] sm:$0xff] %vm210_vm0, %v3056_v0  ;;  %238 = vst.msk [vmem:[%s5349_s2 + $0xd8] sm:$0xff] %vm210_vm0, %v3056_v0 }
  0x44   : > { %239 = vst.msk [vmem:[%s5349_s2 + $0xe0] sm:$0xff] %vm210_vm0, %v3056_v0  ;;  %240 = vst.msk [vmem:[%s5349_s2 + $0xe8] sm:$0xff] %vm210_vm0, %v3056_v0 }
  0x45   : > { %241 = vst.msk [vmem:[%s5349_s2 + $0xf0] sm:$0xff] %vm210_vm0, %v3056_v0  ;;  %242 = vst.msk [vmem:[%s5349_s2 + $0xf8] sm:$0xff] %vm210_vm0, %v3056_v0 }
  0x46   : > { %243 = vst.msk [vmem:[%s5349_s2 + $0x100] sm:$0xff] %vm210_vm0, %v3056_v0  ;;  %244 = vst.msk [vmem:[%s5349_s2 + $0x108] sm:$0xff] %vm210_vm0, %v3056_v0 }
  0x47   : > { %245 = vst.msk [vmem:[%s5349_s2 + $0x110] sm:$0xff] %vm210_vm0, %v3056_v0  ;;  %246 = vst.msk [vmem:[%s5349_s2 + $0x118] sm:$0xff] %vm210_vm0, %v3056_v0 }
  0x48   : > { %247 = vst.msk [vmem:[%s5349_s2 + $0x120] sm:$0xff] %vm210_vm0, %v3056_v0  ;;  %248 = vst.msk [vmem:[%s5349_s2 + $0x128] sm:$0xff] %vm210_vm0, %v3056_v0 }
  0x49   : > { %249 = vst.msk [vmem:[%s5349_s2 + $0x130] sm:$0xff] %vm210_vm0, %v3056_v0  ;;  %250 = vst.msk [vmem:[%s5349_s2 + $0x138] sm:$0xff] %vm210_vm0, %v3056_v0 }
  0x4a   : > { %251 = vst.msk [vmem:[%s5349_s2 + $0x140] sm:$0xff] %vm210_vm0, %v3056_v0  ;;  %252 = vst.msk [vmem:[%s5349_s2 + $0x148] sm:$0xff] %vm210_vm0, %v3056_v0 }
  0x4b   : > { %253 = vst.msk [vmem:[%s5349_s2 + $0x150] sm:$0xff] %vm210_vm0, %v3056_v0  ;;  %254 = vst.msk [vmem:[%s5349_s2 + $0x158] sm:$0xff] %vm210_vm0, %v3056_v0 }
  0x4c   : > { %255 = vst.msk [vmem:[%s5349_s2 + $0x160] sm:$0xff] %vm210_vm0, %v3056_v0  ;;  %256 = vst.msk [vmem:[%s5349_s2 + $0x168] sm:$0xff] %vm210_vm0, %v3056_v0 }
  0x4d   : > { %257 = vst.msk [vmem:[%s5349_s2 + $0x170] sm:$0xff] %vm210_vm0, %v3056_v0  ;;  %258 = vst.msk [vmem:[%s5349_s2 + $0x178] sm:$0xff] %vm210_vm0, %v3056_v0 }
  0x4e   : > { %259 = vst.msk [vmem:[%s5349_s2 + $0x180] sm:$0xff] %vm210_vm0, %v3056_v0  ;;  %260 = vst.msk [vmem:[%s5349_s2 + $0x188] sm:$0xff] %vm210_vm0, %v3056_v0 }
  0x4f   : > { %261 = vst.msk [vmem:[%s5349_s2 + $0x190] sm:$0xff] %vm210_vm0, %v3056_v0  ;;  %262 = vst.msk [vmem:[%s5349_s2 + $0x198] sm:$0xff] %vm210_vm0, %v3056_v0 }
  0x50   : > { %263 = vst.msk [vmem:[%s5349_s2 + $0x1a0] sm:$0xff] %vm210_vm0, %v3056_v0  ;;  %264 = vst.msk [vmem:[%s5349_s2 + $0x1a8] sm:$0xff] %vm210_vm0, %v3056_v0 }
  0x51   : > { %265 = vst.msk [vmem:[%s5349_s2 + $0x1b0] sm:$0xff] %vm210_vm0, %v3056_v0  ;;  %266 = vst.msk [vmem:[%s5349_s2 + $0x1b8] sm:$0xff] %vm210_vm0, %v3056_v0 }
  0x52   : > { %267 = vst.msk [vmem:[%s5349_s2 + $0x1c0] sm:$0xff] %vm210_vm0, %v3056_v0  ;;  %268 = vst.msk [vmem:[%s5349_s2 + $0x1c8] sm:$0xff] %vm210_vm0, %v3056_v0 }
  0x53   : > { %269 = vst.msk [vmem:[%s5349_s2 + $0x1d0] sm:$0xff] %vm210_vm0, %v3056_v0  ;;  %270 = vst.msk [vmem:[%s5349_s2 + $0x1d8] sm:$0xff] %vm210_vm0, %v3056_v0 }
  0x54   : > { %271 = vst.msk [vmem:[%s5349_s2 + $0x1e0] sm:$0xff] %vm210_vm0, %v3056_v0  ;;  %272 = vst.msk [vmem:[%s5349_s2 + $0x1e8] sm:$0xff] %vm210_vm0, %v3056_v0 }
  0x55   : > { %273 = vst.msk [vmem:[%s5349_s2 + $0x1f0] sm:$0xff] %vm210_vm0, %v3056_v0  ;;  %274 = vst.msk [vmem:[%s5349_s2 + $0x1f8] sm:$0xff] %vm210_vm0, %v3056_v0 }
  0x56   : > { %275 = vst.msk [vmem:[%s5349_s2 + $0x200] sm:$0xff] %vm210_vm0, %v3056_v0  ;;  %276 = vst.msk [vmem:[%s5349_s2 + $0x208] sm:$0xff] %vm210_vm0, %v3056_v0 }
  0x57   : > { %277 = vst.msk [vmem:[%s5349_s2 + $0x210] sm:$0xff] %vm210_vm0, %v3056_v0  ;;  %278 = vst.msk [vmem:[%s5349_s2 + $0x218] sm:$0xff] %vm210_vm0, %v3056_v0 }
  0x58   : > { %279 = vst.msk [vmem:[%s5349_s2 + $0x220] sm:$0xff] %vm210_vm0, %v3056_v0  ;;  %280 = vst.msk [vmem:[%s5349_s2 + $0x228] sm:$0xff] %vm210_vm0, %v3056_v0 }
  0x59   : > { %281 = vst.msk [vmem:[%s5349_s2 + $0x230] sm:$0xff] %vm210_vm0, %v3056_v0  ;;  %282 = vst.msk [vmem:[%s5349_s2 + $0x238] sm:$0xff] %vm210_vm0, %v3056_v0 }
  0x5a   : > { %283 = vst.msk [vmem:[%s5349_s2 + $0x240] sm:$0xff] %vm210_vm0, %v3056_v0  ;;  %284 = vst.msk [vmem:[%s5349_s2 + $0x248] sm:$0xff] %vm210_vm0, %v3056_v0 }
  0x5b   : > { %285 = vst.msk [vmem:[%s5349_s2 + $0x250] sm:$0xff] %vm210_vm0, %v3056_v0  ;;  %286 = vst.msk [vmem:[%s5349_s2 + $0x258] sm:$0xff] %vm210_vm0, %v3056_v0 }
  0x5c   : > { %287 = vst.msk [vmem:[%s5349_s2 + $0x260] sm:$0xff] %vm210_vm0, %v3056_v0  ;;  %288 = vst.msk [vmem:[%s5349_s2 + $0x268] sm:$0xff] %vm210_vm0, %v3056_v0 }
  0x5d   : > { %289 = vst.msk [vmem:[%s5349_s2 + $0x270] sm:$0xff] %vm210_vm0, %v3056_v0  ;;  %290 = vst.msk [vmem:[%s5349_s2 + $0x278] sm:$0xff] %vm210_vm0, %v3056_v0 }
  0x5e   : > { %291 = vst.msk [vmem:[%s5349_s2 + $0x280] sm:$0xff] %vm210_vm0, %v3056_v0  ;;  %292 = vst.msk [vmem:[%s5349_s2 + $0x288] sm:$0xff] %vm210_vm0, %v3056_v0 }
  0x5f   : > { %293 = vst.msk [vmem:[%s5349_s2 + $0x290] sm:$0xff] %vm210_vm0, %v3056_v0  ;;  %294 = vst.msk [vmem:[%s5349_s2 + $0x298] sm:$0xff] %vm210_vm0, %v3056_v0 }
  0x60   : > { %295 = vst.msk [vmem:[%s5349_s2 + $0x2a0] sm:$0xff] %vm210_vm0, %v3056_v0  ;;  %296 = vst.msk [vmem:[%s5349_s2 + $0x2a8] sm:$0xff] %vm210_vm0, %v3056_v0 }
  0x61   : > { %297 = vst.msk [vmem:[%s5349_s2 + $0x2b0] sm:$0xff] %vm210_vm0, %v3056_v0  ;;  %298 = vst.msk [vmem:[%s5349_s2 + $0x2b8] sm:$0xff] %vm210_vm0, %v3056_v0 }
  0x62   : > { %299 = vst.msk [vmem:[%s5349_s2 + $0x2c0] sm:$0xff] %vm210_vm0, %v3056_v0  ;;  %300 = vst.msk [vmem:[%s5349_s2 + $0x2c8] sm:$0xff] %vm210_vm0, %v3056_v0 }
  0x63   : > { %301 = vst.msk [vmem:[%s5349_s2 + $0x2d0] sm:$0xff] %vm210_vm0, %v3056_v0  ;;  %302 = vst.msk [vmem:[%s5349_s2 + $0x2d8] sm:$0xff] %vm210_vm0, %v3056_v0 }
  0x64   : > { %303 = vst.msk [vmem:[%s5349_s2 + $0x2e0] sm:$0xff] %vm210_vm0, %v3056_v0  ;;  %304 = vst.msk [vmem:[%s5349_s2 + $0x2e8] sm:$0xff] %vm210_vm0, %v3056_v0 }
  0x65   : > { %305 = vst.msk [vmem:[%s5349_s2 + $0x2f0] sm:$0xff] %vm210_vm0, %v3056_v0  ;;  %306 = vst.msk [vmem:[%s5349_s2 + $0x2f8] sm:$0xff] %vm210_vm0, %v3056_v0 }
  0x66   : > { %307 = vst.msk [vmem:[%s5349_s2 + $0x300] sm:$0xff] %vm210_vm0, %v3056_v0  ;;  %308 = vst.msk [vmem:[%s5349_s2 + $0x308] sm:$0xff] %vm210_vm0, %v3056_v0 }
  0x67   : > { %309 = vst.msk [vmem:[%s5349_s2 + $0x310] sm:$0xff] %vm210_vm0, %v3056_v0  ;;  %310 = vst.msk [vmem:[%s5349_s2 + $0x318] sm:$0xff] %vm210_vm0, %v3056_v0 }
  0x68   : > { %311 = vst.msk [vmem:[%s5349_s2 + $0x320] sm:$0xff] %vm210_vm0, %v3056_v0  ;;  %312 = vst.msk [vmem:[%s5349_s2 + $0x328] sm:$0xff] %vm210_vm0, %v3056_v0 }
  0x69   : > { %313 = vst.msk [vmem:[%s5349_s2 + $0x330] sm:$0xff] %vm210_vm0, %v3056_v0  ;;  %314 = vst.msk [vmem:[%s5349_s2 + $0x338] sm:$0xff] %vm210_vm0, %v3056_v0 }
  0x6a   : > { %315 = vst.msk [vmem:[%s5349_s2 + $0x340] sm:$0xff] %vm210_vm0, %v3056_v0  ;;  %316 = vst.msk [vmem:[%s5349_s2 + $0x348] sm:$0xff] %vm210_vm0, %v3056_v0 }
  0x6b   : > { %317 = vst.msk [vmem:[%s5349_s2 + $0x350] sm:$0xff] %vm210_vm0, %v3056_v0  ;;  %318 = vst.msk [vmem:[%s5349_s2 + $0x358] sm:$0xff] %vm210_vm0, %v3056_v0 }
  0x6c   : > { %319 = vst.msk [vmem:[%s5349_s2 + $0x360] sm:$0xff] %vm210_vm0, %v3056_v0  ;;  %320 = vst.msk [vmem:[%s5349_s2 + $0x368] sm:$0xff] %vm210_vm0, %v3056_v0 }
  0x6d   : > { %321 = vst.msk [vmem:[%s5349_s2 + $0x370] sm:$0xff] %vm210_vm0, %v3056_v0  ;;  %322 = vst.msk [vmem:[%s5349_s2 + $0x378] sm:$0xff] %vm210_vm0, %v3056_v0 }
  0x6e   : > { %323 = vst.msk [vmem:[%s5349_s2 + $0x380] sm:$0xff] %vm210_vm0, %v3056_v0  ;;  %324 = vst.msk [vmem:[%s5349_s2 + $0x388] sm:$0xff] %vm210_vm0, %v3056_v0 }
  0x6f   : > { %325 = vst.msk [vmem:[%s5349_s2 + $0x390] sm:$0xff] %vm210_vm0, %v3056_v0  ;;  %326 = vst.msk [vmem:[%s5349_s2 + $0x398] sm:$0xff] %vm210_vm0, %v3056_v0 }
  0x70   : > { %327 = vst.msk [vmem:[%s5349_s2 + $0x3a0] sm:$0xff] %vm210_vm0, %v3056_v0  ;;  %328 = vst.msk [vmem:[%s5349_s2 + $0x3a8] sm:$0xff] %vm210_vm0, %v3056_v0 }
  0x71   : > { %329 = vst.msk [vmem:[%s5349_s2 + $0x3b0] sm:$0xff] %vm210_vm0, %v3056_v0  ;;  %330 = vst.msk [vmem:[%s5349_s2 + $0x3b8] sm:$0xff] %vm210_vm0, %v3056_v0 }
  0x72   : > { %331 = vst.msk [vmem:[%s5349_s2 + $0x3c0] sm:$0xff] %vm210_vm0, %v3056_v0  ;;  %332 = vst.msk [vmem:[%s5349_s2 + $0x3c8] sm:$0xff] %vm210_vm0, %v3056_v0 }
  0x73   : > { %333 = vst.msk [vmem:[%s5349_s2 + $0x3d0] sm:$0xff] %vm210_vm0, %v3056_v0  ;;  %334 = vst.msk [vmem:[%s5349_s2 + $0x3d8] sm:$0xff] %vm210_vm0, %v3056_v0 }
  0x74   : > { %335 = vst.msk [vmem:[%s5349_s2 + $0x3e0] sm:$0xff] %vm210_vm0, %v3056_v0  ;;  %336 = vst.msk [vmem:[%s5349_s2 + $0x3e8] sm:$0xff] %vm210_vm0, %v3056_v0 }
  0x75   : > { %337 = vst.msk [vmem:[%s5349_s2 + $0x3f0] sm:$0xff] %vm210_vm0, %v3056_v0  ;;  %338 = vst.msk [vmem:[%s5349_s2 + $0x3f8] sm:$0xff] %vm210_vm0, %v3056_v0 }
  0x76 PF: > { %v979_v1 = vld [vmem:[%s3182_s3] sm:$0xff]  ;;  %v980_v2 = vld [vmem:[%s3182_s3 + $0x8] sm:$0xff]  ;;  %v3057_v4 = vmov 0.0|0.0   ;;  %v981_v7 = vld [vmem:[%s3182_s3 + $0x10] sm:$0xff]  ;;  %vm2581_vm1 = vcmask 400384  }
  0x77   : > { %v1011_v3 = vld [vmem:[%s3182_s3 + $0x100] sm:$0xff]  ;;  %2814 = vmatprep.subr.bf16.mxu0 %v3057_v4  ;;  %2862 = vmatprep.subr.bf16.mxu1 %v3057_v4  ;;  %v2815_v5 = vpack.c.bf16 %v980_v2, %v979_v1  ;;  %v1012_v6 = vld [vmem:[%s3182_s3 + $0x108] sm:$0xff]  ;;  %v982_v8 = vld [vmem:[%s3182_s3 + $0x18] sm:$0xff] }
  0x78   : > { %v2863_v9 = vpack.c.bf16 %v1012_v6, %v1011_v3  ;;  %v1013_v10 = vld [vmem:[%s3182_s3 + $0x110] sm:$0xff]  ;;  %v1014_v11 = vld [vmem:[%s3182_s3 + $0x118] sm:$0xff]  ;;  %v2818_v12 = vpack.c.bf16 %v982_v8, %v981_v7  ;;  %v983_v14 = vld [vmem:[%s3182_s3 + $0x20] sm:$0xff] }
  0x79   : > { %2816 = vmatpush1.bf16.msra.mxu0 %v2815_v5  ;;  %v2866_v13 = vpack.c.bf16 %v1014_v11, %v1013_v10  ;;  %v984_v15 = vld [vmem:[%s3182_s3 + $0x28] sm:$0xff]  ;;  %v1015_v16 = vld [vmem:[%s3182_s3 + $0x120] sm:$0xff]  ;;  %v985_v20 = vld [vmem:[%s3182_s3 + $0x30] sm:$0xff] }
  0x7a   : > { %2864 = vmatpush1.bf16.msra.mxu1 %v2863_v9  ;;  %2817 = vmatprep.subr.bf16.mxu0 %v3057_v4  ;;  %v1016_v17 = vld [vmem:[%s3182_s3 + $0x128] sm:$0xff]  ;;  %v2821_v18 = vpack.c.bf16 %v984_v15, %v983_v14  ;;  %v986_v21 = vld [vmem:[%s3182_s3 + $0x38] sm:$0xff]  ;;  %v1017_v22 = vld [vmem:[%s3182_s3 + $0x130] sm:$0xff] }
  0x7b   : > { %2865 = vmatprep.subr.bf16.mxu1 %v3057_v4  ;;  %v2869_v19 = vpack.c.bf16 %v1016_v17, %v1015_v16  ;;  %v1018_v23 = vld [vmem:[%s3182_s3 + $0x138] sm:$0xff]  ;;  %v2824_v24 = vpack.c.bf16 %v986_v21, %v985_v20  ;;  %v987_v26 = vld [vmem:[%s3182_s3 + $0x40] sm:$0xff]  ;;  %v988_v27 = vld [vmem:[%s3182_s3 + $0x48] sm:$0xff] }
  0x7c   : > { %v2872_v25 = vpack.c.bf16 %v1018_v23, %v1017_v22  ;;  %v1019_v28 = vld [vmem:[%s3182_s3 + $0x140] sm:$0xff]  ;;  %v1020_v29 = vld [vmem:[%s3182_s3 + $0x148] sm:$0xff]  ;;  %v2827_v30 = vpack.c.bf16 %v988_v27, %v987_v26  ;;  %v989_v32 = vld [vmem:[%s3182_s3 + $0x50] sm:$0xff] }
  0x7d   : > { %2819 = vmatpush1.bf16.msra.mxu0 %v2818_v12  ;;  %v2875_v31 = vpack.c.bf16 %v1020_v29, %v1019_v28  ;;  %v990_v33 = vld [vmem:[%s3182_s3 + $0x58] sm:$0xff]  ;;  %v1021_v34 = vld [vmem:[%s3182_s3 + $0x150] sm:$0xff]  ;;  %v991_v38 = vld [vmem:[%s3182_s3 + $0x60] sm:$0xff] }
  0x7e   : > { %2867 = vmatpush1.bf16.msra.mxu1 %v2866_v13  ;;  %2820 = vmatprep.subr.bf16.mxu0 %v3057_v4  ;;  %v1022_v35 = vld [vmem:[%s3182_s3 + $0x158] sm:$0xff]  ;;  %v2830_v36 = vpack.c.bf16 %v990_v33, %v989_v32  ;;  %v992_v39 = vld [vmem:[%s3182_s3 + $0x68] sm:$0xff]  ;;  %v1023_v40 = vld [vmem:[%s3182_s3 + $0x160] sm:$0xff] }
  0x7f   : > { %2868 = vmatprep.subr.bf16.mxu1 %v3057_v4  ;;  %v2878_v37 = vpack.c.bf16 %v1022_v35, %v1021_v34  ;;  %v1024_v41 = vld [vmem:[%s3182_s3 + $0x168] sm:$0xff]  ;;  %v470_v43 = vld [vmem:[%s3172_s4 + $0x18] sm:$0xff]  ;;  %v2833_v44 = vpack.c.bf16 %v992_v39, %v991_v38  ;;  %v993_v46 = vld [vmem:[%s3182_s3 + $0x70] sm:$0xff] }
  0x80   : > { %v468_v42 = vld [vmem:[%s3172_s4 + $0x8] sm:$0xff]  ;;  %1812 = vmatprep.mubr.f32.mxu1 %v470_v43  ;;  %v2881_v45 = vpack.c.bf16 %v1024_v41, %v1023_v40  ;;  %v994_v47 = vld [vmem:[%s3182_s3 + $0x78] sm:$0xff]  ;;  %v1025_v48 = vld [vmem:[%s3182_s3 + $0x170] sm:$0xff] }
  0x81   : > { %2822 = vmatpush1.bf16.msra.mxu0 %v2821_v18  ;;  %1107 = vmatprep.mubr.f32.mxu0 %v468_v42  ;;  %v1026_v49 = vld [vmem:[%s3182_s3 + $0x178] sm:$0xff]  ;;  %v2836_v50 = vpack.c.bf16 %v994_v47, %v993_v46  ;;  %v995_v52 = vld [vmem:[%s3182_s3 + $0x80] sm:$0xff]  ;;  %v996_v53 = vld [vmem:[%s3182_s3 + $0x88] sm:$0xff] }
  0x82   : > { %2870 = vmatpush1.bf16.msra.mxu1 %v2869_v19  ;;  %2823 = vmatprep.subr.bf16.mxu0 %v3057_v4  ;;  %v2884_v51 = vpack.c.bf16 %v1026_v49, %v1025_v48  ;;  %v1027_v54 = vld [vmem:[%s3182_s3 + $0x180] sm:$0xff]  ;;  %v1028_v55 = vld [vmem:[%s3182_s3 + $0x188] sm:$0xff]  ;;  %v2839_v56 = vpack.c.bf16 %v996_v53, %v995_v52  ;;  %v997_v58 = vld [vmem:[%s3182_s3 + $0x90] sm:$0xff] }
  0x83   : > { %2871 = vmatprep.subr.bf16.mxu1 %v3057_v4  ;;  %v2887_v57 = vpack.c.bf16 %v1028_v55, %v1027_v54  ;;  %v998_v59 = vld [vmem:[%s3182_s3 + $0x98] sm:$0xff]  ;;  %v1029_v60 = vld [vmem:[%s3182_s3 + $0x190] sm:$0xff]  ;;  %v999_v0 = vld [vmem:[%s3182_s3 + $0xa0] sm:$0xff] }
  0x84   : > { %v1030_v61 = vld [vmem:[%s3182_s3 + $0x198] sm:$0xff]  ;;  %v2842_v62 = vpack.c.bf16 %v998_v59, %v997_v58  ;;  %v1000_v1 = vld [vmem:[%s3182_s3 + $0xa8] sm:$0xff]  ;;  %v1031_v2 = vld [vmem:[%s3182_s3 + $0x1a0] sm:$0xff] }
  0x85   : > { %2825 = vmatpush1.bf16.msra.mxu0 %v2824_v24  ;;  %v2890_v63 = vpack.c.bf16 %v1030_v61, %v1029_v60  ;;  %v1032_v3 = vld [vmem:[%s3182_s3 + $0x1a8] sm:$0xff]  ;;  %v2845_v5 = vpack.c.bf16 %v1000_v1, %v999_v0  ;;  %v1001_v7 = vld [vmem:[%s3182_s3 + $0xb0] sm:$0xff]  ;;  %v1002_v8 = vld [vmem:[%s3182_s3 + $0xb8] sm:$0xff] }
  0x86   : > { %2873 = vmatpush1.bf16.msra.mxu1 %v2872_v25  ;;  %2826 = vmatprep.subr.bf16.mxu0 %v3057_v4  ;;  %v2893_v6 = vpack.c.bf16 %v1032_v3, %v1031_v2  ;;  %v1033_v9 = vld [vmem:[%s3182_s3 + $0x1b0] sm:$0xff]  ;;  %v1034_v10 = vld [vmem:[%s3182_s3 + $0x1b8] sm:$0xff]  ;;  %v2848_v11 = vpack.c.bf16 %v1002_v8, %v1001_v7  ;;  %v1003_v13 = vld [vmem:[%s3182_s3 + $0xc0] sm:$0xff] }
  0x87   : > { %2874 = vmatprep.subr.bf16.mxu1 %v3057_v4  ;;  %v2896_v12 = vpack.c.bf16 %v1034_v10, %v1033_v9  ;;  %v1004_v14 = vld [vmem:[%s3182_s3 + $0xc8] sm:$0xff]  ;;  %v1035_v15 = vld [vmem:[%s3182_s3 + $0x1c0] sm:$0xff]  ;;  %v1005_v19 = vld [vmem:[%s3182_s3 + $0xd0] sm:$0xff] }
  0x88   : > { %v1036_v16 = vld [vmem:[%s3182_s3 + $0x1c8] sm:$0xff]  ;;  %v2851_v17 = vpack.c.bf16 %v1004_v14, %v1003_v13  ;;  %v1006_v20 = vld [vmem:[%s3182_s3 + $0xd8] sm:$0xff]  ;;  %v1037_v21 = vld [vmem:[%s3182_s3 + $0x1d0] sm:$0xff] }
  0x89   : > { %2828 = vmatpush1.bf16.msra.mxu0 %v2827_v30  ;;  %v2899_v18 = vpack.c.bf16 %v1036_v16, %v1035_v15  ;;  %v1038_v22 = vld [vmem:[%s3182_s3 + $0x1d8] sm:$0xff]  ;;  %v2854_v23 = vpack.c.bf16 %v1006_v20, %v1005_v19  ;;  %v1007_v25 = vld [vmem:[%s3182_s3 + $0xe0] sm:$0xff]  ;;  %v1008_v26 = vld [vmem:[%s3182_s3 + $0xe8] sm:$0xff] }
  0x8a   : > { %2876 = vmatpush1.bf16.msra.mxu1 %v2875_v31  ;;  %2829 = vmatprep.subr.bf16.mxu0 %v3057_v4  ;;  %v2902_v24 = vpack.c.bf16 %v1038_v22, %v1037_v21  ;;  %v1039_v27 = vld [vmem:[%s3182_s3 + $0x1e0] sm:$0xff]  ;;  %v1040_v28 = vld [vmem:[%s3182_s3 + $0x1e8] sm:$0xff]  ;;  %v2857_v29 = vpack.c.bf16 %v1008_v26, %v1007_v25  ;;  %v1009_v31 = vld [vmem:[%s3182_s3 + $0xf0] sm:$0xff] }
  0x8b   : > { %2877 = vmatprep.subr.bf16.mxu1 %v3057_v4  ;;  %v2905_v30 = vpack.c.bf16 %v1040_v28, %v1039_v27  ;;  %v1010_v32 = vld [vmem:[%s3182_s3 + $0xf8] sm:$0xff]  ;;  %v1041_v33 = vld [vmem:[%s3182_s3 + $0x1f0] sm:$0xff]  ;;  %v472_v39 = vld [vmem:[%s3172_s4 + $0x28] sm:$0xff] }
  0x8c   : > { %v1042_v34 = vld [vmem:[%s3182_s3 + $0x1f8] sm:$0xff]  ;;  %v2860_v35 = vpack.c.bf16 %v1010_v32, %v1009_v31  ;;  %v469_v38 = vld [vmem:[%s3172_s4 + $0x10] sm:$0xff]  ;;  %v471_v41 = vld [vmem:[%s3172_s4 + $0x20] sm:$0xff] }
  0x8d   : > { %2831 = vmatpush1.bf16.msra.mxu0 %v2830_v36  ;;  %v2908_v36 = vpack.c.bf16 %v1042_v34, %v1041_v33  ;;  %v474_v40 = vld [vmem:[%s3172_s4 + $0x38] sm:$0xff]  ;;  %v473_v42 = vld [vmem:[%s3172_s4 + $0x30] sm:$0xff]  ;;  %v476_v43 = vld [vmem:[%s3172_s4 + $0x48] sm:$0xff] }
  0x8e   : > { %2879 = vmatpush1.bf16.msra.mxu1 %v2878_v37  ;;  %2832 = vmatprep.subr.bf16.mxu0 %v3057_v4  ;;  %v467_v37 = vld [vmem:[%s3172_s4] sm:$0xff]  ;;  %v480_v46 = vld [vmem:[%s3172_s4 + $0x68] sm:$0xff]  ;;  %v482_v47 = vld [vmem:[%s3172_s4 + $0x78] sm:$0xff] }
  0x8f   : > { %2880 = vmatprep.subr.bf16.mxu1 %v3057_v4  ;;  %v479_v48 = vld [vmem:[%s3172_s4 + $0x60] sm:$0xff]  ;;  %v481_v49 = vld [vmem:[%s3172_s4 + $0x70] sm:$0xff]  ;;  %v488_v54 = vld [vmem:[%s3172_s4 + $0xa8] sm:$0xff] }
  0x90   : > { %v483_v52 = vld [vmem:[%s3172_s4 + $0x80] sm:$0xff]  ;;  %v485_v53 = vld [vmem:[%s3172_s4 + $0x90] sm:$0xff]  ;;  %v490_v55 = vld [vmem:[%s3172_s4 + $0xb8] sm:$0xff] }
  0x91   : > { %2834 = vmatpush1.bf16.msra.mxu0 %v2833_v44  ;;  %v475_v44 = vld [vmem:[%s3172_s4 + $0x40] sm:$0xff]  ;;  %v492_v58 = vld [vmem:[%s3172_s4 + $0xc8] sm:$0xff]  ;;  %v494_v59 = vld [vmem:[%s3172_s4 + $0xd8] sm:$0xff] }
  0x92   : > { %2882 = vmatpush1.bf16.msra.mxu1 %v2881_v45  ;;  %2835 = vmatprep.subr.bf16.mxu0 %v3057_v4  ;;  %v477_v45 = vld [vmem:[%s3172_s4 + $0x50] sm:$0xff]  ;;  %v491_v60 = vld [vmem:[%s3172_s4 + $0xc0] sm:$0xff]  ;;  %v500_v2 = vld [vmem:[%s3172_s4 + $0x108] sm:$0xff] }
  0x93   : > { %2883 = vmatprep.subr.bf16.mxu1 %v3057_v4  ;;  %v493_v61 = vld [vmem:[%s3172_s4 + $0xd0] sm:$0xff]  ;;  %v495_v0 = vld [vmem:[%s3172_s4 + $0xe0] sm:$0xff]  ;;  %v502_v3 = vld [vmem:[%s3172_s4 + $0x118] sm:$0xff] }
  0x94   : > { %v497_v1 = vld [vmem:[%s3172_s4 + $0xf0] sm:$0xff]  ;;  %v504_v7 = vld [vmem:[%s3172_s4 + $0x128] sm:$0xff]  ;;  %v506_v8 = vld [vmem:[%s3172_s4 + $0x138] sm:$0xff] }
  0x95   : > { %2837 = vmatpush1.bf16.msra.mxu0 %v2836_v50  ;;  %v484_v50 = vld [vmem:[%s3172_s4 + $0x88] sm:$0xff]  ;;  %v503_v9 = vld [vmem:[%s3172_s4 + $0x120] sm:$0xff]  ;;  %v505_v10 = vld [vmem:[%s3172_s4 + $0x130] sm:$0xff] }
  0x96   : > { %2885 = vmatpush1.bf16.msra.mxu1 %v2884_v51  ;;  %2838 = vmatprep.subr.bf16.mxu0 %v3057_v4  ;;  %v486_v51 = vld [vmem:[%s3172_s4 + $0x98] sm:$0xff]  ;;  %v507_v13 = vld [vmem:[%s3172_s4 + $0x140] sm:$0xff]  ;;  %v509_v14 = vld [vmem:[%s3172_s4 + $0x150] sm:$0xff] }
  0x97   : > { %2886 = vmatprep.subr.bf16.mxu1 %v3057_v4  ;;  %v512_v15 = vld [vmem:[%s3172_s4 + $0x168] sm:$0xff]  ;;  %v514_v16 = vld [vmem:[%s3172_s4 + $0x178] sm:$0xff]  ;;  %v515_v21 = vld [vmem:[%s3172_s4 + $0x180] sm:$0xff] }
  0x98   : > { %v516_v19 = vld [vmem:[%s3172_s4 + $0x188] sm:$0xff]  ;;  %v518_v20 = vld [vmem:[%s3172_s4 + $0x198] sm:$0xff]  ;;  %v517_v22 = vld [vmem:[%s3172_s4 + $0x190] sm:$0xff] }
  0x99   : > { %2840 = vmatpush1.bf16.msra.mxu0 %v2839_v56  ;;  %v487_v56 = vld [vmem:[%s3172_s4 + $0xa0] sm:$0xff]  ;;  %v521_v26 = vld [vmem:[%s3172_s4 + $0x1b0] sm:$0xff]  ;;  %v524_v27 = vld [vmem:[%s3172_s4 + $0x1c8] sm:$0xff] }
  0x9a   : > { %2888 = vmatpush1.bf16.msra.mxu1 %v2887_v57  ;;  %2841 = vmatprep.subr.bf16.mxu0 %v3057_v4  ;;  %v489_v57 = vld [vmem:[%s3172_s4 + $0xb0] sm:$0xff]  ;;  %v519_v25 = vld [vmem:[%s3172_s4 + $0x1a0] sm:$0xff]  ;;  %v526_v28 = vld [vmem:[%s3172_s4 + $0x1d8] sm:$0xff] }
  0x9b   : > { %2889 = vmatprep.subr.bf16.mxu1 %v3057_v4  ;;  %v528_v31 = vld [vmem:[%s3172_s4 + $0x1e8] sm:$0xff]  ;;  %v530_v32 = vld [vmem:[%s3172_s4 + $0x1f8] sm:$0xff]  ;;  %v527_v33 = vld [vmem:[%s3172_s4 + $0x1e0] sm:$0xff] }
  0x9c   : > { %v529_v34 = vld [vmem:[%s3172_s4 + $0x1f0] sm:$0xff] }
  0x9d   : > { %2843 = vmatpush1.bf16.msra.mxu0 %v2842_v62  ;;  %v496_v62 = vld [vmem:[%s3172_s4 + $0xe8] sm:$0xff] }
  0x9e   : > { %2891 = vmatpush1.bf16.msra.mxu1 %v2890_v63  ;;  %2844 = vmatprep.subr.bf16.mxu0 %v3057_v4  ;;  %v498_v63 = vld [vmem:[%s3172_s4 + $0xf8] sm:$0xff] }
  0x9f   : > { %2892 = vmatprep.subr.bf16.mxu1 %v3057_v4 }
  0xa1   : > { %2846 = vmatpush1.bf16.msra.mxu0 %v2845_v5  ;;  %v499_v5 = vld [vmem:[%s3172_s4 + $0x100] sm:$0xff] }
  0xa2   : > { %2894 = vmatpush1.bf16.msra.mxu1 %v2893_v6  ;;  %2847 = vmatprep.subr.bf16.mxu0 %v3057_v4  ;;  %v501_v6 = vld [vmem:[%s3172_s4 + $0x110] sm:$0xff] }
  0xa3   : > { %2895 = vmatprep.subr.bf16.mxu1 %v3057_v4 }
  0xa5   : > { %2849 = vmatpush1.bf16.msra.mxu0 %v2848_v11  ;;  %v508_v11 = vld [vmem:[%s3172_s4 + $0x148] sm:$0xff] }
  0xa6   : > { %2897 = vmatpush1.bf16.msra.mxu1 %v2896_v12  ;;  %2850 = vmatprep.subr.bf16.mxu0 %v3057_v4  ;;  %v510_v12 = vld [vmem:[%s3172_s4 + $0x158] sm:$0xff] }
  0xa7   : > { %2898 = vmatprep.subr.bf16.mxu1 %v3057_v4 }
  0xa9   : > { %2852 = vmatpush1.bf16.msra.mxu0 %v2851_v17  ;;  %v511_v17 = vld [vmem:[%s3172_s4 + $0x160] sm:$0xff] }
  0xaa   : > { %2900 = vmatpush1.bf16.msra.mxu1 %v2899_v18  ;;  %2853 = vmatprep.subr.bf16.mxu0 %v3057_v4  ;;  %v513_v18 = vld [vmem:[%s3172_s4 + $0x170] sm:$0xff] }
  0xab   : > { %2901 = vmatprep.subr.bf16.mxu1 %v3057_v4 }
  0xad   : > { %2855 = vmatpush1.bf16.msra.mxu0 %v2854_v23  ;;  %v520_v23 = vld [vmem:[%s3172_s4 + $0x1a8] sm:$0xff] }
  0xae   : > { %2903 = vmatpush1.bf16.msra.mxu1 %v2902_v24  ;;  %2856 = vmatprep.subr.bf16.mxu0 %v3057_v4  ;;  %v522_v24 = vld [vmem:[%s3172_s4 + $0x1b8] sm:$0xff] }
  0xaf   : > { %2904 = vmatprep.subr.bf16.mxu1 %v3057_v4 }
  0xb1   : > { %2858 = vmatpush1.bf16.msra.mxu0 %v2857_v29  ;;  %v523_v29 = vld [vmem:[%s3172_s4 + $0x1c0] sm:$0xff] }
  0xb2   : > { %2906 = vmatpush1.bf16.msra.mxu1 %v2905_v30  ;;  %2859 = vmatprep.subr.bf16.mxu0 %v3057_v4  ;;  %v525_v30 = vld [vmem:[%s3172_s4 + $0x1d0] sm:$0xff] }
  0xb3   : > { %2907 = vmatprep.subr.bf16.mxu1 %v3057_v4  ;;  %v478_v4 = vld [vmem:[%s3172_s4 + $0x58] sm:$0xff] }
  0xb5   : > { %2861 = vmatpush1.bf16.msra.mxu0 %v2860_v35  ;;  %v532_v35 = vld [vmem:[%s3172_s4 + $0x208] sm:$0xff] }
  0xb6   : > { %2909 = vmatpush1.bf16.msra.mxu1 %v2908_v36  ;;  %v534_v36 = vld [vmem:[%s3172_s4 + $0x218] sm:$0xff] }
  0xb8   : > { %1108 = vmatmul.mubr.f32.vlgmr.msra.gmra.mrb[0].mxu0 %v467_v37  ;;  %v531_v37 = vld [vmem:[%s3172_s4 + $0x200] sm:$0xff] }
  0xb9   : > { %1813 = vmatmul.mubr.f32.vlgmr.msra.gmra.mrb[0].mxu1 %v469_v38  ;;  %1112 = vmatprep.mubr.f32.mxu0 %v472_v39  ;;  %v533_v38 = vld [vmem:[%s3172_s4 + $0x210] sm:$0xff]  ;;  %v536_v39 = vld [vmem:[%s3172_s4 + $0x228] sm:$0xff] }
  0xba   : > { %1817 = vmatprep.mubr.f32.mxu1 %v474_v40  ;;  %v538_v40 = vld [vmem:[%s3172_s4 + $0x238] sm:$0xff] }
  0xbc   : > { %1113 = vmatmul.mubr.f32.gmra.mrb[2].mxu0 %v471_v41  ;;  %v535_v41 = vld [vmem:[%s3172_s4 + $0x220] sm:$0xff] }
  0xbd   : > { %1818 = vmatmul.mubr.f32.gmra.mrb[2].mxu1 %v473_v42  ;;  %1117 = vmatprep.mubr.f32.mxu0 %v476_v43  ;;  %v537_v42 = vld [vmem:[%s3172_s4 + $0x230] sm:$0xff]  ;;  %v540_v43 = vld [vmem:[%s3172_s4 + $0x248] sm:$0xff] }
  0xbe   : > { %1822 = vmatprep.mubr.f32.mxu1 %v478_v4  ;;  %v542_v4 = vld [vmem:[%s3172_s4 + $0x258] sm:$0xff] }
  0xc0   : > { %1118 = vmatmul.mubr.f32.gmra.mrb[4].mxu0 %v475_v44  ;;  %v539_v44 = vld [vmem:[%s3172_s4 + $0x240] sm:$0xff] }
  0xc1   : > { %1823 = vmatmul.mubr.f32.gmra.mrb[4].mxu1 %v477_v45  ;;  %1122 = vmatprep.mubr.f32.mxu0 %v480_v46  ;;  %v541_v45 = vld [vmem:[%s3172_s4 + $0x250] sm:$0xff]  ;;  %v544_v46 = vld [vmem:[%s3172_s4 + $0x268] sm:$0xff] }
  0xc2   : > { %1827 = vmatprep.mubr.f32.mxu1 %v482_v47  ;;  %v546_v47 = vld [vmem:[%s3172_s4 + $0x278] sm:$0xff] }
  0xc4   : > { %1123 = vmatmul.mubr.f32.gmra.mrb[6].mxu0 %v479_v48  ;;  %v543_v48 = vld [vmem:[%s3172_s4 + $0x260] sm:$0xff] }
  0xc5   : > { %1828 = vmatmul.mubr.f32.gmra.mrb[6].mxu1 %v481_v49  ;;  %1127 = vmatprep.mubr.f32.mxu0 %v484_v50  ;;  %v545_v49 = vld [vmem:[%s3172_s4 + $0x270] sm:$0xff]  ;;  %v548_v50 = vld [vmem:[%s3172_s4 + $0x288] sm:$0xff] }
  0xc6   : > { %1832 = vmatprep.mubr.f32.mxu1 %v486_v51  ;;  %v550_v51 = vld [vmem:[%s3172_s4 + $0x298] sm:$0xff] }
  0xc8   : > { %1128 = vmatmul.mubr.f32.gmra.mrb[8].mxu0 %v483_v52  ;;  %v547_v52 = vld [vmem:[%s3172_s4 + $0x280] sm:$0xff] }
  0xc9   : > { %1833 = vmatmul.mubr.f32.gmra.mrb[8].mxu1 %v485_v53  ;;  %1132 = vmatprep.mubr.f32.mxu0 %v488_v54  ;;  %v549_v53 = vld [vmem:[%s3172_s4 + $0x290] sm:$0xff]  ;;  %v552_v54 = vld [vmem:[%s3172_s4 + $0x2a8] sm:$0xff] }
  0xca   : > { %1837 = vmatprep.mubr.f32.mxu1 %v490_v55  ;;  %v554_v55 = vld [vmem:[%s3172_s4 + $0x2b8] sm:$0xff] }
  0xcc   : > { %1133 = vmatmul.mubr.f32.gmra.mrb[10].mxu0 %v487_v56  ;;  %v551_v56 = vld [vmem:[%s3172_s4 + $0x2a0] sm:$0xff] }
  0xcd   : > { %1838 = vmatmul.mubr.f32.gmra.mrb[10].mxu1 %v489_v57  ;;  %1137 = vmatprep.mubr.f32.mxu0 %v492_v58  ;;  %v553_v57 = vld [vmem:[%s3172_s4 + $0x2b0] sm:$0xff]  ;;  %v556_v58 = vld [vmem:[%s3172_s4 + $0x2c8] sm:$0xff] }
  0xce   : > { %1842 = vmatprep.mubr.f32.mxu1 %v494_v59  ;;  %v558_v59 = vld [vmem:[%s3172_s4 + $0x2d8] sm:$0xff] }
  0xd0   : > { %1138 = vmatmul.mubr.f32.gmra.mrb[12].mxu0 %v491_v60  ;;  %v555_v60 = vld [vmem:[%s3172_s4 + $0x2c0] sm:$0xff] }
  0xd1   : > { %1843 = vmatmul.mubr.f32.gmra.mrb[12].mxu1 %v493_v61  ;;  %1142 = vmatprep.mubr.f32.mxu0 %v496_v62  ;;  %v557_v61 = vld [vmem:[%s3172_s4 + $0x2d0] sm:$0xff]  ;;  %v560_v62 = vld [vmem:[%s3172_s4 + $0x2e8] sm:$0xff] }
  0xd2   : > { %1847 = vmatprep.mubr.f32.mxu1 %v498_v63  ;;  %v562_v63 = vld [vmem:[%s3172_s4 + $0x2f8] sm:$0xff] }
  0xd4   : > { %1143 = vmatmul.mubr.f32.gmra.mrb[14].mxu0 %v495_v0  ;;  %v559_v0 = vld [vmem:[%s3172_s4 + $0x2e0] sm:$0xff] }
  0xd5   : > { %1848 = vmatmul.mubr.f32.gmra.mrb[14].mxu1 %v497_v1  ;;  %1147 = vmatprep.mubr.f32.mxu0 %v500_v2  ;;  %v561_v1 = vld [vmem:[%s3172_s4 + $0x2f0] sm:$0xff]  ;;  %v564_v2 = vld [vmem:[%s3172_s4 + $0x308] sm:$0xff] }
  0xd6   : > { %1852 = vmatprep.mubr.f32.mxu1 %v502_v3  ;;  %v566_v3 = vld [vmem:[%s3172_s4 + $0x318] sm:$0xff] }
  0xd8   : > { %1148 = vmatmul.mubr.f32.gmra.mrb[16].mxu0 %v499_v5  ;;  %v563_v5 = vld [vmem:[%s3172_s4 + $0x300] sm:$0xff] }
  0xd9   : > { %1853 = vmatmul.mubr.f32.gmra.mrb[16].mxu1 %v501_v6  ;;  %1152 = vmatprep.mubr.f32.mxu0 %v504_v7  ;;  %v565_v6 = vld [vmem:[%s3172_s4 + $0x310] sm:$0xff]  ;;  %v568_v7 = vld [vmem:[%s3172_s4 + $0x328] sm:$0xff] }
  0xda   : > { %1857 = vmatprep.mubr.f32.mxu1 %v506_v8  ;;  %v570_v8 = vld [vmem:[%s3172_s4 + $0x338] sm:$0xff] }
  0xdc   : > { %1153 = vmatmul.mubr.f32.gmra.mrb[18].mxu0 %v503_v9  ;;  %v567_v9 = vld [vmem:[%s3172_s4 + $0x320] sm:$0xff] }
  0xdd   : > { %1858 = vmatmul.mubr.f32.gmra.mrb[18].mxu1 %v505_v10  ;;  %1157 = vmatprep.mubr.f32.mxu0 %v508_v11  ;;  %v569_v10 = vld [vmem:[%s3172_s4 + $0x330] sm:$0xff]  ;;  %v572_v11 = vld [vmem:[%s3172_s4 + $0x348] sm:$0xff] }
  0xde   : > { %1862 = vmatprep.mubr.f32.mxu1 %v510_v12  ;;  %v574_v12 = vld [vmem:[%s3172_s4 + $0x358] sm:$0xff] }
  0xe0   : > { %1158 = vmatmul.mubr.f32.gmra.mrb[20].mxu0 %v507_v13  ;;  %v571_v13 = vld [vmem:[%s3172_s4 + $0x340] sm:$0xff] }
  0xe1   : > { %1863 = vmatmul.mubr.f32.gmra.mrb[20].mxu1 %v509_v14  ;;  %1162 = vmatprep.mubr.f32.mxu0 %v512_v15  ;;  %v573_v14 = vld [vmem:[%s3172_s4 + $0x350] sm:$0xff]  ;;  %v576_v15 = vld [vmem:[%s3172_s4 + $0x368] sm:$0xff] }
  0xe2   : > { %1867 = vmatprep.mubr.f32.mxu1 %v514_v16  ;;  %v578_v16 = vld [vmem:[%s3172_s4 + $0x378] sm:$0xff] }
  0xe4   : > { %1163 = vmatmul.mubr.f32.gmra.mrb[22].mxu0 %v511_v17  ;;  %v575_v17 = vld [vmem:[%s3172_s4 + $0x360] sm:$0xff] }
  0xe5   : > { %1868 = vmatmul.mubr.f32.gmra.mrb[22].mxu1 %v513_v18  ;;  %1167 = vmatprep.mubr.f32.mxu0 %v516_v19  ;;  %v577_v18 = vld [vmem:[%s3172_s4 + $0x370] sm:$0xff]  ;;  %v580_v19 = vld [vmem:[%s3172_s4 + $0x388] sm:$0xff] }
  0xe6   : > { %1872 = vmatprep.mubr.f32.mxu1 %v518_v20  ;;  %v582_v20 = vld [vmem:[%s3172_s4 + $0x398] sm:$0xff] }
  0xe8   : > { %1168 = vmatmul.mubr.f32.gmra.mrb[24].mxu0 %v515_v21  ;;  %v579_v21 = vld [vmem:[%s3172_s4 + $0x380] sm:$0xff] }
  0xe9   : > { %1873 = vmatmul.mubr.f32.gmra.mrb[24].mxu1 %v517_v22  ;;  %1172 = vmatprep.mubr.f32.mxu0 %v520_v23  ;;  %v581_v22 = vld [vmem:[%s3172_s4 + $0x390] sm:$0xff]  ;;  %v584_v23 = vld [vmem:[%s3172_s4 + $0x3a8] sm:$0xff] }
  0xea   : > { %1877 = vmatprep.mubr.f32.mxu1 %v522_v24  ;;  %v586_v24 = vld [vmem:[%s3172_s4 + $0x3b8] sm:$0xff] }
  0xec   : > { %1173 = vmatmul.mubr.f32.gmra.mrb[26].mxu0 %v519_v25  ;;  %v583_v25 = vld [vmem:[%s3172_s4 + $0x3a0] sm:$0xff] }
  0xed   : > { %1878 = vmatmul.mubr.f32.gmra.mrb[26].mxu1 %v521_v26  ;;  %1177 = vmatprep.mubr.f32.mxu0 %v524_v27  ;;  %v585_v26 = vld [vmem:[%s3172_s4 + $0x3b0] sm:$0xff]  ;;  %v588_v27 = vld [vmem:[%s3172_s4 + $0x3c8] sm:$0xff] }
  0xee   : > { %1882 = vmatprep.mubr.f32.mxu1 %v526_v28  ;;  %v590_v28 = vld [vmem:[%s3172_s4 + $0x3d8] sm:$0xff] }
  0xf0   : > { %1178 = vmatmul.mubr.f32.gmra.mrb[28].mxu0 %v523_v29  ;;  %v587_v29 = vld [vmem:[%s3172_s4 + $0x3c0] sm:$0xff] }
  0xf1   : > { %1883 = vmatmul.mubr.f32.gmra.mrb[28].mxu1 %v525_v30  ;;  %1182 = vmatprep.mubr.f32.mxu0 %v528_v31  ;;  %v589_v30 = vld [vmem:[%s3172_s4 + $0x3d0] sm:$0xff]  ;;  %v592_v31 = vld [vmem:[%s3172_s4 + $0x3e8] sm:$0xff] }
  0xf2   : > { %1887 = vmatprep.mubr.f32.mxu1 %v530_v32  ;;  %v594_v32 = vld [vmem:[%s3172_s4 + $0x3f8] sm:$0xff] }
  0xf4   : > { %1183 = vmatmul.mubr.f32.gmra.mrb[30].mxu0 %v527_v33  ;;  %v591_v33 = vld [vmem:[%s3172_s4 + $0x3e0] sm:$0xff] }
  0xf5   : > { %1888 = vmatmul.mubr.f32.gmra.mrb[30].mxu1 %v529_v34  ;;  %1187 = vmatprep.mubr.f32.mxu0 %v532_v35  ;;  %v593_v34 = vld [vmem:[%s3172_s4 + $0x3f0] sm:$0xff]  ;;  %v596_v35 = vld [vmem:[%s3172_s4 + $0x408] sm:$0xff] }
  0xf6   : > { %1892 = vmatprep.mubr.f32.mxu1 %v534_v36  ;;  %v598_v36 = vld [vmem:[%s3172_s4 + $0x418] sm:$0xff] }
  0xf8   : > { %1188 = vmatmul.mubr.f32.gmra.mrb[32].mxu0 %v531_v37  ;;  %v595_v37 = vld [vmem:[%s3172_s4 + $0x400] sm:$0xff] }
  0xf9   : > { %1893 = vmatmul.mubr.f32.gmra.mrb[32].mxu1 %v533_v38  ;;  %1192 = vmatprep.mubr.f32.mxu0 %v536_v39  ;;  %v597_v38 = vld [vmem:[%s3172_s4 + $0x410] sm:$0xff]  ;;  %v600_v39 = vld [vmem:[%s3172_s4 + $0x428] sm:$0xff] }
  0xfa   : > { %1897 = vmatprep.mubr.f32.mxu1 %v538_v40  ;;  %v602_v40 = vld [vmem:[%s3172_s4 + $0x438] sm:$0xff] }
  0xfc   : > { %1193 = vmatmul.mubr.f32.gmra.mrb[34].mxu0 %v535_v41  ;;  %v599_v41 = vld [vmem:[%s3172_s4 + $0x420] sm:$0xff] }
  0xfd   : > { %1898 = vmatmul.mubr.f32.gmra.mrb[34].mxu1 %v537_v42  ;;  %1197 = vmatprep.mubr.f32.mxu0 %v540_v43  ;;  %v601_v42 = vld [vmem:[%s3172_s4 + $0x430] sm:$0xff]  ;;  %v604_v43 = vld [vmem:[%s3172_s4 + $0x448] sm:$0xff] }
  0xfe   : > { %1902 = vmatprep.mubr.f32.mxu1 %v542_v4  ;;  %v606_v4 = vld [vmem:[%s3172_s4 + $0x458] sm:$0xff] }
 0x100   : > { %1198 = vmatmul.mubr.f32.gmra.mrb[36].mxu0 %v539_v44  ;;  %v603_v44 = vld [vmem:[%s3172_s4 + $0x440] sm:$0xff] }
 0x101   : > { %1903 = vmatmul.mubr.f32.gmra.mrb[36].mxu1 %v541_v45  ;;  %1202 = vmatprep.mubr.f32.mxu0 %v544_v46  ;;  %v605_v45 = vld [vmem:[%s3172_s4 + $0x450] sm:$0xff]  ;;  %v608_v46 = vld [vmem:[%s3172_s4 + $0x468] sm:$0xff] }
 0x102   : > { %1907 = vmatprep.mubr.f32.mxu1 %v546_v47  ;;  %v610_v47 = vld [vmem:[%s3172_s4 + $0x478] sm:$0xff] }
 0x104   : > { %1203 = vmatmul.mubr.f32.gmra.mrb[38].mxu0 %v543_v48  ;;  %v607_v48 = vld [vmem:[%s3172_s4 + $0x460] sm:$0xff] }
 0x105   : > { %1908 = vmatmul.mubr.f32.gmra.mrb[38].mxu1 %v545_v49  ;;  %1207 = vmatprep.mubr.f32.mxu0 %v548_v50  ;;  %v609_v49 = vld [vmem:[%s3172_s4 + $0x470] sm:$0xff]  ;;  %v612_v50 = vld [vmem:[%s3172_s4 + $0x488] sm:$0xff] }
 0x106   : > { %1912 = vmatprep.mubr.f32.mxu1 %v550_v51  ;;  %v614_v51 = vld [vmem:[%s3172_s4 + $0x498] sm:$0xff] }
 0x108   : > { %1208 = vmatmul.mubr.f32.gmra.mrb[40].mxu0 %v547_v52  ;;  %v611_v52 = vld [vmem:[%s3172_s4 + $0x480] sm:$0xff] }
 0x109   : > { %1913 = vmatmul.mubr.f32.gmra.mrb[40].mxu1 %v549_v53  ;;  %1212 = vmatprep.mubr.f32.mxu0 %v552_v54  ;;  %v613_v53 = vld [vmem:[%s3172_s4 + $0x490] sm:$0xff]  ;;  %v616_v54 = vld [vmem:[%s3172_s4 + $0x4a8] sm:$0xff] }
 0x10a   : > { %1917 = vmatprep.mubr.f32.mxu1 %v554_v55  ;;  %v618_v55 = vld [vmem:[%s3172_s4 + $0x4b8] sm:$0xff] }
 0x10c   : > { %1213 = vmatmul.mubr.f32.gmra.mrb[42].mxu0 %v551_v56  ;;  %v615_v56 = vld [vmem:[%s3172_s4 + $0x4a0] sm:$0xff] }
 0x10d   : > { %1918 = vmatmul.mubr.f32.gmra.mrb[42].mxu1 %v553_v57  ;;  %1217 = vmatprep.mubr.f32.mxu0 %v556_v58  ;;  %v617_v57 = vld [vmem:[%s3172_s4 + $0x4b0] sm:$0xff]  ;;  %v620_v58 = vld [vmem:[%s3172_s4 + $0x4c8] sm:$0xff] }
 0x10e   : > { %1922 = vmatprep.mubr.f32.mxu1 %v558_v59  ;;  %v622_v59 = vld [vmem:[%s3172_s4 + $0x4d8] sm:$0xff] }
 0x110   : > { %1218 = vmatmul.mubr.f32.gmra.mrb[44].mxu0 %v555_v60  ;;  %v619_v60 = vld [vmem:[%s3172_s4 + $0x4c0] sm:$0xff] }
 0x111   : > { %1923 = vmatmul.mubr.f32.gmra.mrb[44].mxu1 %v557_v61  ;;  %1222 = vmatprep.mubr.f32.mxu0 %v560_v62  ;;  %v621_v61 = vld [vmem:[%s3172_s4 + $0x4d0] sm:$0xff]  ;;  %v624_v62 = vld [vmem:[%s3172_s4 + $0x4e8] sm:$0xff] }
 0x112   : > { %1927 = vmatprep.mubr.f32.mxu1 %v562_v63  ;;  %v626_v63 = vld [vmem:[%s3172_s4 + $0x4f8] sm:$0xff] }
 0x114   : > { %1223 = vmatmul.mubr.f32.gmra.mrb[46].mxu0 %v559_v0  ;;  %v623_v0 = vld [vmem:[%s3172_s4 + $0x4e0] sm:$0xff] }
 0x115   : > { %1928 = vmatmul.mubr.f32.gmra.mrb[46].mxu1 %v561_v1  ;;  %1227 = vmatprep.mubr.f32.mxu0 %v564_v2  ;;  %v625_v1 = vld [vmem:[%s3172_s4 + $0x4f0] sm:$0xff]  ;;  %v628_v2 = vld [vmem:[%s3172_s4 + $0x508] sm:$0xff] }
 0x116   : > { %1932 = vmatprep.mubr.f32.mxu1 %v566_v3  ;;  %v630_v3 = vld [vmem:[%s3172_s4 + $0x518] sm:$0xff] }
 0x118   : > { %1228 = vmatmul.mubr.f32.gmra.mrb[48].mxu0 %v563_v5  ;;  %v627_v5 = vld [vmem:[%s3172_s4 + $0x500] sm:$0xff] }
 0x119   : > { %1933 = vmatmul.mubr.f32.gmra.mrb[48].mxu1 %v565_v6  ;;  %1232 = vmatprep.mubr.f32.mxu0 %v568_v7  ;;  %v629_v6 = vld [vmem:[%s3172_s4 + $0x510] sm:$0xff]  ;;  %v632_v7 = vld [vmem:[%s3172_s4 + $0x528] sm:$0xff] }
 0x11a   : > { %1937 = vmatprep.mubr.f32.mxu1 %v570_v8  ;;  %v634_v8 = vld [vmem:[%s3172_s4 + $0x538] sm:$0xff] }
 0x11c   : > { %1233 = vmatmul.mubr.f32.gmra.mrb[50].mxu0 %v567_v9  ;;  %v631_v9 = vld [vmem:[%s3172_s4 + $0x520] sm:$0xff] }
 0x11d   : > { %1938 = vmatmul.mubr.f32.gmra.mrb[50].mxu1 %v569_v10  ;;  %1237 = vmatprep.mubr.f32.mxu0 %v572_v11  ;;  %v633_v10 = vld [vmem:[%s3172_s4 + $0x530] sm:$0xff]  ;;  %v636_v11 = vld [vmem:[%s3172_s4 + $0x548] sm:$0xff] }
 0x11e   : > { %1942 = vmatprep.mubr.f32.mxu1 %v574_v12  ;;  %v638_v12 = vld [vmem:[%s3172_s4 + $0x558] sm:$0xff] }
 0x120   : > { %1238 = vmatmul.mubr.f32.gmra.mrb[52].mxu0 %v571_v13  ;;  %v635_v13 = vld [vmem:[%s3172_s4 + $0x540] sm:$0xff] }
 0x121   : > { %1943 = vmatmul.mubr.f32.gmra.mrb[52].mxu1 %v573_v14  ;;  %1242 = vmatprep.mubr.f32.mxu0 %v576_v15  ;;  %v637_v14 = vld [vmem:[%s3172_s4 + $0x550] sm:$0xff]  ;;  %v640_v15 = vld [vmem:[%s3172_s4 + $0x568] sm:$0xff] }
 0x122   : > { %1947 = vmatprep.mubr.f32.mxu1 %v578_v16  ;;  %v642_v16 = vld [vmem:[%s3172_s4 + $0x578] sm:$0xff] }
 0x124   : > { %1243 = vmatmul.mubr.f32.gmra.mrb[54].mxu0 %v575_v17  ;;  %v639_v17 = vld [vmem:[%s3172_s4 + $0x560] sm:$0xff] }
 0x125   : > { %1948 = vmatmul.mubr.f32.gmra.mrb[54].mxu1 %v577_v18  ;;  %1247 = vmatprep.mubr.f32.mxu0 %v580_v19  ;;  %v641_v18 = vld [vmem:[%s3172_s4 + $0x570] sm:$0xff]  ;;  %v644_v19 = vld [vmem:[%s3172_s4 + $0x588] sm:$0xff] }
 0x126   : > { %1952 = vmatprep.mubr.f32.mxu1 %v582_v20  ;;  %v646_v20 = vld [vmem:[%s3172_s4 + $0x598] sm:$0xff] }
 0x128   : > { %1248 = vmatmul.mubr.f32.gmra.mrb[56].mxu0 %v579_v21  ;;  %v643_v21 = vld [vmem:[%s3172_s4 + $0x580] sm:$0xff] }
 0x129   : > { %1953 = vmatmul.mubr.f32.gmra.mrb[56].mxu1 %v581_v22  ;;  %1252 = vmatprep.mubr.f32.mxu0 %v584_v23  ;;  %v645_v22 = vld [vmem:[%s3172_s4 + $0x590] sm:$0xff]  ;;  %v648_v23 = vld [vmem:[%s3172_s4 + $0x5a8] sm:$0xff] }
 0x12a   : > { %1957 = vmatprep.mubr.f32.mxu1 %v586_v24  ;;  %v650_v24 = vld [vmem:[%s3172_s4 + $0x5b8] sm:$0xff] }
 0x12c   : > { %1253 = vmatmul.mubr.f32.gmra.mrb[58].mxu0 %v583_v25  ;;  %v647_v25 = vld [vmem:[%s3172_s4 + $0x5a0] sm:$0xff] }
 0x12d   : > { %1958 = vmatmul.mubr.f32.gmra.mrb[58].mxu1 %v585_v26  ;;  %1257 = vmatprep.mubr.f32.mxu0 %v588_v27  ;;  %v649_v26 = vld [vmem:[%s3172_s4 + $0x5b0] sm:$0xff]  ;;  %v652_v27 = vld [vmem:[%s3172_s4 + $0x5c8] sm:$0xff] }
 0x12e   : > { %1962 = vmatprep.mubr.f32.mxu1 %v590_v28  ;;  %v654_v28 = vld [vmem:[%s3172_s4 + $0x5d8] sm:$0xff] }
 0x130   : > { %1258 = vmatmul.mubr.f32.gmra.mrb[60].mxu0 %v587_v29  ;;  %v651_v29 = vld [vmem:[%s3172_s4 + $0x5c0] sm:$0xff] }
 0x131   : > { %1963 = vmatmul.mubr.f32.gmra.mrb[60].mxu1 %v589_v30  ;;  %1262 = vmatprep.mubr.f32.mxu0 %v592_v31  ;;  %v653_v30 = vld [vmem:[%s3172_s4 + $0x5d0] sm:$0xff]  ;;  %v656_v31 = vld [vmem:[%s3172_s4 + $0x5e8] sm:$0xff] }
 0x132   : > { %1967 = vmatprep.mubr.f32.mxu1 %v594_v32  ;;  %v658_v32 = vld [vmem:[%s3172_s4 + $0x5f8] sm:$0xff] }
 0x134   : > { %1263 = vmatmul.mubr.f32.gmra.mrb[62].mxu0 %v591_v33  ;;  %v655_v33 = vld [vmem:[%s3172_s4 + $0x5e0] sm:$0xff] }
 0x135   : > { %1968 = vmatmul.mubr.f32.gmra.mrb[62].mxu1 %v593_v34  ;;  %1267 = vmatprep.mubr.f32.mxu0 %v596_v35  ;;  %v657_v34 = vld [vmem:[%s3172_s4 + $0x5f0] sm:$0xff]  ;;  %v660_v35 = vld [vmem:[%s3172_s4 + $0x608] sm:$0xff] }
 0x136   : > { %1972 = vmatprep.mubr.f32.mxu1 %v598_v36  ;;  %v662_v36 = vld [vmem:[%s3172_s4 + $0x618] sm:$0xff] }
 0x138   : > { %1268 = vmatmul.mubr.f32.gmra.mrb[64].mxu0 %v595_v37  ;;  %v659_v37 = vld [vmem:[%s3172_s4 + $0x600] sm:$0xff] }
 0x139   : > { %1973 = vmatmul.mubr.f32.gmra.mrb[64].mxu1 %v597_v38  ;;  %1272 = vmatprep.mubr.f32.mxu0 %v600_v39  ;;  %v661_v38 = vld [vmem:[%s3172_s4 + $0x610] sm:$0xff]  ;;  %v664_v39 = vld [vmem:[%s3172_s4 + $0x628] sm:$0xff] }
 0x13a   : > { %1977 = vmatprep.mubr.f32.mxu1 %v602_v40  ;;  %v666_v40 = vld [vmem:[%s3172_s4 + $0x638] sm:$0xff] }
 0x13c   : > { %1273 = vmatmul.mubr.f32.gmra.mrb[66].mxu0 %v599_v41  ;;  %v663_v41 = vld [vmem:[%s3172_s4 + $0x620] sm:$0xff] }
 0x13d   : > { %1978 = vmatmul.mubr.f32.gmra.mrb[66].mxu1 %v601_v42  ;;  %1277 = vmatprep.mubr.f32.mxu0 %v604_v43  ;;  %v665_v42 = vld [vmem:[%s3172_s4 + $0x630] sm:$0xff]  ;;  %v668_v43 = vld [vmem:[%s3172_s4 + $0x648] sm:$0xff] }
 0x13e   : > { %1982 = vmatprep.mubr.f32.mxu1 %v606_v4  ;;  %v670_v4 = vld [vmem:[%s3172_s4 + $0x658] sm:$0xff] }
 0x140   : > { %1278 = vmatmul.mubr.f32.gmra.mrb[68].mxu0 %v603_v44  ;;  %v667_v44 = vld [vmem:[%s3172_s4 + $0x640] sm:$0xff] }
 0x141   : > { %1983 = vmatmul.mubr.f32.gmra.mrb[68].mxu1 %v605_v45  ;;  %1282 = vmatprep.mubr.f32.mxu0 %v608_v46  ;;  %v669_v45 = vld [vmem:[%s3172_s4 + $0x650] sm:$0xff]  ;;  %v672_v46 = vld [vmem:[%s3172_s4 + $0x668] sm:$0xff] }
 0x142   : > { %1987 = vmatprep.mubr.f32.mxu1 %v610_v47  ;;  %v674_v47 = vld [vmem:[%s3172_s4 + $0x678] sm:$0xff] }
 0x144   : > { %1283 = vmatmul.mubr.f32.gmra.mrb[70].mxu0 %v607_v48  ;;  %v671_v48 = vld [vmem:[%s3172_s4 + $0x660] sm:$0xff] }
 0x145   : > { %1988 = vmatmul.mubr.f32.gmra.mrb[70].mxu1 %v609_v49  ;;  %1287 = vmatprep.mubr.f32.mxu0 %v612_v50  ;;  %v673_v49 = vld [vmem:[%s3172_s4 + $0x670] sm:$0xff]  ;;  %v676_v50 = vld [vmem:[%s3172_s4 + $0x688] sm:$0xff] }
 0x146   : > { %1992 = vmatprep.mubr.f32.mxu1 %v614_v51  ;;  %v678_v51 = vld [vmem:[%s3172_s4 + $0x698] sm:$0xff] }
 0x148   : > { %1288 = vmatmul.mubr.f32.gmra.mrb[72].mxu0 %v611_v52  ;;  %v675_v52 = vld [vmem:[%s3172_s4 + $0x680] sm:$0xff] }
 0x149   : > { %1993 = vmatmul.mubr.f32.gmra.mrb[72].mxu1 %v613_v53  ;;  %1292 = vmatprep.mubr.f32.mxu0 %v616_v54  ;;  %v677_v53 = vld [vmem:[%s3172_s4 + $0x690] sm:$0xff]  ;;  %v680_v54 = vld [vmem:[%s3172_s4 + $0x6a8] sm:$0xff] }
 0x14a   : > { %1997 = vmatprep.mubr.f32.mxu1 %v618_v55  ;;  %v682_v55 = vld [vmem:[%s3172_s4 + $0x6b8] sm:$0xff] }
 0x14c   : > { %1293 = vmatmul.mubr.f32.gmra.mrb[74].mxu0 %v615_v56  ;;  %v679_v56 = vld [vmem:[%s3172_s4 + $0x6a0] sm:$0xff] }
 0x14d   : > { %1998 = vmatmul.mubr.f32.gmra.mrb[74].mxu1 %v617_v57  ;;  %1297 = vmatprep.mubr.f32.mxu0 %v620_v58  ;;  %v681_v57 = vld [vmem:[%s3172_s4 + $0x6b0] sm:$0xff]  ;;  %v684_v58 = vld [vmem:[%s3172_s4 + $0x6c8] sm:$0xff] }
 0x14e   : > { %2002 = vmatprep.mubr.f32.mxu1 %v622_v59 }
 0x150   : > { %1298 = vmatmul.mubr.f32.gmra.mrb[76].mxu0 %v619_v60  ;;  %v686_v60 = vld [vmem:[%s3172_s4 + $0x6d8] sm:$0xff] }
 0x151   : > { %2003 = vmatmul.mubr.f32.gmra.mrb[76].mxu1 %v621_v61  ;;  %1302 = vmatprep.mubr.f32.mxu0 %v624_v62  ;;  %v339_v61 = vld [vmem:[%s5349_s2] sm:$0xff] }
 0x152   : > { %2007 = vmatprep.mubr.f32.mxu1 %v626_v63 }
 0x154   : > { %1303 = vmatmul.mubr.f32.gmra.mrb[78].mxu0 %v623_v0 }
 0x155   : > { %2008 = vmatmul.mubr.f32.gmra.mrb[78].mxu1 %v625_v1  ;;  %1307 = vmatprep.mubr.f32.mxu0 %v628_v2  ;;  %v683_v2 = vld [vmem:[%s3172_s4 + $0x6c0] sm:$0xff] }
 0x156   : > { %2012 = vmatprep.mubr.f32.mxu1 %v630_v3  ;;  %v685_v3 = vld [vmem:[%s3172_s4 + $0x6d0] sm:$0xff] }
 0x158   : > { %1308 = vmatmul.mubr.f32.gmra.mrb[80].mxu0 %v627_v5  ;;  %v688_v5 = vld [vmem:[%s3172_s4 + $0x6e8] sm:$0xff] }
 0x159   : > { %2013 = vmatmul.mubr.f32.gmra.mrb[80].mxu1 %v629_v6  ;;  %1312 = vmatprep.mubr.f32.mxu0 %v632_v7 }
 0x15a   : > { %2017 = vmatprep.mubr.f32.mxu1 %v634_v8  ;;  %v690_v8 = vld [vmem:[%s3172_s4 + $0x6f8] sm:$0xff] }
 0x15c   : > { %1313 = vmatmul.mubr.f32.gmra.mrb[82].mxu0 %v631_v9  ;;  %v340_v9 = vld [vmem:[%s5349_s2 + $0x8] sm:$0xff] }
 0x15d   : > { %2018 = vmatmul.mubr.f32.gmra.mrb[82].mxu1 %v633_v10  ;;  %1317 = vmatprep.mubr.f32.mxu0 %v636_v11 }
 0x15e   : > { %2022 = vmatprep.mubr.f32.mxu1 %v638_v12 }
 0x160   : > { %1318 = vmatmul.mubr.f32.gmra.mrb[84].mxu0 %v635_v13 }
 0x161   : > { %2023 = vmatmul.mubr.f32.gmra.mrb[84].mxu1 %v637_v14  ;;  %1322 = vmatprep.mubr.f32.mxu0 %v640_v15  ;;  %v687_v14 = vld [vmem:[%s3172_s4 + $0x6e0] sm:$0xff]  ;;  %v689_v15 = vld [vmem:[%s3172_s4 + $0x6f0] sm:$0xff] }
 0x162   : > { %2027 = vmatprep.mubr.f32.mxu1 %v642_v16  ;;  %v692_v16 = vld [vmem:[%s3172_s4 + $0x708] sm:$0xff] }
 0x164   : > { %1323 = vmatmul.mubr.f32.gmra.mrb[86].mxu0 %v639_v17 }
 0x165   : > { %2028 = vmatmul.mubr.f32.gmra.mrb[86].mxu1 %v641_v18  ;;  %1327 = vmatprep.mubr.f32.mxu0 %v644_v19  ;;  %v694_v19 = vld [vmem:[%s3172_s4 + $0x718] sm:$0xff] }
 0x166   : > { %2032 = vmatprep.mubr.f32.mxu1 %v646_v20  ;;  %v341_v20 = vld [vmem:[%s5349_s2 + $0x10] sm:$0xff] }
 0x168   : > { %1328 = vmatmul.mubr.f32.gmra.mrb[88].mxu0 %v643_v21 }
 0x169   : > { %2033 = vmatmul.mubr.f32.gmra.mrb[88].mxu1 %v645_v22  ;;  %1332 = vmatprep.mubr.f32.mxu0 %v648_v23 }
 0x16a   : > { %2037 = vmatprep.mubr.f32.mxu1 %v650_v24 }
 0x16c   : > { %1333 = vmatmul.mubr.f32.gmra.mrb[90].mxu0 %v647_v25  ;;  %v691_v25 = vld [vmem:[%s3172_s4 + $0x700] sm:$0xff] }
 0x16d   : > { %2038 = vmatmul.mubr.f32.gmra.mrb[90].mxu1 %v649_v26  ;;  %1337 = vmatprep.mubr.f32.mxu0 %v652_v27  ;;  %v693_v26 = vld [vmem:[%s3172_s4 + $0x710] sm:$0xff]  ;;  %v696_v27 = vld [vmem:[%s3172_s4 + $0x728] sm:$0xff] }
 0x16e   : > { %2042 = vmatprep.mubr.f32.mxu1 %v654_v28 }
 0x170   : > { %1338 = vmatmul.mubr.f32.gmra.mrb[92].mxu0 %v651_v29 }
 0x171   : > { %2043 = vmatmul.mubr.f32.gmra.mrb[92].mxu1 %v653_v30  ;;  %1342 = vmatprep.mubr.f32.mxu0 %v656_v31  ;;  %v698_v30 = vld [vmem:[%s3172_s4 + $0x738] sm:$0xff] }
 0x172   : > { %2047 = vmatprep.mubr.f32.mxu1 %v658_v32  ;;  %v342_v31 = vld [vmem:[%s5349_s2 + $0x18] sm:$0xff] }
 0x174   : > { %1343 = vmatmul.mubr.f32.gmra.mrb[94].mxu0 %v655_v33 }
 0x175   : > { %2048 = vmatmul.mubr.f32.gmra.mrb[94].mxu1 %v657_v34  ;;  %1347 = vmatprep.mubr.f32.mxu0 %v660_v35 }
 0x176   : > { %2052 = vmatprep.mubr.f32.mxu1 %v662_v36  ;;  %v695_v36 = vld [vmem:[%s3172_s4 + $0x720] sm:$0xff] }
 0x178   : > { %1348 = vmatmul.mubr.f32.gmra.mrb[96].mxu0 %v659_v37  ;;  %v697_v37 = vld [vmem:[%s3172_s4 + $0x730] sm:$0xff] }
 0x179   : > { %2053 = vmatmul.mubr.f32.gmra.mrb[96].mxu1 %v661_v38  ;;  %1352 = vmatprep.mubr.f32.mxu0 %v664_v39  ;;  %v700_v38 = vld [vmem:[%s3172_s4 + $0x748] sm:$0xff] }
 0x17a   : > { %2057 = vmatprep.mubr.f32.mxu1 %v666_v40 }
 0x17c   : > { %1353 = vmatmul.mubr.f32.gmra.mrb[98].mxu0 %v663_v41  ;;  %v702_v41 = vld [vmem:[%s3172_s4 + $0x758] sm:$0xff] }
 0x17d   : > { %2058 = vmatmul.mubr.f32.gmra.mrb[98].mxu1 %v665_v42  ;;  %1357 = vmatprep.mubr.f32.mxu0 %v668_v43  ;;  %v343_v42 = vld [vmem:[%s5349_s2 + $0x20] sm:$0xff] }
 0x17e   : > { %2062 = vmatprep.mubr.f32.mxu1 %v670_v4 }
 0x180   : > { %1358 = vmatmul.mubr.f32.gmra.mrb[100].mxu0 %v667_v44 }
 0x181   : > { %2063 = vmatmul.mubr.f32.gmra.mrb[100].mxu1 %v669_v45  ;;  %1362 = vmatprep.mubr.f32.mxu0 %v672_v46  ;;  %v699_v46 = vld [vmem:[%s3172_s4 + $0x740] sm:$0xff] }
 0x182   : > { %2067 = vmatprep.mubr.f32.mxu1 %v674_v47  ;;  %v701_v47 = vld [vmem:[%s3172_s4 + $0x750] sm:$0xff] }
 0x184   : > { %1363 = vmatmul.mubr.f32.gmra.mrb[102].mxu0 %v671_v48  ;;  %v704_v48 = vld [vmem:[%s3172_s4 + $0x768] sm:$0xff] }
 0x185   : > { %2068 = vmatmul.mubr.f32.gmra.mrb[102].mxu1 %v673_v49  ;;  %1367 = vmatprep.mubr.f32.mxu0 %v676_v50 }
 0x186   : > { %2072 = vmatprep.mubr.f32.mxu1 %v678_v51  ;;  %v706_v51 = vld [vmem:[%s3172_s4 + $0x778] sm:$0xff] }
 0x188   : > { %1368 = vmatmul.mubr.f32.gmra.mrb[104].mxu0 %v675_v52  ;;  %v344_v52 = vld [vmem:[%s5349_s2 + $0x28] sm:$0xff] }
 0x189   : > { %2073 = vmatmul.mubr.f32.gmra.mrb[104].mxu1 %v677_v53  ;;  %1372 = vmatprep.mubr.f32.mxu0 %v680_v54 }
 0x18a   : > { %2077 = vmatprep.mubr.f32.mxu1 %v682_v55 }
 0x18b   : > { %v1109_v59 = vpop.f32.mrb[0].mxu0 }
 0x18c   : > { %v1814_v62 = vpop.f32.mrb[0].mxu1  ;;  %v1111_v63 = vpop.f32.mrb[1].mxu0  ;;  %1373 = vmatmul.mubr.f32.gmra.mrb[106].mxu0 %v679_v56 }
 0x18d   : > { %v1815_v0 = vadd.f32 %v1814_v62, %v1109_v59  ;;  %v1816_v1 = vpop.f32.mrb[1].mxu1  ;;  %2078 = vmatmul.mubr.f32.gmra.mrb[106].mxu1 %v681_v57  ;;  %1377 = vmatprep.mubr.f32.mxu0 %v684_v58  ;;  %v703_v57 = vld [vmem:[%s3172_s4 + $0x760] sm:$0xff]  ;;  %v705_v58 = vld [vmem:[%s3172_s4 + $0x770] sm:$0xff]  ;;  %v708_v59 = vld [vmem:[%s3172_s4 + $0x788] sm:$0xff] }
 0x18e   : > { %2082 = vmatprep.mubr.f32.mxu1 %v686_v60  ;;  %v710_v62 = vld [vmem:[%s3172_s4 + $0x798] sm:$0xff]  ;;  %v345_v63 = vld [vmem:[%s5349_s2 + $0x30] sm:$0xff] }
 0x18f   : > { %v2453_v6 = vadd.f32 %v1815_v0, %v339_v61  ;;  %v1114_v7 = vpop.f32.mrb[2].mxu0 }
 0x190   : > { %v1819_v10 = vpop.f32.mrb[2].mxu1  ;;  %v1116_v11 = vpop.f32.mrb[3].mxu0  ;;  %1378 = vmatmul.mubr.f32.gmra.mrb[108].mxu0 %v683_v2 }
 0x191   : > { %2582 = vst.msk [vmem:[%s5349_s2] sm:$0xff] %vm2581_vm1, %v2453_v6  ;;  %v1820_v12 = vadd.f32 %v1819_v10, %v1114_v7  ;;  %v1821_v13 = vpop.f32.mrb[3].mxu1  ;;  %2083 = vmatmul.mubr.f32.gmra.mrb[108].mxu1 %v685_v3  ;;  %1382 = vmatprep.mubr.f32.mxu0 %v688_v5  ;;  %v707_v5 = vld [vmem:[%s3172_s4 + $0x780] sm:$0xff]  ;;  %v709_v6 = vld [vmem:[%s3172_s4 + $0x790] sm:$0xff]  ;;  %v712_v7 = vld [vmem:[%s3172_s4 + $0x7a8] sm:$0xff] }
 0x192   : > { %2087 = vmatprep.mubr.f32.mxu1 %v690_v8  ;;  %v714_v10 = vld [vmem:[%s3172_s4 + $0x7b8] sm:$0xff] }
 0x193   : > { %v2454_v17 = vadd.f32 %v1820_v12, %v340_v9  ;;  %v1119_v18 = vpop.f32.mrb[4].mxu0  ;;  %v346_v11 = vld [vmem:[%s5349_s2 + $0x38] sm:$0xff] }
 0x194   : > { %v1824_v21 = vpop.f32.mrb[4].mxu1  ;;  %v1121_v22 = vpop.f32.mrb[5].mxu0  ;;  %1383 = vmatmul.mubr.f32.gmra.mrb[110].mxu0 %v687_v14 }
 0x195   : > { %2583 = vst.msk [vmem:[%s5349_s2 + $0x8] sm:$0xff] %vm2581_vm1, %v2454_v17  ;;  %v1825_v23 = vadd.f32 %v1824_v21, %v1119_v18  ;;  %v1826_v24 = vpop.f32.mrb[5].mxu1  ;;  %2088 = vmatmul.mubr.f32.gmra.mrb[110].mxu1 %v689_v15  ;;  %1387 = vmatprep.mubr.f32.mxu0 %v692_v16  ;;  %v711_v16 = vld [vmem:[%s3172_s4 + $0x7a0] sm:$0xff]  ;;  %v713_v17 = vld [vmem:[%s3172_s4 + $0x7b0] sm:$0xff]  ;;  %v716_v18 = vld [vmem:[%s3172_s4 + $0x7c8] sm:$0xff] }
 0x196   : > { %2092 = vmatprep.mubr.f32.mxu1 %v694_v19  ;;  %v718_v21 = vld [vmem:[%s3172_s4 + $0x7d8] sm:$0xff]  ;;  %v347_v22 = vld [vmem:[%s5349_s2 + $0x40] sm:$0xff] }
 0x197   : > { %v2455_v28 = vadd.f32 %v1825_v23, %v341_v20  ;;  %v1124_v29 = vpop.f32.mrb[6].mxu0 }
 0x198   : > { %v1829_v32 = vpop.f32.mrb[6].mxu1  ;;  %v1126_v33 = vpop.f32.mrb[7].mxu0  ;;  %1388 = vmatmul.mubr.f32.gmra.mrb[112].mxu0 %v691_v25 }
 0x199   : > { %2584 = vst.msk [vmem:[%s5349_s2 + $0x10] sm:$0xff] %vm2581_vm1, %v2455_v28  ;;  %v1830_v34 = vadd.f32 %v1829_v32, %v1124_v29  ;;  %v1831_v35 = vpop.f32.mrb[7].mxu1  ;;  %2093 = vmatmul.mubr.f32.gmra.mrb[112].mxu1 %v693_v26  ;;  %1392 = vmatprep.mubr.f32.mxu0 %v696_v27  ;;  %v715_v27 = vld [vmem:[%s3172_s4 + $0x7c0] sm:$0xff]  ;;  %v717_v28 = vld [vmem:[%s3172_s4 + $0x7d0] sm:$0xff]  ;;  %v720_v29 = vld [vmem:[%s3172_s4 + $0x7e8] sm:$0xff] }
 0x19a   : > { %2097 = vmatprep.mubr.f32.mxu1 %v698_v30  ;;  %v722_v32 = vld [vmem:[%s3172_s4 + $0x7f8] sm:$0xff]  ;;  %v348_v33 = vld [vmem:[%s5349_s2 + $0x48] sm:$0xff] }
 0x19b   : > { %v2456_v39 = vadd.f32 %v1830_v34, %v342_v31  ;;  %v1129_v40 = vpop.f32.mrb[8].mxu0 }
 0x19c   : > { %v1834_v43 = vpop.f32.mrb[8].mxu1  ;;  %v1131_v4 = vpop.f32.mrb[9].mxu0  ;;  %1393 = vmatmul.mubr.f32.gmra.mrb[114].mxu0 %v695_v36 }
 0x19d   : > { %2585 = vst.msk [vmem:[%s5349_s2 + $0x18] sm:$0xff] %vm2581_vm1, %v2456_v39  ;;  %v1835_v44 = vadd.f32 %v1834_v43, %v1129_v40  ;;  %v1836_v45 = vpop.f32.mrb[9].mxu1  ;;  %2098 = vmatmul.mubr.f32.gmra.mrb[114].mxu1 %v697_v37  ;;  %1397 = vmatprep.mubr.f32.mxu0 %v700_v38  ;;  %v719_v38 = vld [vmem:[%s3172_s4 + $0x7e0] sm:$0xff]  ;;  %v721_v39 = vld [vmem:[%s3172_s4 + $0x7f0] sm:$0xff]  ;;  %v724_v40 = vld [vmem:[%s3172_s4 + $0x808] sm:$0xff] }
 0x19e   : > { %2102 = vmatprep.mubr.f32.mxu1 %v702_v41  ;;  %v726_v43 = vld [vmem:[%s3172_s4 + $0x818] sm:$0xff]  ;;  %v349_v4 = vld [vmem:[%s5349_s2 + $0x50] sm:$0xff] }
 0x19f   : > { %v2457_v49 = vadd.f32 %v1835_v44, %v343_v42  ;;  %v1134_v50 = vpop.f32.mrb[10].mxu0 }
 0x1a0   : > { %v1839_v53 = vpop.f32.mrb[10].mxu1  ;;  %v1136_v54 = vpop.f32.mrb[11].mxu0  ;;  %1398 = vmatmul.mubr.f32.gmra.mrb[116].mxu0 %v699_v46 }
 0x1a1   : > { %2586 = vst.msk [vmem:[%s5349_s2 + $0x20] sm:$0xff] %vm2581_vm1, %v2457_v49  ;;  %v1840_v55 = vadd.f32 %v1839_v53, %v1134_v50  ;;  %v1841_v56 = vpop.f32.mrb[11].mxu1  ;;  %2103 = vmatmul.mubr.f32.gmra.mrb[116].mxu1 %v701_v47  ;;  %1402 = vmatprep.mubr.f32.mxu0 %v704_v48  ;;  %v723_v48 = vld [vmem:[%s3172_s4 + $0x800] sm:$0xff]  ;;  %v725_v49 = vld [vmem:[%s3172_s4 + $0x810] sm:$0xff]  ;;  %v728_v50 = vld [vmem:[%s3172_s4 + $0x828] sm:$0xff] }
 0x1a2   : > { %2107 = vmatprep.mubr.f32.mxu1 %v706_v51  ;;  %v730_v53 = vld [vmem:[%s3172_s4 + $0x838] sm:$0xff] }
 0x1a3   : > { %v2458_v60 = vadd.f32 %v1840_v55, %v344_v52  ;;  %v1139_v61 = vpop.f32.mrb[12].mxu0  ;;  %v350_v54 = vld [vmem:[%s5349_s2 + $0x58] sm:$0xff] }
 0x1a4   : > { %v1844_v0 = vpop.f32.mrb[12].mxu1  ;;  %v1141_v1 = vpop.f32.mrb[13].mxu0  ;;  %1403 = vmatmul.mubr.f32.gmra.mrb[118].mxu0 %v703_v57 }
 0x1a5   : > { %2587 = vst.msk [vmem:[%s5349_s2 + $0x28] sm:$0xff] %vm2581_vm1, %v2458_v60  ;;  %v1845_v2 = vadd.f32 %v1844_v0, %v1139_v61  ;;  %v1846_v3 = vpop.f32.mrb[13].mxu1  ;;  %2108 = vmatmul.mubr.f32.gmra.mrb[118].mxu1 %v705_v58  ;;  %1407 = vmatprep.mubr.f32.mxu0 %v708_v59  ;;  %v727_v59 = vld [vmem:[%s3172_s4 + $0x820] sm:$0xff]  ;;  %v729_v60 = vld [vmem:[%s3172_s4 + $0x830] sm:$0xff]  ;;  %v732_v61 = vld [vmem:[%s3172_s4 + $0x848] sm:$0xff] }
 0x1a6   : > { %2112 = vmatprep.mubr.f32.mxu1 %v710_v62  ;;  %v734_v0 = vld [vmem:[%s3172_s4 + $0x858] sm:$0xff]  ;;  %v351_v1 = vld [vmem:[%s5349_s2 + $0x60] sm:$0xff] }
 0x1a7   : > { %v2459_v8 = vadd.f32 %v1845_v2, %v345_v63  ;;  %v1144_v9 = vpop.f32.mrb[14].mxu0 }
 0x1a8   : > { %v1849_v12 = vpop.f32.mrb[14].mxu1  ;;  %v1146_v13 = vpop.f32.mrb[15].mxu0  ;;  %1408 = vmatmul.mubr.f32.gmra.mrb[120].mxu0 %v707_v5 }
 0x1a9   : > { %2588 = vst.msk [vmem:[%s5349_s2 + $0x30] sm:$0xff] %vm2581_vm1, %v2459_v8  ;;  %v1850_v14 = vadd.f32 %v1849_v12, %v1144_v9  ;;  %v1851_v15 = vpop.f32.mrb[15].mxu1  ;;  %2113 = vmatmul.mubr.f32.gmra.mrb[120].mxu1 %v709_v6  ;;  %1412 = vmatprep.mubr.f32.mxu0 %v712_v7  ;;  %v731_v7 = vld [vmem:[%s3172_s4 + $0x840] sm:$0xff]  ;;  %v733_v8 = vld [vmem:[%s3172_s4 + $0x850] sm:$0xff]  ;;  %v736_v9 = vld [vmem:[%s3172_s4 + $0x868] sm:$0xff] }
 0x1aa   : > { %2117 = vmatprep.mubr.f32.mxu1 %v714_v10  ;;  %v738_v12 = vld [vmem:[%s3172_s4 + $0x878] sm:$0xff]  ;;  %v352_v13 = vld [vmem:[%s5349_s2 + $0x68] sm:$0xff] }
 0x1ab   : > { %v2460_v19 = vadd.f32 %v1850_v14, %v346_v11  ;;  %v1149_v20 = vpop.f32.mrb[16].mxu0 }
 0x1ac   : > { %v1854_v23 = vpop.f32.mrb[16].mxu1  ;;  %v1151_v24 = vpop.f32.mrb[17].mxu0  ;;  %1413 = vmatmul.mubr.f32.gmra.mrb[122].mxu0 %v711_v16 }
 0x1ad   : > { %2589 = vst.msk [vmem:[%s5349_s2 + $0x38] sm:$0xff] %vm2581_vm1, %v2460_v19  ;;  %v1855_v25 = vadd.f32 %v1854_v23, %v1149_v20  ;;  %v1856_v26 = vpop.f32.mrb[17].mxu1  ;;  %2118 = vmatmul.mubr.f32.gmra.mrb[122].mxu1 %v713_v17  ;;  %1417 = vmatprep.mubr.f32.mxu0 %v716_v18  ;;  %v735_v18 = vld [vmem:[%s3172_s4 + $0x860] sm:$0xff]  ;;  %v737_v19 = vld [vmem:[%s3172_s4 + $0x870] sm:$0xff]  ;;  %v740_v20 = vld [vmem:[%s3172_s4 + $0x888] sm:$0xff] }
 0x1ae   : > { %2122 = vmatprep.mubr.f32.mxu1 %v718_v21  ;;  %v742_v23 = vld [vmem:[%s3172_s4 + $0x898] sm:$0xff]  ;;  %v353_v24 = vld [vmem:[%s5349_s2 + $0x70] sm:$0xff] }
 0x1af   : > { %v2461_v30 = vadd.f32 %v1855_v25, %v347_v22  ;;  %v1154_v31 = vpop.f32.mrb[18].mxu0 }
 0x1b0   : > { %v1859_v34 = vpop.f32.mrb[18].mxu1  ;;  %v1156_v35 = vpop.f32.mrb[19].mxu0  ;;  %1418 = vmatmul.mubr.f32.gmra.mrb[124].mxu0 %v715_v27 }
 0x1b1   : > { %2590 = vst.msk [vmem:[%s5349_s2 + $0x40] sm:$0xff] %vm2581_vm1, %v2461_v30  ;;  %v1860_v36 = vadd.f32 %v1859_v34, %v1154_v31  ;;  %v1861_v37 = vpop.f32.mrb[19].mxu1  ;;  %2123 = vmatmul.mubr.f32.gmra.mrb[124].mxu1 %v717_v28  ;;  %1422 = vmatprep.mubr.f32.mxu0 %v720_v29  ;;  %v739_v29 = vld [vmem:[%s3172_s4 + $0x880] sm:$0xff]  ;;  %v741_v30 = vld [vmem:[%s3172_s4 + $0x890] sm:$0xff]  ;;  %v744_v31 = vld [vmem:[%s3172_s4 + $0x8a8] sm:$0xff] }
 0x1b2   : > { %2127 = vmatprep.mubr.f32.mxu1 %v722_v32  ;;  %v746_v34 = vld [vmem:[%s3172_s4 + $0x8b8] sm:$0xff] }
 0x1b3   : > { %v2462_v41 = vadd.f32 %v1860_v36, %v348_v33  ;;  %v1159_v42 = vpop.f32.mrb[20].mxu0  ;;  %v354_v35 = vld [vmem:[%s5349_s2 + $0x78] sm:$0xff] }
 0x1b4   : > { %v1864_v44 = vpop.f32.mrb[20].mxu1  ;;  %v1161_v45 = vpop.f32.mrb[21].mxu0  ;;  %1423 = vmatmul.mubr.f32.gmra.mrb[126].mxu0 %v719_v38 }
 0x1b5   : > { %2591 = vst.msk [vmem:[%s5349_s2 + $0x48] sm:$0xff] %vm2581_vm1, %v2462_v41  ;;  %v1865_v46 = vadd.f32 %v1864_v44, %v1159_v42  ;;  %v1866_v47 = vpop.f32.mrb[21].mxu1  ;;  %2128 = vmatmul.mubr.f32.gmra.mrb[126].mxu1 %v721_v39  ;;  %1427 = vmatprep.mubr.f32.mxu0 %v724_v40  ;;  %v743_v40 = vld [vmem:[%s3172_s4 + $0x8a0] sm:$0xff]  ;;  %v745_v41 = vld [vmem:[%s3172_s4 + $0x8b0] sm:$0xff]  ;;  %v748_v42 = vld [vmem:[%s3172_s4 + $0x8c8] sm:$0xff] }
 0x1b6   : > { %2132 = vmatprep.mubr.f32.mxu1 %v726_v43  ;;  %v750_v44 = vld [vmem:[%s3172_s4 + $0x8d8] sm:$0xff]  ;;  %v355_v45 = vld [vmem:[%s5349_s2 + $0x80] sm:$0xff] }
 0x1b7   : > { %v2463_v51 = vadd.f32 %v1865_v46, %v349_v4  ;;  %v1164_v52 = vpop.f32.mrb[22].mxu0 }
 0x1b8   : > { %v1869_v55 = vpop.f32.mrb[22].mxu1  ;;  %v1166_v56 = vpop.f32.mrb[23].mxu0  ;;  %1428 = vmatmul.mubr.f32.gmra.mrb[128].mxu0 %v723_v48 }
 0x1b9   : > { %2592 = vst.msk [vmem:[%s5349_s2 + $0x50] sm:$0xff] %vm2581_vm1, %v2463_v51  ;;  %v1870_v57 = vadd.f32 %v1869_v55, %v1164_v52  ;;  %v1871_v58 = vpop.f32.mrb[23].mxu1  ;;  %2133 = vmatmul.mubr.f32.gmra.mrb[128].mxu1 %v725_v49  ;;  %1432 = vmatprep.mubr.f32.mxu0 %v728_v50  ;;  %v747_v50 = vld [vmem:[%s3172_s4 + $0x8c0] sm:$0xff]  ;;  %v749_v51 = vld [vmem:[%s3172_s4 + $0x8d0] sm:$0xff]  ;;  %v752_v52 = vld [vmem:[%s3172_s4 + $0x8e8] sm:$0xff] }
 0x1ba   : > { %2137 = vmatprep.mubr.f32.mxu1 %v730_v53  ;;  %v754_v55 = vld [vmem:[%s3172_s4 + $0x8f8] sm:$0xff]  ;;  %v356_v56 = vld [vmem:[%s5349_s2 + $0x88] sm:$0xff] }
 0x1bb   : > { %v2464_v62 = vadd.f32 %v1870_v57, %v350_v54  ;;  %v1169_v63 = vpop.f32.mrb[24].mxu0 }
 0x1bc   : > { %v1874_v2 = vpop.f32.mrb[24].mxu1  ;;  %v1171_v3 = vpop.f32.mrb[25].mxu0  ;;  %1433 = vmatmul.mubr.f32.gmra.mrb[130].mxu0 %v727_v59 }
 0x1bd   : > { %2593 = vst.msk [vmem:[%s5349_s2 + $0x58] sm:$0xff] %vm2581_vm1, %v2464_v62  ;;  %v1875_v5 = vadd.f32 %v1874_v2, %v1169_v63  ;;  %v1876_v6 = vpop.f32.mrb[25].mxu1  ;;  %2138 = vmatmul.mubr.f32.gmra.mrb[130].mxu1 %v729_v60  ;;  %1437 = vmatprep.mubr.f32.mxu0 %v732_v61  ;;  %v751_v61 = vld [vmem:[%s3172_s4 + $0x8e0] sm:$0xff]  ;;  %v753_v62 = vld [vmem:[%s3172_s4 + $0x8f0] sm:$0xff]  ;;  %v756_v63 = vld [vmem:[%s3172_s4 + $0x908] sm:$0xff] }
 0x1be   : > { %2142 = vmatprep.mubr.f32.mxu1 %v734_v0  ;;  %v758_v2 = vld [vmem:[%s3172_s4 + $0x918] sm:$0xff]  ;;  %v357_v3 = vld [vmem:[%s5349_s2 + $0x90] sm:$0xff] }
 0x1bf   : > { %v2465_v10 = vadd.f32 %v1875_v5, %v351_v1  ;;  %v1174_v11 = vpop.f32.mrb[26].mxu0 }
 0x1c0   : > { %v1879_v14 = vpop.f32.mrb[26].mxu1  ;;  %v1176_v15 = vpop.f32.mrb[27].mxu0  ;;  %1438 = vmatmul.mubr.f32.gmra.mrb[132].mxu0 %v731_v7 }
 0x1c1   : > { %2594 = vst.msk [vmem:[%s5349_s2 + $0x60] sm:$0xff] %vm2581_vm1, %v2465_v10  ;;  %v1880_v16 = vadd.f32 %v1879_v14, %v1174_v11  ;;  %v1881_v17 = vpop.f32.mrb[27].mxu1  ;;  %2143 = vmatmul.mubr.f32.gmra.mrb[132].mxu1 %v733_v8  ;;  %1442 = vmatprep.mubr.f32.mxu0 %v736_v9  ;;  %v755_v9 = vld [vmem:[%s3172_s4 + $0x900] sm:$0xff]  ;;  %v757_v10 = vld [vmem:[%s3172_s4 + $0x910] sm:$0xff]  ;;  %v760_v11 = vld [vmem:[%s3172_s4 + $0x928] sm:$0xff] }
 0x1c2   : > { %2147 = vmatprep.mubr.f32.mxu1 %v738_v12  ;;  %v762_v14 = vld [vmem:[%s3172_s4 + $0x938] sm:$0xff] }
 0x1c3   : > { %v2466_v21 = vadd.f32 %v1880_v16, %v352_v13  ;;  %v1179_v22 = vpop.f32.mrb[28].mxu0  ;;  %v358_v15 = vld [vmem:[%s5349_s2 + $0x98] sm:$0xff] }
 0x1c4   : > { %v1884_v25 = vpop.f32.mrb[28].mxu1  ;;  %v1181_v26 = vpop.f32.mrb[29].mxu0  ;;  %1443 = vmatmul.mubr.f32.gmra.mrb[134].mxu0 %v735_v18 }
 0x1c5   : > { %2595 = vst.msk [vmem:[%s5349_s2 + $0x68] sm:$0xff] %vm2581_vm1, %v2466_v21  ;;  %v1885_v27 = vadd.f32 %v1884_v25, %v1179_v22  ;;  %v1886_v28 = vpop.f32.mrb[29].mxu1  ;;  %2148 = vmatmul.mubr.f32.gmra.mrb[134].mxu1 %v737_v19  ;;  %1447 = vmatprep.mubr.f32.mxu0 %v740_v20  ;;  %v759_v20 = vld [vmem:[%s3172_s4 + $0x920] sm:$0xff]  ;;  %v761_v21 = vld [vmem:[%s3172_s4 + $0x930] sm:$0xff]  ;;  %v764_v22 = vld [vmem:[%s3172_s4 + $0x948] sm:$0xff] }
 0x1c6   : > { %2152 = vmatprep.mubr.f32.mxu1 %v742_v23  ;;  %v766_v25 = vld [vmem:[%s3172_s4 + $0x958] sm:$0xff]  ;;  %v359_v26 = vld [vmem:[%s5349_s2 + $0xa0] sm:$0xff] }
 0x1c7   : > { %v2467_v32 = vadd.f32 %v1885_v27, %v353_v24  ;;  %v1184_v33 = vpop.f32.mrb[30].mxu0 }
 0x1c8   : > { %v1889_v36 = vpop.f32.mrb[30].mxu1  ;;  %v1186_v37 = vpop.f32.mrb[31].mxu0  ;;  %1448 = vmatmul.mubr.f32.gmra.mrb[136].mxu0 %v739_v29 }
 0x1c9   : > { %2596 = vst.msk [vmem:[%s5349_s2 + $0x70] sm:$0xff] %vm2581_vm1, %v2467_v32  ;;  %v1890_v38 = vadd.f32 %v1889_v36, %v1184_v33  ;;  %v1891_v39 = vpop.f32.mrb[31].mxu1  ;;  %2153 = vmatmul.mubr.f32.gmra.mrb[136].mxu1 %v741_v30  ;;  %1452 = vmatprep.mubr.f32.mxu0 %v744_v31  ;;  %v763_v31 = vld [vmem:[%s3172_s4 + $0x940] sm:$0xff]  ;;  %v765_v32 = vld [vmem:[%s3172_s4 + $0x950] sm:$0xff]  ;;  %v768_v33 = vld [vmem:[%s3172_s4 + $0x968] sm:$0xff] }
 0x1ca   : > { %2157 = vmatprep.mubr.f32.mxu1 %v746_v34  ;;  %v770_v36 = vld [vmem:[%s3172_s4 + $0x978] sm:$0xff]  ;;  %v360_v37 = vld [vmem:[%s5349_s2 + $0xa8] sm:$0xff] }
 0x1cb   : > { %v2468_v43 = vadd.f32 %v1890_v38, %v354_v35  ;;  %v1189_v4 = vpop.f32.mrb[32].mxu0 }
 0x1cc   : > { %v1894_v46 = vpop.f32.mrb[32].mxu1  ;;  %v1191_v47 = vpop.f32.mrb[33].mxu0  ;;  %1453 = vmatmul.mubr.f32.gmra.mrb[138].mxu0 %v743_v40 }
 0x1cd   : > { %2597 = vst.msk [vmem:[%s5349_s2 + $0x78] sm:$0xff] %vm2581_vm1, %v2468_v43  ;;  %v1895_v48 = vadd.f32 %v1894_v46, %v1189_v4  ;;  %v1896_v49 = vpop.f32.mrb[33].mxu1  ;;  %2158 = vmatmul.mubr.f32.gmra.mrb[138].mxu1 %v745_v41  ;;  %1457 = vmatprep.mubr.f32.mxu0 %v748_v42  ;;  %v767_v42 = vld [vmem:[%s3172_s4 + $0x960] sm:$0xff]  ;;  %v769_v43 = vld [vmem:[%s3172_s4 + $0x970] sm:$0xff]  ;;  %v772_v4 = vld [vmem:[%s3172_s4 + $0x988] sm:$0xff] }
 0x1ce   : > { %2162 = vmatprep.mubr.f32.mxu1 %v750_v44  ;;  %v774_v46 = vld [vmem:[%s3172_s4 + $0x998] sm:$0xff]  ;;  %v361_v47 = vld [vmem:[%s5349_s2 + $0xb0] sm:$0xff] }
 0x1cf   : > { %v2469_v53 = vadd.f32 %v1895_v48, %v355_v45  ;;  %v1194_v54 = vpop.f32.mrb[34].mxu0 }
 0x1d0   : > { %v1899_v57 = vpop.f32.mrb[34].mxu1  ;;  %v1196_v58 = vpop.f32.mrb[35].mxu0  ;;  %1458 = vmatmul.mubr.f32.gmra.mrb[140].mxu0 %v747_v50 }
 0x1d1   : > { %2598 = vst.msk [vmem:[%s5349_s2 + $0x80] sm:$0xff] %vm2581_vm1, %v2469_v53  ;;  %v1900_v59 = vadd.f32 %v1899_v57, %v1194_v54  ;;  %v1901_v60 = vpop.f32.mrb[35].mxu1  ;;  %2163 = vmatmul.mubr.f32.gmra.mrb[140].mxu1 %v749_v51  ;;  %1462 = vmatprep.mubr.f32.mxu0 %v752_v52  ;;  %v771_v52 = vld [vmem:[%s3172_s4 + $0x980] sm:$0xff]  ;;  %v773_v53 = vld [vmem:[%s3172_s4 + $0x990] sm:$0xff]  ;;  %v776_v54 = vld [vmem:[%s3172_s4 + $0x9a8] sm:$0xff] }
 0x1d2   : > { %2167 = vmatprep.mubr.f32.mxu1 %v754_v55  ;;  %v778_v57 = vld [vmem:[%s3172_s4 + $0x9b8] sm:$0xff] }
 0x1d3   : > { %v2470_v0 = vadd.f32 %v1900_v59, %v356_v56  ;;  %v1199_v1 = vpop.f32.mrb[36].mxu0  ;;  %v362_v58 = vld [vmem:[%s5349_s2 + $0xb8] sm:$0xff] }
 0x1d4   : > { %v1904_v5 = vpop.f32.mrb[36].mxu1  ;;  %v1201_v6 = vpop.f32.mrb[37].mxu0  ;;  %1463 = vmatmul.mubr.f32.gmra.mrb[142].mxu0 %v751_v61 }
 0x1d5   : > { %2599 = vst.msk [vmem:[%s5349_s2 + $0x88] sm:$0xff] %vm2581_vm1, %v2470_v0  ;;  %v1905_v7 = vadd.f32 %v1904_v5, %v1199_v1  ;;  %v1906_v8 = vpop.f32.mrb[37].mxu1  ;;  %2168 = vmatmul.mubr.f32.gmra.mrb[142].mxu1 %v753_v62  ;;  %1467 = vmatprep.mubr.f32.mxu0 %v756_v63  ;;  %v775_v63 = vld [vmem:[%s3172_s4 + $0x9a0] sm:$0xff]  ;;  %v777_v0 = vld [vmem:[%s3172_s4 + $0x9b0] sm:$0xff]  ;;  %v780_v1 = vld [vmem:[%s3172_s4 + $0x9c8] sm:$0xff] }
 0x1d6   : > { %2172 = vmatprep.mubr.f32.mxu1 %v758_v2  ;;  %v782_v5 = vld [vmem:[%s3172_s4 + $0x9d8] sm:$0xff]  ;;  %v363_v6 = vld [vmem:[%s5349_s2 + $0xc0] sm:$0xff] }
 0x1d7   : > { %v2471_v12 = vadd.f32 %v1905_v7, %v357_v3  ;;  %v1204_v13 = vpop.f32.mrb[38].mxu0 }
 0x1d8   : > { %v1909_v16 = vpop.f32.mrb[38].mxu1  ;;  %v1206_v17 = vpop.f32.mrb[39].mxu0  ;;  %1468 = vmatmul.mubr.f32.gmra.mrb[144].mxu0 %v755_v9 }
 0x1d9   : > { %2600 = vst.msk [vmem:[%s5349_s2 + $0x90] sm:$0xff] %vm2581_vm1, %v2471_v12  ;;  %v1910_v18 = vadd.f32 %v1909_v16, %v1204_v13  ;;  %v1911_v19 = vpop.f32.mrb[39].mxu1  ;;  %2173 = vmatmul.mubr.f32.gmra.mrb[144].mxu1 %v757_v10  ;;  %1472 = vmatprep.mubr.f32.mxu0 %v760_v11  ;;  %v779_v11 = vld [vmem:[%s3172_s4 + $0x9c0] sm:$0xff]  ;;  %v781_v12 = vld [vmem:[%s3172_s4 + $0x9d0] sm:$0xff]  ;;  %v784_v13 = vld [vmem:[%s3172_s4 + $0x9e8] sm:$0xff] }
 0x1da   : > { %2177 = vmatprep.mubr.f32.mxu1 %v762_v14  ;;  %v786_v16 = vld [vmem:[%s3172_s4 + $0x9f8] sm:$0xff]  ;;  %v364_v17 = vld [vmem:[%s5349_s2 + $0xc8] sm:$0xff] }
 0x1db   : > { %v2472_v23 = vadd.f32 %v1910_v18, %v358_v15  ;;  %v1209_v24 = vpop.f32.mrb[40].mxu0 }
 0x1dc   : > { %v1914_v27 = vpop.f32.mrb[40].mxu1  ;;  %v1211_v28 = vpop.f32.mrb[41].mxu0  ;;  %1473 = vmatmul.mubr.f32.gmra.mrb[146].mxu0 %v759_v20 }
 0x1dd   : > { %2601 = vst.msk [vmem:[%s5349_s2 + $0x98] sm:$0xff] %vm2581_vm1, %v2472_v23  ;;  %v1915_v29 = vadd.f32 %v1914_v27, %v1209_v24  ;;  %v1916_v30 = vpop.f32.mrb[41].mxu1  ;;  %2178 = vmatmul.mubr.f32.gmra.mrb[146].mxu1 %v761_v21  ;;  %1477 = vmatprep.mubr.f32.mxu0 %v764_v22  ;;  %v783_v22 = vld [vmem:[%s3172_s4 + $0x9e0] sm:$0xff]  ;;  %v785_v23 = vld [vmem:[%s3172_s4 + $0x9f0] sm:$0xff]  ;;  %v788_v24 = vld [vmem:[%s3172_s4 + $0xa08] sm:$0xff] }
 0x1de   : > { %2182 = vmatprep.mubr.f32.mxu1 %v766_v25  ;;  %v790_v27 = vld [vmem:[%s3172_s4 + $0xa18] sm:$0xff]  ;;  %v365_v28 = vld [vmem:[%s5349_s2 + $0xd0] sm:$0xff] }
 0x1df   : > { %v2473_v34 = vadd.f32 %v1915_v29, %v359_v26  ;;  %v1214_v35 = vpop.f32.mrb[42].mxu0 }
 0x1e0   : > { %v1919_v38 = vpop.f32.mrb[42].mxu1  ;;  %v1216_v39 = vpop.f32.mrb[43].mxu0  ;;  %1478 = vmatmul.mubr.f32.gmra.mrb[148].mxu0 %v763_v31 }
 0x1e1   : > { %2602 = vst.msk [vmem:[%s5349_s2 + $0xa0] sm:$0xff] %vm2581_vm1, %v2473_v34  ;;  %v1920_v40 = vadd.f32 %v1919_v38, %v1214_v35  ;;  %v1921_v41 = vpop.f32.mrb[43].mxu1  ;;  %2183 = vmatmul.mubr.f32.gmra.mrb[148].mxu1 %v765_v32  ;;  %1482 = vmatprep.mubr.f32.mxu0 %v768_v33  ;;  %v787_v33 = vld [vmem:[%s3172_s4 + $0xa00] sm:$0xff]  ;;  %v789_v34 = vld [vmem:[%s3172_s4 + $0xa10] sm:$0xff]  ;;  %v792_v35 = vld [vmem:[%s3172_s4 + $0xa28] sm:$0xff] }
 0x1e2   : > { %2187 = vmatprep.mubr.f32.mxu1 %v770_v36  ;;  %v794_v38 = vld [vmem:[%s3172_s4 + $0xa38] sm:$0xff] }
 0x1e3   : > { %v2474_v44 = vadd.f32 %v1920_v40, %v360_v37  ;;  %v1219_v45 = vpop.f32.mrb[44].mxu0  ;;  %v366_v39 = vld [vmem:[%s5349_s2 + $0xd8] sm:$0xff] }
 0x1e4   : > { %v1924_v48 = vpop.f32.mrb[44].mxu1  ;;  %v1221_v49 = vpop.f32.mrb[45].mxu0  ;;  %1483 = vmatmul.mubr.f32.gmra.mrb[150].mxu0 %v767_v42 }
 0x1e5   : > { %2603 = vst.msk [vmem:[%s5349_s2 + $0xa8] sm:$0xff] %vm2581_vm1, %v2474_v44  ;;  %v1925_v50 = vadd.f32 %v1924_v48, %v1219_v45  ;;  %v1926_v51 = vpop.f32.mrb[45].mxu1  ;;  %2188 = vmatmul.mubr.f32.gmra.mrb[150].mxu1 %v769_v43  ;;  %1487 = vmatprep.mubr.f32.mxu0 %v772_v4  ;;  %v791_v4 = vld [vmem:[%s3172_s4 + $0xa20] sm:$0xff]  ;;  %v793_v44 = vld [vmem:[%s3172_s4 + $0xa30] sm:$0xff]  ;;  %v796_v45 = vld [vmem:[%s3172_s4 + $0xa48] sm:$0xff] }
 0x1e6   : > { %2192 = vmatprep.mubr.f32.mxu1 %v774_v46  ;;  %v798_v48 = vld [vmem:[%s3172_s4 + $0xa58] sm:$0xff]  ;;  %v367_v49 = vld [vmem:[%s5349_s2 + $0xe0] sm:$0xff] }
 0x1e7   : > { %v2475_v55 = vadd.f32 %v1925_v50, %v361_v47  ;;  %v1224_v56 = vpop.f32.mrb[46].mxu0 }
 0x1e8   : > { %v1929_v59 = vpop.f32.mrb[46].mxu1  ;;  %v1226_v60 = vpop.f32.mrb[47].mxu0  ;;  %1488 = vmatmul.mubr.f32.gmra.mrb[152].mxu0 %v771_v52 }
 0x1e9   : > { %2604 = vst.msk [vmem:[%s5349_s2 + $0xb0] sm:$0xff] %vm2581_vm1, %v2475_v55  ;;  %v1930_v61 = vadd.f32 %v1929_v59, %v1224_v56  ;;  %v1931_v62 = vpop.f32.mrb[47].mxu1  ;;  %2193 = vmatmul.mubr.f32.gmra.mrb[152].mxu1 %v773_v53  ;;  %1492 = vmatprep.mubr.f32.mxu0 %v776_v54  ;;  %v795_v54 = vld [vmem:[%s3172_s4 + $0xa40] sm:$0xff]  ;;  %v797_v55 = vld [vmem:[%s3172_s4 + $0xa50] sm:$0xff]  ;;  %v800_v56 = vld [vmem:[%s3172_s4 + $0xa68] sm:$0xff] }
 0x1ea   : > { %2197 = vmatprep.mubr.f32.mxu1 %v778_v57  ;;  %v802_v59 = vld [vmem:[%s3172_s4 + $0xa78] sm:$0xff]  ;;  %v368_v60 = vld [vmem:[%s5349_s2 + $0xe8] sm:$0xff] }
 0x1eb   : > { %v2476_v2 = vadd.f32 %v1930_v61, %v362_v58  ;;  %v1229_v3 = vpop.f32.mrb[48].mxu0 }
 0x1ec   : > { %v1934_v7 = vpop.f32.mrb[48].mxu1  ;;  %v1231_v8 = vpop.f32.mrb[49].mxu0  ;;  %1493 = vmatmul.mubr.f32.gmra.mrb[154].mxu0 %v775_v63 }
 0x1ed   : > { %2605 = vst.msk [vmem:[%s5349_s2 + $0xb8] sm:$0xff] %vm2581_vm1, %v2476_v2  ;;  %v1935_v9 = vadd.f32 %v1934_v7, %v1229_v3  ;;  %v1936_v10 = vpop.f32.mrb[49].mxu1  ;;  %2198 = vmatmul.mubr.f32.gmra.mrb[154].mxu1 %v777_v0  ;;  %1497 = vmatprep.mubr.f32.mxu0 %v780_v1  ;;  %v799_v1 = vld [vmem:[%s3172_s4 + $0xa60] sm:$0xff]  ;;  %v801_v2 = vld [vmem:[%s3172_s4 + $0xa70] sm:$0xff]  ;;  %v804_v3 = vld [vmem:[%s3172_s4 + $0xa88] sm:$0xff] }
 0x1ee   : > { %2202 = vmatprep.mubr.f32.mxu1 %v782_v5  ;;  %v806_v7 = vld [vmem:[%s3172_s4 + $0xa98] sm:$0xff]  ;;  %v369_v8 = vld [vmem:[%s5349_s2 + $0xf0] sm:$0xff] }
 0x1ef   : > { %v2477_v14 = vadd.f32 %v1935_v9, %v363_v6  ;;  %v1234_v15 = vpop.f32.mrb[50].mxu0 }
 0x1f0   : > { %v1939_v18 = vpop.f32.mrb[50].mxu1  ;;  %v1236_v19 = vpop.f32.mrb[51].mxu0  ;;  %1498 = vmatmul.mubr.f32.gmra.mrb[156].mxu0 %v779_v11 }
 0x1f1   : > { %2606 = vst.msk [vmem:[%s5349_s2 + $0xc0] sm:$0xff] %vm2581_vm1, %v2477_v14  ;;  %v1940_v20 = vadd.f32 %v1939_v18, %v1234_v15  ;;  %v1941_v21 = vpop.f32.mrb[51].mxu1  ;;  %2203 = vmatmul.mubr.f32.gmra.mrb[156].mxu1 %v781_v12  ;;  %1502 = vmatprep.mubr.f32.mxu0 %v784_v13  ;;  %v803_v13 = vld [vmem:[%s3172_s4 + $0xa80] sm:$0xff]  ;;  %v805_v14 = vld [vmem:[%s3172_s4 + $0xa90] sm:$0xff]  ;;  %v808_v15 = vld [vmem:[%s3172_s4 + $0xaa8] sm:$0xff] }
 0x1f2   : > { %2207 = vmatprep.mubr.f32.mxu1 %v786_v16  ;;  %v810_v18 = vld [vmem:[%s3172_s4 + $0xab8] sm:$0xff] }
 0x1f3   : > { %v2478_v25 = vadd.f32 %v1940_v20, %v364_v17  ;;  %v1239_v26 = vpop.f32.mrb[52].mxu0  ;;  %v370_v19 = vld [vmem:[%s5349_s2 + $0xf8] sm:$0xff] }
 0x1f4   : > { %v1944_v29 = vpop.f32.mrb[52].mxu1  ;;  %v1241_v30 = vpop.f32.mrb[53].mxu0  ;;  %1503 = vmatmul.mubr.f32.gmra.mrb[158].mxu0 %v783_v22 }
 0x1f5   : > { %2607 = vst.msk [vmem:[%s5349_s2 + $0xc8] sm:$0xff] %vm2581_vm1, %v2478_v25  ;;  %v1945_v31 = vadd.f32 %v1944_v29, %v1239_v26  ;;  %v1946_v32 = vpop.f32.mrb[53].mxu1  ;;  %2208 = vmatmul.mubr.f32.gmra.mrb[158].mxu1 %v785_v23  ;;  %1507 = vmatprep.mubr.f32.mxu0 %v788_v24  ;;  %v807_v24 = vld [vmem:[%s3172_s4 + $0xaa0] sm:$0xff]  ;;  %v809_v25 = vld [vmem:[%s3172_s4 + $0xab0] sm:$0xff]  ;;  %v812_v26 = vld [vmem:[%s3172_s4 + $0xac8] sm:$0xff] }
 0x1f6   : > { %2212 = vmatprep.mubr.f32.mxu1 %v790_v27  ;;  %v814_v29 = vld [vmem:[%s3172_s4 + $0xad8] sm:$0xff]  ;;  %v371_v30 = vld [vmem:[%s5349_s2 + $0x100] sm:$0xff] }
 0x1f7   : > { %v2479_v36 = vadd.f32 %v1945_v31, %v365_v28  ;;  %v1244_v37 = vpop.f32.mrb[54].mxu0 }
 0x1f8   : > { %v1949_v40 = vpop.f32.mrb[54].mxu1  ;;  %v1246_v41 = vpop.f32.mrb[55].mxu0  ;;  %1508 = vmatmul.mubr.f32.gmra.mrb[160].mxu0 %v787_v33 }
 0x1f9   : > { %2608 = vst.msk [vmem:[%s5349_s2 + $0xd0] sm:$0xff] %vm2581_vm1, %v2479_v36  ;;  %v1950_v42 = vadd.f32 %v1949_v40, %v1244_v37  ;;  %v1951_v43 = vpop.f32.mrb[55].mxu1  ;;  %2213 = vmatmul.mubr.f32.gmra.mrb[160].mxu1 %v789_v34  ;;  %1512 = vmatprep.mubr.f32.mxu0 %v792_v35  ;;  %v811_v35 = vld [vmem:[%s3172_s4 + $0xac0] sm:$0xff]  ;;  %v813_v36 = vld [vmem:[%s3172_s4 + $0xad0] sm:$0xff]  ;;  %v816_v37 = vld [vmem:[%s3172_s4 + $0xae8] sm:$0xff] }
 0x1fa   : > { %2217 = vmatprep.mubr.f32.mxu1 %v794_v38  ;;  %v818_v40 = vld [vmem:[%s3172_s4 + $0xaf8] sm:$0xff]  ;;  %v372_v41 = vld [vmem:[%s5349_s2 + $0x108] sm:$0xff] }
 0x1fb   : > { %v2480_v46 = vadd.f32 %v1950_v42, %v366_v39  ;;  %v1249_v47 = vpop.f32.mrb[56].mxu0 }
 0x1fc   : > { %v1954_v50 = vpop.f32.mrb[56].mxu1  ;;  %v1251_v51 = vpop.f32.mrb[57].mxu0  ;;  %1513 = vmatmul.mubr.f32.gmra.mrb[162].mxu0 %v791_v4 }
 0x1fd   : > { %2609 = vst.msk [vmem:[%s5349_s2 + $0xd8] sm:$0xff] %vm2581_vm1, %v2480_v46  ;;  %v1955_v52 = vadd.f32 %v1954_v50, %v1249_v47  ;;  %v1956_v53 = vpop.f32.mrb[57].mxu1  ;;  %2218 = vmatmul.mubr.f32.gmra.mrb[162].mxu1 %v793_v44  ;;  %1517 = vmatprep.mubr.f32.mxu0 %v796_v45  ;;  %v815_v45 = vld [vmem:[%s3172_s4 + $0xae0] sm:$0xff]  ;;  %v817_v46 = vld [vmem:[%s3172_s4 + $0xaf0] sm:$0xff]  ;;  %v820_v47 = vld [vmem:[%s3172_s4 + $0xb08] sm:$0xff] }
 0x1fe   : > { %2222 = vmatprep.mubr.f32.mxu1 %v798_v48  ;;  %v822_v50 = vld [vmem:[%s3172_s4 + $0xb18] sm:$0xff]  ;;  %v373_v51 = vld [vmem:[%s5349_s2 + $0x110] sm:$0xff] }
 0x1ff   : > { %v2481_v57 = vadd.f32 %v1955_v52, %v367_v49  ;;  %v1254_v58 = vpop.f32.mrb[58].mxu0 }
 0x200   : > { %v1959_v61 = vpop.f32.mrb[58].mxu1  ;;  %v1256_v62 = vpop.f32.mrb[59].mxu0  ;;  %1518 = vmatmul.mubr.f32.gmra.mrb[164].mxu0 %v795_v54 }
 0x201   : > { %2610 = vst.msk [vmem:[%s5349_s2 + $0xe0] sm:$0xff] %vm2581_vm1, %v2481_v57  ;;  %v1960_v63 = vadd.f32 %v1959_v61, %v1254_v58  ;;  %v1961_v0 = vpop.f32.mrb[59].mxu1  ;;  %2223 = vmatmul.mubr.f32.gmra.mrb[164].mxu1 %v797_v55  ;;  %1522 = vmatprep.mubr.f32.mxu0 %v800_v56  ;;  %v819_v56 = vld [vmem:[%s3172_s4 + $0xb00] sm:$0xff]  ;;  %v821_v57 = vld [vmem:[%s3172_s4 + $0xb10] sm:$0xff]  ;;  %v824_v58 = vld [vmem:[%s3172_s4 + $0xb28] sm:$0xff] }
 0x202   : > { %2227 = vmatprep.mubr.f32.mxu1 %v802_v59  ;;  %v826_v61 = vld [vmem:[%s3172_s4 + $0xb38] sm:$0xff] }
 0x203   : > { %v2482_v5 = vadd.f32 %v1960_v63, %v368_v60  ;;  %v1259_v6 = vpop.f32.mrb[60].mxu0  ;;  %v374_v62 = vld [vmem:[%s5349_s2 + $0x118] sm:$0xff] }
 0x204   : > { %v1964_v9 = vpop.f32.mrb[60].mxu1  ;;  %v1261_v10 = vpop.f32.mrb[61].mxu0  ;;  %1523 = vmatmul.mubr.f32.gmra.mrb[166].mxu0 %v799_v1 }
 0x205   : > { %2611 = vst.msk [vmem:[%s5349_s2 + $0xe8] sm:$0xff] %vm2581_vm1, %v2482_v5  ;;  %v1965_v11 = vadd.f32 %v1964_v9, %v1259_v6  ;;  %v1966_v12 = vpop.f32.mrb[61].mxu1  ;;  %2228 = vmatmul.mubr.f32.gmra.mrb[166].mxu1 %v801_v2  ;;  %1527 = vmatprep.mubr.f32.mxu0 %v804_v3  ;;  %v823_v3 = vld [vmem:[%s3172_s4 + $0xb20] sm:$0xff]  ;;  %v825_v5 = vld [vmem:[%s3172_s4 + $0xb30] sm:$0xff]  ;;  %v828_v6 = vld [vmem:[%s3172_s4 + $0xb48] sm:$0xff] }
 0x206   : > { %2232 = vmatprep.mubr.f32.mxu1 %v806_v7  ;;  %v830_v9 = vld [vmem:[%s3172_s4 + $0xb58] sm:$0xff]  ;;  %v375_v10 = vld [vmem:[%s5349_s2 + $0x120] sm:$0xff] }
 0x207   : > { %v2483_v16 = vadd.f32 %v1965_v11, %v369_v8  ;;  %v1264_v17 = vpop.f32.mrb[62].mxu0 }
 0x208   : > { %v1969_v20 = vpop.f32.mrb[62].mxu1  ;;  %v1266_v21 = vpop.f32.mrb[63].mxu0  ;;  %1528 = vmatmul.mubr.f32.gmra.mrb[168].mxu0 %v803_v13 }
 0x209   : > { %2612 = vst.msk [vmem:[%s5349_s2 + $0xf0] sm:$0xff] %vm2581_vm1, %v2483_v16  ;;  %v1970_v22 = vadd.f32 %v1969_v20, %v1264_v17  ;;  %v1971_v23 = vpop.f32.mrb[63].mxu1  ;;  %2233 = vmatmul.mubr.f32.gmra.mrb[168].mxu1 %v805_v14  ;;  %1532 = vmatprep.mubr.f32.mxu0 %v808_v15  ;;  %v827_v15 = vld [vmem:[%s3172_s4 + $0xb40] sm:$0xff]  ;;  %v829_v16 = vld [vmem:[%s3172_s4 + $0xb50] sm:$0xff]  ;;  %v832_v17 = vld [vmem:[%s3172_s4 + $0xb68] sm:$0xff] }
 0x20a   : > { %2237 = vmatprep.mubr.f32.mxu1 %v810_v18  ;;  %v834_v20 = vld [vmem:[%s3172_s4 + $0xb78] sm:$0xff]  ;;  %v376_v21 = vld [vmem:[%s5349_s2 + $0x128] sm:$0xff] }
 0x20b   : > { %v2484_v27 = vadd.f32 %v1970_v22, %v370_v19  ;;  %v1269_v28 = vpop.f32.mrb[64].mxu0 }
 0x20c   : > { %v1974_v31 = vpop.f32.mrb[64].mxu1  ;;  %v1271_v32 = vpop.f32.mrb[65].mxu0  ;;  %1533 = vmatmul.mubr.f32.gmra.mrb[170].mxu0 %v807_v24 }
 0x20d   : > { %2613 = vst.msk [vmem:[%s5349_s2 + $0xf8] sm:$0xff] %vm2581_vm1, %v2484_v27  ;;  %v1975_v33 = vadd.f32 %v1974_v31, %v1269_v28  ;;  %v1976_v34 = vpop.f32.mrb[65].mxu1  ;;  %2238 = vmatmul.mubr.f32.gmra.mrb[170].mxu1 %v809_v25  ;;  %1537 = vmatprep.mubr.f32.mxu0 %v812_v26  ;;  %v831_v26 = vld [vmem:[%s3172_s4 + $0xb60] sm:$0xff]  ;;  %v833_v27 = vld [vmem:[%s3172_s4 + $0xb70] sm:$0xff]  ;;  %v836_v28 = vld [vmem:[%s3172_s4 + $0xb88] sm:$0xff] }
 0x20e   : > { %2242 = vmatprep.mubr.f32.mxu1 %v814_v29  ;;  %v838_v31 = vld [vmem:[%s3172_s4 + $0xb98] sm:$0xff]  ;;  %v377_v32 = vld [vmem:[%s5349_s2 + $0x130] sm:$0xff] }
 0x20f   : > { %v2485_v38 = vadd.f32 %v1975_v33, %v371_v30  ;;  %v1274_v39 = vpop.f32.mrb[66].mxu0 }
 0x210   : > { %v1979_v42 = vpop.f32.mrb[66].mxu1  ;;  %v1276_v43 = vpop.f32.mrb[67].mxu0  ;;  %1538 = vmatmul.mubr.f32.gmra.mrb[172].mxu0 %v811_v35 }
 0x211   : > { %2614 = vst.msk [vmem:[%s5349_s2 + $0x100] sm:$0xff] %vm2581_vm1, %v2485_v38  ;;  %v1980_v4 = vadd.f32 %v1979_v42, %v1274_v39  ;;  %v1981_v44 = vpop.f32.mrb[67].mxu1  ;;  %2243 = vmatmul.mubr.f32.gmra.mrb[172].mxu1 %v813_v36  ;;  %1542 = vmatprep.mubr.f32.mxu0 %v816_v37  ;;  %v835_v37 = vld [vmem:[%s3172_s4 + $0xb80] sm:$0xff]  ;;  %v837_v38 = vld [vmem:[%s3172_s4 + $0xb90] sm:$0xff]  ;;  %v840_v39 = vld [vmem:[%s3172_s4 + $0xba8] sm:$0xff] }
 0x212   : > { %2247 = vmatprep.mubr.f32.mxu1 %v818_v40  ;;  %v842_v42 = vld [vmem:[%s3172_s4 + $0xbb8] sm:$0xff] }
 0x213   : > { %v2486_v48 = vadd.f32 %v1980_v4, %v372_v41  ;;  %v1279_v49 = vpop.f32.mrb[68].mxu0  ;;  %v378_v43 = vld [vmem:[%s5349_s2 + $0x138] sm:$0xff] }
 0x214   : > { %v1984_v52 = vpop.f32.mrb[68].mxu1  ;;  %v1281_v53 = vpop.f32.mrb[69].mxu0  ;;  %1543 = vmatmul.mubr.f32.gmra.mrb[174].mxu0 %v815_v45 }
 0x215   : > { %2615 = vst.msk [vmem:[%s5349_s2 + $0x108] sm:$0xff] %vm2581_vm1, %v2486_v48  ;;  %v1985_v54 = vadd.f32 %v1984_v52, %v1279_v49  ;;  %v1986_v55 = vpop.f32.mrb[69].mxu1  ;;  %2248 = vmatmul.mubr.f32.gmra.mrb[174].mxu1 %v817_v46  ;;  %1547 = vmatprep.mubr.f32.mxu0 %v820_v47  ;;  %v839_v47 = vld [vmem:[%s3172_s4 + $0xba0] sm:$0xff]  ;;  %v841_v48 = vld [vmem:[%s3172_s4 + $0xbb0] sm:$0xff]  ;;  %v844_v49 = vld [vmem:[%s3172_s4 + $0xbc8] sm:$0xff] }
 0x216   : > { %2252 = vmatprep.mubr.f32.mxu1 %v822_v50  ;;  %v846_v52 = vld [vmem:[%s3172_s4 + $0xbd8] sm:$0xff]  ;;  %v379_v53 = vld [vmem:[%s5349_s2 + $0x140] sm:$0xff] }
 0x217   : > { %v2487_v59 = vadd.f32 %v1985_v54, %v373_v51  ;;  %v1284_v60 = vpop.f32.mrb[70].mxu0 }
 0x218   : > { %v1989_v63 = vpop.f32.mrb[70].mxu1  ;;  %v1286_v0 = vpop.f32.mrb[71].mxu0  ;;  %1548 = vmatmul.mubr.f32.gmra.mrb[176].mxu0 %v819_v56 }
 0x219   : > { %2616 = vst.msk [vmem:[%s5349_s2 + $0x110] sm:$0xff] %vm2581_vm1, %v2487_v59  ;;  %v1990_v1 = vadd.f32 %v1989_v63, %v1284_v60  ;;  %v1991_v2 = vpop.f32.mrb[71].mxu1  ;;  %2253 = vmatmul.mubr.f32.gmra.mrb[176].mxu1 %v821_v57  ;;  %1552 = vmatprep.mubr.f32.mxu0 %v824_v58  ;;  %v843_v58 = vld [vmem:[%s3172_s4 + $0xbc0] sm:$0xff]  ;;  %v845_v59 = vld [vmem:[%s3172_s4 + $0xbd0] sm:$0xff]  ;;  %v848_v60 = vld [vmem:[%s3172_s4 + $0xbe8] sm:$0xff] }
 0x21a   : > { %2257 = vmatprep.mubr.f32.mxu1 %v826_v61  ;;  %v850_v63 = vld [vmem:[%s3172_s4 + $0xbf8] sm:$0xff]  ;;  %v380_v0 = vld [vmem:[%s5349_s2 + $0x148] sm:$0xff] }
 0x21b   : > { %v2488_v7 = vadd.f32 %v1990_v1, %v374_v62  ;;  %v1289_v8 = vpop.f32.mrb[72].mxu0 }
 0x21c   : > { %v1994_v11 = vpop.f32.mrb[72].mxu1  ;;  %v1291_v12 = vpop.f32.mrb[73].mxu0  ;;  %1553 = vmatmul.mubr.f32.gmra.mrb[178].mxu0 %v823_v3 }
 0x21d   : > { %2617 = vst.msk [vmem:[%s5349_s2 + $0x118] sm:$0xff] %vm2581_vm1, %v2488_v7  ;;  %v1995_v13 = vadd.f32 %v1994_v11, %v1289_v8  ;;  %v1996_v14 = vpop.f32.mrb[73].mxu1  ;;  %2258 = vmatmul.mubr.f32.gmra.mrb[178].mxu1 %v825_v5  ;;  %1557 = vmatprep.mubr.f32.mxu0 %v828_v6  ;;  %v847_v6 = vld [vmem:[%s3172_s4 + $0xbe0] sm:$0xff]  ;;  %v849_v7 = vld [vmem:[%s3172_s4 + $0xbf0] sm:$0xff]  ;;  %v852_v8 = vld [vmem:[%s3172_s4 + $0xc08] sm:$0xff] }
 0x21e   : > { %2262 = vmatprep.mubr.f32.mxu1 %v830_v9  ;;  %v854_v11 = vld [vmem:[%s3172_s4 + $0xc18] sm:$0xff]  ;;  %v381_v12 = vld [vmem:[%s5349_s2 + $0x150] sm:$0xff] }
 0x21f   : > { %v2489_v18 = vadd.f32 %v1995_v13, %v375_v10  ;;  %v1294_v19 = vpop.f32.mrb[74].mxu0 }
 0x220   : > { %v1999_v22 = vpop.f32.mrb[74].mxu1  ;;  %v1296_v23 = vpop.f32.mrb[75].mxu0  ;;  %1558 = vmatmul.mubr.f32.gmra.mrb[180].mxu0 %v827_v15 }
 0x221   : > { %2618 = vst.msk [vmem:[%s5349_s2 + $0x120] sm:$0xff] %vm2581_vm1, %v2489_v18  ;;  %v2000_v24 = vadd.f32 %v1999_v22, %v1294_v19  ;;  %v2001_v25 = vpop.f32.mrb[75].mxu1  ;;  %2263 = vmatmul.mubr.f32.gmra.mrb[180].mxu1 %v829_v16  ;;  %1562 = vmatprep.mubr.f32.mxu0 %v832_v17  ;;  %v851_v17 = vld [vmem:[%s3172_s4 + $0xc00] sm:$0xff]  ;;  %v853_v18 = vld [vmem:[%s3172_s4 + $0xc10] sm:$0xff]  ;;  %v856_v19 = vld [vmem:[%s3172_s4 + $0xc28] sm:$0xff] }
 0x222   : > { %2267 = vmatprep.mubr.f32.mxu1 %v834_v20  ;;  %v858_v22 = vld [vmem:[%s3172_s4 + $0xc38] sm:$0xff] }
 0x223   : > { %v2490_v29 = vadd.f32 %v2000_v24, %v376_v21  ;;  %v1299_v30 = vpop.f32.mrb[76].mxu0  ;;  %v382_v23 = vld [vmem:[%s5349_s2 + $0x158] sm:$0xff] }
 0x224   : > { %v2004_v33 = vpop.f32.mrb[76].mxu1  ;;  %v1301_v34 = vpop.f32.mrb[77].mxu0  ;;  %1563 = vmatmul.mubr.f32.gmra.mrb[182].mxu0 %v831_v26 }
 0x225   : > { %2619 = vst.msk [vmem:[%s5349_s2 + $0x128] sm:$0xff] %vm2581_vm1, %v2490_v29  ;;  %v2005_v35 = vadd.f32 %v2004_v33, %v1299_v30  ;;  %v2006_v36 = vpop.f32.mrb[77].mxu1  ;;  %2268 = vmatmul.mubr.f32.gmra.mrb[182].mxu1 %v833_v27  ;;  %1567 = vmatprep.mubr.f32.mxu0 %v836_v28  ;;  %v855_v28 = vld [vmem:[%s3172_s4 + $0xc20] sm:$0xff]  ;;  %v857_v29 = vld [vmem:[%s3172_s4 + $0xc30] sm:$0xff]  ;;  %v860_v30 = vld [vmem:[%s3172_s4 + $0xc48] sm:$0xff] }
 0x226   : > { %2272 = vmatprep.mubr.f32.mxu1 %v838_v31  ;;  %v862_v33 = vld [vmem:[%s3172_s4 + $0xc58] sm:$0xff]  ;;  %v383_v34 = vld [vmem:[%s5349_s2 + $0x160] sm:$0xff] }
 0x227   : > { %v2491_v40 = vadd.f32 %v2005_v35, %v377_v32  ;;  %v1304_v41 = vpop.f32.mrb[78].mxu0 }
 0x228   : > { %v2009_v4 = vpop.f32.mrb[78].mxu1  ;;  %v1306_v44 = vpop.f32.mrb[79].mxu0  ;;  %1568 = vmatmul.mubr.f32.gmra.mrb[184].mxu0 %v835_v37 }
 0x229   : > { %2620 = vst.msk [vmem:[%s5349_s2 + $0x130] sm:$0xff] %vm2581_vm1, %v2491_v40  ;;  %v2010_v45 = vadd.f32 %v2009_v4, %v1304_v41  ;;  %v2011_v46 = vpop.f32.mrb[79].mxu1  ;;  %2273 = vmatmul.mubr.f32.gmra.mrb[184].mxu1 %v837_v38  ;;  %1572 = vmatprep.mubr.f32.mxu0 %v840_v39  ;;  %v859_v39 = vld [vmem:[%s3172_s4 + $0xc40] sm:$0xff]  ;;  %v861_v40 = vld [vmem:[%s3172_s4 + $0xc50] sm:$0xff]  ;;  %v864_v41 = vld [vmem:[%s3172_s4 + $0xc68] sm:$0xff] }
 0x22a   : > { %2277 = vmatprep.mubr.f32.mxu1 %v842_v42  ;;  %v866_v4 = vld [vmem:[%s3172_s4 + $0xc78] sm:$0xff]  ;;  %v384_v44 = vld [vmem:[%s5349_s2 + $0x168] sm:$0xff] }
 0x22b   : > { %v2492_v50 = vadd.f32 %v2010_v45, %v378_v43  ;;  %v1309_v51 = vpop.f32.mrb[80].mxu0 }
 0x22c   : > { %v2014_v54 = vpop.f32.mrb[80].mxu1  ;;  %v1311_v55 = vpop.f32.mrb[81].mxu0  ;;  %1573 = vmatmul.mubr.f32.gmra.mrb[186].mxu0 %v839_v47 }
 0x22d   : > { %2621 = vst.msk [vmem:[%s5349_s2 + $0x138] sm:$0xff] %vm2581_vm1, %v2492_v50  ;;  %v2015_v56 = vadd.f32 %v2014_v54, %v1309_v51  ;;  %v2016_v57 = vpop.f32.mrb[81].mxu1  ;;  %2278 = vmatmul.mubr.f32.gmra.mrb[186].mxu1 %v841_v48  ;;  %1577 = vmatprep.mubr.f32.mxu0 %v844_v49  ;;  %v863_v49 = vld [vmem:[%s3172_s4 + $0xc60] sm:$0xff]  ;;  %v865_v50 = vld [vmem:[%s3172_s4 + $0xc70] sm:$0xff]  ;;  %v868_v51 = vld [vmem:[%s3172_s4 + $0xc88] sm:$0xff] }
 0x22e   : > { %2282 = vmatprep.mubr.f32.mxu1 %v846_v52  ;;  %v870_v54 = vld [vmem:[%s3172_s4 + $0xc98] sm:$0xff]  ;;  %v385_v55 = vld [vmem:[%s5349_s2 + $0x170] sm:$0xff] }
 0x22f   : > { %v2493_v61 = vadd.f32 %v2015_v56, %v379_v53  ;;  %v1314_v62 = vpop.f32.mrb[82].mxu0 }
 0x230   : > { %v2019_v1 = vpop.f32.mrb[82].mxu1  ;;  %v1316_v2 = vpop.f32.mrb[83].mxu0  ;;  %1578 = vmatmul.mubr.f32.gmra.mrb[188].mxu0 %v843_v58 }
 0x231   : > { %2622 = vst.msk [vmem:[%s5349_s2 + $0x140] sm:$0xff] %vm2581_vm1, %v2493_v61  ;;  %v2020_v3 = vadd.f32 %v2019_v1, %v1314_v62  ;;  %v2021_v5 = vpop.f32.mrb[83].mxu1  ;;  %2283 = vmatmul.mubr.f32.gmra.mrb[188].mxu1 %v845_v59  ;;  %1582 = vmatprep.mubr.f32.mxu0 %v848_v60  ;;  %v867_v60 = vld [vmem:[%s3172_s4 + $0xc80] sm:$0xff]  ;;  %v869_v61 = vld [vmem:[%s3172_s4 + $0xc90] sm:$0xff]  ;;  %v872_v62 = vld [vmem:[%s3172_s4 + $0xca8] sm:$0xff] }
 0x232   : > { %2287 = vmatprep.mubr.f32.mxu1 %v850_v63  ;;  %v874_v1 = vld [vmem:[%s3172_s4 + $0xcb8] sm:$0xff] }
 0x233   : > { %v2494_v9 = vadd.f32 %v2020_v3, %v380_v0  ;;  %v1319_v10 = vpop.f32.mrb[84].mxu0  ;;  %v386_v2 = vld [vmem:[%s5349_s2 + $0x178] sm:$0xff] }
 0x234   : > { %v2024_v13 = vpop.f32.mrb[84].mxu1  ;;  %v1321_v14 = vpop.f32.mrb[85].mxu0  ;;  %1583 = vmatmul.mubr.f32.gmra.mrb[190].mxu0 %v847_v6 }
 0x235   : > { %2623 = vst.msk [vmem:[%s5349_s2 + $0x148] sm:$0xff] %vm2581_vm1, %v2494_v9  ;;  %v2025_v15 = vadd.f32 %v2024_v13, %v1319_v10  ;;  %v2026_v16 = vpop.f32.mrb[85].mxu1  ;;  %2288 = vmatmul.mubr.f32.gmra.mrb[190].mxu1 %v849_v7  ;;  %1587 = vmatprep.mubr.f32.mxu0 %v852_v8  ;;  %v871_v8 = vld [vmem:[%s3172_s4 + $0xca0] sm:$0xff]  ;;  %v873_v9 = vld [vmem:[%s3172_s4 + $0xcb0] sm:$0xff]  ;;  %v876_v10 = vld [vmem:[%s3172_s4 + $0xcc8] sm:$0xff] }
 0x236   : > { %2292 = vmatprep.mubr.f32.mxu1 %v854_v11  ;;  %v878_v13 = vld [vmem:[%s3172_s4 + $0xcd8] sm:$0xff]  ;;  %v387_v14 = vld [vmem:[%s5349_s2 + $0x180] sm:$0xff] }
 0x237   : > { %v2495_v20 = vadd.f32 %v2025_v15, %v381_v12  ;;  %v1324_v21 = vpop.f32.mrb[86].mxu0 }
 0x238   : > { %v2029_v24 = vpop.f32.mrb[86].mxu1  ;;  %v1326_v25 = vpop.f32.mrb[87].mxu0  ;;  %1588 = vmatmul.mubr.f32.gmra.mrb[192].mxu0 %v851_v17 }
 0x239   : > { %2624 = vst.msk [vmem:[%s5349_s2 + $0x150] sm:$0xff] %vm2581_vm1, %v2495_v20  ;;  %v2030_v26 = vadd.f32 %v2029_v24, %v1324_v21  ;;  %v2031_v27 = vpop.f32.mrb[87].mxu1  ;;  %2293 = vmatmul.mubr.f32.gmra.mrb[192].mxu1 %v853_v18  ;;  %1592 = vmatprep.mubr.f32.mxu0 %v856_v19  ;;  %v875_v19 = vld [vmem:[%s3172_s4 + $0xcc0] sm:$0xff]  ;;  %v877_v20 = vld [vmem:[%s3172_s4 + $0xcd0] sm:$0xff]  ;;  %v880_v21 = vld [vmem:[%s3172_s4 + $0xce8] sm:$0xff] }
 0x23a   : > { %2297 = vmatprep.mubr.f32.mxu1 %v858_v22  ;;  %v882_v24 = vld [vmem:[%s3172_s4 + $0xcf8] sm:$0xff]  ;;  %v388_v25 = vld [vmem:[%s5349_s2 + $0x188] sm:$0xff] }
 0x23b   : > { %v2496_v31 = vadd.f32 %v2030_v26, %v382_v23  ;;  %v1329_v32 = vpop.f32.mrb[88].mxu0 }
 0x23c   : > { %v2034_v35 = vpop.f32.mrb[88].mxu1  ;;  %v1331_v36 = vpop.f32.mrb[89].mxu0  ;;  %1593 = vmatmul.mubr.f32.gmra.mrb[194].mxu0 %v855_v28 }
 0x23d   : > { %2625 = vst.msk [vmem:[%s5349_s2 + $0x158] sm:$0xff] %vm2581_vm1, %v2496_v31  ;;  %v2035_v37 = vadd.f32 %v2034_v35, %v1329_v32  ;;  %v2036_v38 = vpop.f32.mrb[89].mxu1  ;;  %2298 = vmatmul.mubr.f32.gmra.mrb[194].mxu1 %v857_v29  ;;  %1597 = vmatprep.mubr.f32.mxu0 %v860_v30  ;;  %v879_v30 = vld [vmem:[%s3172_s4 + $0xce0] sm:$0xff]  ;;  %v881_v31 = vld [vmem:[%s3172_s4 + $0xcf0] sm:$0xff]  ;;  %v884_v32 = vld [vmem:[%s3172_s4 + $0xd08] sm:$0xff] }
 0x23e   : > { %2302 = vmatprep.mubr.f32.mxu1 %v862_v33  ;;  %v886_v35 = vld [vmem:[%s3172_s4 + $0xd18] sm:$0xff]  ;;  %v389_v36 = vld [vmem:[%s5349_s2 + $0x190] sm:$0xff] }
 0x23f   : > { %v2497_v42 = vadd.f32 %v2035_v37, %v383_v34  ;;  %v1334_v43 = vpop.f32.mrb[90].mxu0 }
 0x240   : > { %v2039_v45 = vpop.f32.mrb[90].mxu1  ;;  %v1336_v46 = vpop.f32.mrb[91].mxu0  ;;  %1598 = vmatmul.mubr.f32.gmra.mrb[196].mxu0 %v859_v39 }
 0x241   : > { %2626 = vst.msk [vmem:[%s5349_s2 + $0x160] sm:$0xff] %vm2581_vm1, %v2497_v42  ;;  %v2040_v47 = vadd.f32 %v2039_v45, %v1334_v43  ;;  %v2041_v48 = vpop.f32.mrb[91].mxu1  ;;  %2303 = vmatmul.mubr.f32.gmra.mrb[196].mxu1 %v861_v40  ;;  %1602 = vmatprep.mubr.f32.mxu0 %v864_v41  ;;  %v883_v41 = vld [vmem:[%s3172_s4 + $0xd00] sm:$0xff]  ;;  %v885_v42 = vld [vmem:[%s3172_s4 + $0xd10] sm:$0xff]  ;;  %v888_v43 = vld [vmem:[%s3172_s4 + $0xd28] sm:$0xff] }
 0x242   : > { %2307 = vmatprep.mubr.f32.mxu1 %v866_v4  ;;  %v890_v45 = vld [vmem:[%s3172_s4 + $0xd38] sm:$0xff] }
 0x243   : > { %v2498_v52 = vadd.f32 %v2040_v47, %v384_v44  ;;  %v1339_v53 = vpop.f32.mrb[92].mxu0  ;;  %v390_v46 = vld [vmem:[%s5349_s2 + $0x198] sm:$0xff] }
 0x244   : > { %v2044_v56 = vpop.f32.mrb[92].mxu1  ;;  %v1341_v57 = vpop.f32.mrb[93].mxu0  ;;  %1603 = vmatmul.mubr.f32.gmra.mrb[198].mxu0 %v863_v49 }
 0x245   : > { %2627 = vst.msk [vmem:[%s5349_s2 + $0x168] sm:$0xff] %vm2581_vm1, %v2498_v52  ;;  %v2045_v58 = vadd.f32 %v2044_v56, %v1339_v53  ;;  %v2046_v59 = vpop.f32.mrb[93].mxu1  ;;  %2308 = vmatmul.mubr.f32.gmra.mrb[198].mxu1 %v865_v50  ;;  %1607 = vmatprep.mubr.f32.mxu0 %v868_v51  ;;  %v887_v51 = vld [vmem:[%s3172_s4 + $0xd20] sm:$0xff]  ;;  %v889_v52 = vld [vmem:[%s3172_s4 + $0xd30] sm:$0xff]  ;;  %v892_v53 = vld [vmem:[%s3172_s4 + $0xd48] sm:$0xff] }
 0x246   : > { %2312 = vmatprep.mubr.f32.mxu1 %v870_v54  ;;  %v894_v56 = vld [vmem:[%s3172_s4 + $0xd58] sm:$0xff]  ;;  %v391_v57 = vld [vmem:[%s5349_s2 + $0x1a0] sm:$0xff] }
 0x247   : > { %v2499_v63 = vadd.f32 %v2045_v58, %v385_v55  ;;  %v1344_v0 = vpop.f32.mrb[94].mxu0 }
 0x248   : > { %v2049_v3 = vpop.f32.mrb[94].mxu1  ;;  %v1346_v5 = vpop.f32.mrb[95].mxu0  ;;  %1608 = vmatmul.mubr.f32.gmra.mrb[200].mxu0 %v867_v60 }
 0x249   : > { %2628 = vst.msk [vmem:[%s5349_s2 + $0x170] sm:$0xff] %vm2581_vm1, %v2499_v63  ;;  %v2050_v6 = vadd.f32 %v2049_v3, %v1344_v0  ;;  %v2051_v7 = vpop.f32.mrb[95].mxu1  ;;  %2313 = vmatmul.mubr.f32.gmra.mrb[200].mxu1 %v869_v61  ;;  %1612 = vmatprep.mubr.f32.mxu0 %v872_v62  ;;  %v891_v62 = vld [vmem:[%s3172_s4 + $0xd40] sm:$0xff]  ;;  %v893_v63 = vld [vmem:[%s3172_s4 + $0xd50] sm:$0xff]  ;;  %v896_v0 = vld [vmem:[%s3172_s4 + $0xd68] sm:$0xff] }
 0x24a   : > { %2317 = vmatprep.mubr.f32.mxu1 %v874_v1  ;;  %v898_v3 = vld [vmem:[%s3172_s4 + $0xd78] sm:$0xff]  ;;  %v392_v5 = vld [vmem:[%s5349_s2 + $0x1a8] sm:$0xff] }
 0x24b   : > { %v2500_v11 = vadd.f32 %v2050_v6, %v386_v2  ;;  %v1349_v12 = vpop.f32.mrb[96].mxu0 }
 0x24c   : > { %v2054_v15 = vpop.f32.mrb[96].mxu1  ;;  %v1351_v16 = vpop.f32.mrb[97].mxu0  ;;  %1613 = vmatmul.mubr.f32.gmra.mrb[202].mxu0 %v871_v8 }
 0x24d   : > { %2629 = vst.msk [vmem:[%s5349_s2 + $0x178] sm:$0xff] %vm2581_vm1, %v2500_v11  ;;  %v2055_v17 = vadd.f32 %v2054_v15, %v1349_v12  ;;  %v2056_v18 = vpop.f32.mrb[97].mxu1  ;;  %2318 = vmatmul.mubr.f32.gmra.mrb[202].mxu1 %v873_v9  ;;  %1617 = vmatprep.mubr.f32.mxu0 %v876_v10  ;;  %v895_v10 = vld [vmem:[%s3172_s4 + $0xd60] sm:$0xff]  ;;  %v897_v11 = vld [vmem:[%s3172_s4 + $0xd70] sm:$0xff]  ;;  %v900_v12 = vld [vmem:[%s3172_s4 + $0xd88] sm:$0xff] }
 0x24e   : > { %2322 = vmatprep.mubr.f32.mxu1 %v878_v13  ;;  %v902_v15 = vld [vmem:[%s3172_s4 + $0xd98] sm:$0xff]  ;;  %v393_v16 = vld [vmem:[%s5349_s2 + $0x1b0] sm:$0xff] }
 0x24f   : > { %v2501_v22 = vadd.f32 %v2055_v17, %v387_v14  ;;  %v1354_v23 = vpop.f32.mrb[98].mxu0 }
 0x250   : > { %v2059_v26 = vpop.f32.mrb[98].mxu1  ;;  %v1356_v27 = vpop.f32.mrb[99].mxu0  ;;  %1618 = vmatmul.mubr.f32.gmra.mrb[204].mxu0 %v875_v19 }
 0x251   : > { %2630 = vst.msk [vmem:[%s5349_s2 + $0x180] sm:$0xff] %vm2581_vm1, %v2501_v22  ;;  %v2060_v28 = vadd.f32 %v2059_v26, %v1354_v23  ;;  %v2061_v29 = vpop.f32.mrb[99].mxu1  ;;  %2323 = vmatmul.mubr.f32.gmra.mrb[204].mxu1 %v877_v20  ;;  %1622 = vmatprep.mubr.f32.mxu0 %v880_v21  ;;  %v899_v21 = vld [vmem:[%s3172_s4 + $0xd80] sm:$0xff]  ;;  %v901_v22 = vld [vmem:[%s3172_s4 + $0xd90] sm:$0xff]  ;;  %v904_v23 = vld [vmem:[%s3172_s4 + $0xda8] sm:$0xff] }
 0x252   : > { %2327 = vmatprep.mubr.f32.mxu1 %v882_v24  ;;  %v906_v26 = vld [vmem:[%s3172_s4 + $0xdb8] sm:$0xff] }
 0x253   : > { %v2502_v33 = vadd.f32 %v2060_v28, %v388_v25  ;;  %v1359_v34 = vpop.f32.mrb[100].mxu0  ;;  %v394_v27 = vld [vmem:[%s5349_s2 + $0x1b8] sm:$0xff] }
 0x254   : > { %v2064_v37 = vpop.f32.mrb[100].mxu1  ;;  %v1361_v38 = vpop.f32.mrb[101].mxu0  ;;  %1623 = vmatmul.mubr.f32.gmra.mrb[206].mxu0 %v879_v30 }
 0x255   : > { %2631 = vst.msk [vmem:[%s5349_s2 + $0x188] sm:$0xff] %vm2581_vm1, %v2502_v33  ;;  %v2065_v39 = vadd.f32 %v2064_v37, %v1359_v34  ;;  %v2066_v40 = vpop.f32.mrb[101].mxu1  ;;  %2328 = vmatmul.mubr.f32.gmra.mrb[206].mxu1 %v881_v31  ;;  %1627 = vmatprep.mubr.f32.mxu0 %v884_v32  ;;  %v903_v32 = vld [vmem:[%s3172_s4 + $0xda0] sm:$0xff]  ;;  %v905_v33 = vld [vmem:[%s3172_s4 + $0xdb0] sm:$0xff]  ;;  %v908_v34 = vld [vmem:[%s3172_s4 + $0xdc8] sm:$0xff] }
 0x256   : > { %2332 = vmatprep.mubr.f32.mxu1 %v886_v35  ;;  %v910_v37 = vld [vmem:[%s3172_s4 + $0xdd8] sm:$0xff]  ;;  %v395_v38 = vld [vmem:[%s5349_s2 + $0x1c0] sm:$0xff] }
 0x257   : > { %v2503_v4 = vadd.f32 %v2065_v39, %v389_v36  ;;  %v1364_v44 = vpop.f32.mrb[102].mxu0 }
 0x258   : > { %v2069_v47 = vpop.f32.mrb[102].mxu1  ;;  %v1366_v48 = vpop.f32.mrb[103].mxu0  ;;  %1628 = vmatmul.mubr.f32.gmra.mrb[208].mxu0 %v883_v41 }
 0x259   : > { %2632 = vst.msk [vmem:[%s5349_s2 + $0x190] sm:$0xff] %vm2581_vm1, %v2503_v4  ;;  %v2070_v49 = vadd.f32 %v2069_v47, %v1364_v44  ;;  %v2071_v50 = vpop.f32.mrb[103].mxu1  ;;  %2333 = vmatmul.mubr.f32.gmra.mrb[208].mxu1 %v885_v42  ;;  %1632 = vmatprep.mubr.f32.mxu0 %v888_v43  ;;  %v907_v43 = vld [vmem:[%s3172_s4 + $0xdc0] sm:$0xff]  ;;  %v909_v4 = vld [vmem:[%s3172_s4 + $0xdd0] sm:$0xff]  ;;  %v912_v44 = vld [vmem:[%s3172_s4 + $0xde8] sm:$0xff] }
 0x25a   : > { %2337 = vmatprep.mubr.f32.mxu1 %v890_v45  ;;  %v914_v47 = vld [vmem:[%s3172_s4 + $0xdf8] sm:$0xff]  ;;  %v396_v48 = vld [vmem:[%s5349_s2 + $0x1c8] sm:$0xff] }
 0x25b   : > { %v2504_v54 = vadd.f32 %v2070_v49, %v390_v46  ;;  %v1369_v55 = vpop.f32.mrb[104].mxu0 }
 0x25c   : > { %v2074_v58 = vpop.f32.mrb[104].mxu1  ;;  %v1371_v59 = vpop.f32.mrb[105].mxu0  ;;  %1633 = vmatmul.mubr.f32.gmra.mrb[210].mxu0 %v887_v51 }
 0x25d   : > { %2633 = vst.msk [vmem:[%s5349_s2 + $0x198] sm:$0xff] %vm2581_vm1, %v2504_v54  ;;  %v2075_v60 = vadd.f32 %v2074_v58, %v1369_v55  ;;  %v2076_v61 = vpop.f32.mrb[105].mxu1  ;;  %2338 = vmatmul.mubr.f32.gmra.mrb[210].mxu1 %v889_v52  ;;  %1637 = vmatprep.mubr.f32.mxu0 %v892_v53  ;;  %v911_v53 = vld [vmem:[%s3172_s4 + $0xde0] sm:$0xff]  ;;  %v913_v54 = vld [vmem:[%s3172_s4 + $0xdf0] sm:$0xff]  ;;  %v916_v55 = vld [vmem:[%s3172_s4 + $0xe08] sm:$0xff] }
 0x25e   : > { %2342 = vmatprep.mubr.f32.mxu1 %v894_v56  ;;  %v918_v58 = vld [vmem:[%s3172_s4 + $0xe18] sm:$0xff]  ;;  %v397_v59 = vld [vmem:[%s5349_s2 + $0x1d0] sm:$0xff] }
 0x25f   : > { %v2505_v1 = vadd.f32 %v2075_v60, %v391_v57  ;;  %v1374_v2 = vpop.f32.mrb[106].mxu0 }
 0x260   : > { %v2079_v6 = vpop.f32.mrb[106].mxu1  ;;  %v1376_v7 = vpop.f32.mrb[107].mxu0  ;;  %1638 = vmatmul.mubr.f32.gmra.mrb[212].mxu0 %v891_v62 }
 0x261   : > { %2634 = vst.msk [vmem:[%s5349_s2 + $0x1a0] sm:$0xff] %vm2581_vm1, %v2505_v1  ;;  %v2080_v8 = vadd.f32 %v2079_v6, %v1374_v2  ;;  %v2081_v9 = vpop.f32.mrb[107].mxu1  ;;  %2343 = vmatmul.mubr.f32.gmra.mrb[212].mxu1 %v893_v63  ;;  %1642 = vmatprep.mubr.f32.mxu0 %v896_v0  ;;  %v915_v0 = vld [vmem:[%s3172_s4 + $0xe00] sm:$0xff]  ;;  %v917_v1 = vld [vmem:[%s3172_s4 + $0xe10] sm:$0xff]  ;;  %v920_v2 = vld [vmem:[%s3172_s4 + $0xe28] sm:$0xff] }
 0x262   : > { %2347 = vmatprep.mubr.f32.mxu1 %v898_v3  ;;  %v922_v6 = vld [vmem:[%s3172_s4 + $0xe38] sm:$0xff] }
 0x263   : > { %v2506_v13 = vadd.f32 %v2080_v8, %v392_v5  ;;  %v1379_v14 = vpop.f32.mrb[108].mxu0  ;;  %v398_v7 = vld [vmem:[%s5349_s2 + $0x1d8] sm:$0xff] }
 0x264   : > { %v2084_v17 = vpop.f32.mrb[108].mxu1  ;;  %v1381_v18 = vpop.f32.mrb[109].mxu0  ;;  %1643 = vmatmul.mubr.f32.gmra.mrb[214].mxu0 %v895_v10 }
 0x265   : > { %2635 = vst.msk [vmem:[%s5349_s2 + $0x1a8] sm:$0xff] %vm2581_vm1, %v2506_v13  ;;  %v2085_v19 = vadd.f32 %v2084_v17, %v1379_v14  ;;  %v2086_v20 = vpop.f32.mrb[109].mxu1  ;;  %2348 = vmatmul.mubr.f32.gmra.mrb[214].mxu1 %v897_v11  ;;  %1647 = vmatprep.mubr.f32.mxu0 %v900_v12  ;;  %v919_v12 = vld [vmem:[%s3172_s4 + $0xe20] sm:$0xff]  ;;  %v921_v13 = vld [vmem:[%s3172_s4 + $0xe30] sm:$0xff]  ;;  %v924_v14 = vld [vmem:[%s3172_s4 + $0xe48] sm:$0xff] }
 0x266   : > { %2352 = vmatprep.mubr.f32.mxu1 %v902_v15  ;;  %v926_v17 = vld [vmem:[%s3172_s4 + $0xe58] sm:$0xff]  ;;  %v399_v18 = vld [vmem:[%s5349_s2 + $0x1e0] sm:$0xff] }
 0x267   : > { %v2507_v24 = vadd.f32 %v2085_v19, %v393_v16  ;;  %v1384_v25 = vpop.f32.mrb[110].mxu0 }
 0x268   : > { %v2089_v28 = vpop.f32.mrb[110].mxu1  ;;  %v1386_v29 = vpop.f32.mrb[111].mxu0  ;;  %1648 = vmatmul.mubr.f32.gmra.mrb[216].mxu0 %v899_v21 }
 0x269   : > { %2636 = vst.msk [vmem:[%s5349_s2 + $0x1b0] sm:$0xff] %vm2581_vm1, %v2507_v24  ;;  %v2090_v30 = vadd.f32 %v2089_v28, %v1384_v25  ;;  %v2091_v31 = vpop.f32.mrb[111].mxu1  ;;  %2353 = vmatmul.mubr.f32.gmra.mrb[216].mxu1 %v901_v22  ;;  %1652 = vmatprep.mubr.f32.mxu0 %v904_v23  ;;  %v923_v23 = vld [vmem:[%s3172_s4 + $0xe40] sm:$0xff]  ;;  %v925_v24 = vld [vmem:[%s3172_s4 + $0xe50] sm:$0xff]  ;;  %v928_v25 = vld [vmem:[%s3172_s4 + $0xe68] sm:$0xff] }
 0x26a   : > { %2357 = vmatprep.mubr.f32.mxu1 %v906_v26  ;;  %v930_v28 = vld [vmem:[%s3172_s4 + $0xe78] sm:$0xff]  ;;  %v400_v29 = vld [vmem:[%s5349_s2 + $0x1e8] sm:$0xff] }
 0x26b   : > { %v2508_v35 = vadd.f32 %v2090_v30, %v394_v27  ;;  %v1389_v36 = vpop.f32.mrb[112].mxu0 }
 0x26c   : > { %v2094_v39 = vpop.f32.mrb[112].mxu1  ;;  %v1391_v40 = vpop.f32.mrb[113].mxu0  ;;  %1653 = vmatmul.mubr.f32.gmra.mrb[218].mxu0 %v903_v32 }
 0x26d   : > { %2637 = vst.msk [vmem:[%s5349_s2 + $0x1b8] sm:$0xff] %vm2581_vm1, %v2508_v35  ;;  %v2095_v41 = vadd.f32 %v2094_v39, %v1389_v36  ;;  %v2096_v42 = vpop.f32.mrb[113].mxu1  ;;  %2358 = vmatmul.mubr.f32.gmra.mrb[218].mxu1 %v905_v33  ;;  %1657 = vmatprep.mubr.f32.mxu0 %v908_v34  ;;  %v927_v34 = vld [vmem:[%s3172_s4 + $0xe60] sm:$0xff]  ;;  %v929_v35 = vld [vmem:[%s3172_s4 + $0xe70] sm:$0xff]  ;;  %v932_v36 = vld [vmem:[%s3172_s4 + $0xe88] sm:$0xff] }
 0x26e   : > { %2362 = vmatprep.mubr.f32.mxu1 %v910_v37  ;;  %v934_v39 = vld [vmem:[%s3172_s4 + $0xe98] sm:$0xff]  ;;  %v401_v40 = vld [vmem:[%s5349_s2 + $0x1f0] sm:$0xff] }
 0x26f   : > { %v2509_v45 = vadd.f32 %v2095_v41, %v395_v38  ;;  %v1394_v46 = vpop.f32.mrb[114].mxu0 }
 0x270   : > { %v2099_v49 = vpop.f32.mrb[114].mxu1  ;;  %v1396_v50 = vpop.f32.mrb[115].mxu0  ;;  %1658 = vmatmul.mubr.f32.gmra.mrb[220].mxu0 %v907_v43 }
 0x271   : > { %2638 = vst.msk [vmem:[%s5349_s2 + $0x1c0] sm:$0xff] %vm2581_vm1, %v2509_v45  ;;  %v2100_v51 = vadd.f32 %v2099_v49, %v1394_v46  ;;  %v2101_v52 = vpop.f32.mrb[115].mxu1  ;;  %2363 = vmatmul.mubr.f32.gmra.mrb[220].mxu1 %v909_v4  ;;  %1662 = vmatprep.mubr.f32.mxu0 %v912_v44  ;;  %v931_v44 = vld [vmem:[%s3172_s4 + $0xe80] sm:$0xff]  ;;  %v933_v45 = vld [vmem:[%s3172_s4 + $0xe90] sm:$0xff]  ;;  %v936_v46 = vld [vmem:[%s3172_s4 + $0xea8] sm:$0xff] }
 0x272   : > { %2367 = vmatprep.mubr.f32.mxu1 %v914_v47  ;;  %v938_v49 = vld [vmem:[%s3172_s4 + $0xeb8] sm:$0xff] }
 0x273   : > { %v2510_v56 = vadd.f32 %v2100_v51, %v396_v48  ;;  %v1399_v57 = vpop.f32.mrb[116].mxu0  ;;  %v402_v50 = vld [vmem:[%s5349_s2 + $0x1f8] sm:$0xff] }
 0x274   : > { %v2104_v60 = vpop.f32.mrb[116].mxu1  ;;  %v1401_v61 = vpop.f32.mrb[117].mxu0  ;;  %1663 = vmatmul.mubr.f32.gmra.mrb[222].mxu0 %v911_v53 }
 0x275   : > { %2639 = vst.msk [vmem:[%s5349_s2 + $0x1c8] sm:$0xff] %vm2581_vm1, %v2510_v56  ;;  %v2105_v62 = vadd.f32 %v2104_v60, %v1399_v57  ;;  %v2106_v63 = vpop.f32.mrb[117].mxu1  ;;  %2368 = vmatmul.mubr.f32.gmra.mrb[222].mxu1 %v913_v54  ;;  %1667 = vmatprep.mubr.f32.mxu0 %v916_v55  ;;  %v935_v55 = vld [vmem:[%s3172_s4 + $0xea0] sm:$0xff]  ;;  %v937_v56 = vld [vmem:[%s3172_s4 + $0xeb0] sm:$0xff]  ;;  %v940_v57 = vld [vmem:[%s3172_s4 + $0xec8] sm:$0xff] }
 0x276   : > { %2372 = vmatprep.mubr.f32.mxu1 %v918_v58  ;;  %v942_v60 = vld [vmem:[%s3172_s4 + $0xed8] sm:$0xff]  ;;  %v403_v61 = vld [vmem:[%s5349_s2 + $0x200] sm:$0xff] }
 0x277   : > { %v2511_v3 = vadd.f32 %v2105_v62, %v397_v59  ;;  %v1404_v5 = vpop.f32.mrb[118].mxu0 }
 0x278   : > { %v2109_v8 = vpop.f32.mrb[118].mxu1  ;;  %v1406_v9 = vpop.f32.mrb[119].mxu0  ;;  %1668 = vmatmul.mubr.f32.gmra.mrb[224].mxu0 %v915_v0 }
 0x279   : > { %2640 = vst.msk [vmem:[%s5349_s2 + $0x1d0] sm:$0xff] %vm2581_vm1, %v2511_v3  ;;  %v2110_v10 = vadd.f32 %v2109_v8, %v1404_v5  ;;  %v2111_v11 = vpop.f32.mrb[119].mxu1  ;;  %2373 = vmatmul.mubr.f32.gmra.mrb[224].mxu1 %v917_v1  ;;  %1672 = vmatprep.mubr.f32.mxu0 %v920_v2  ;;  %v939_v2 = vld [vmem:[%s3172_s4 + $0xec0] sm:$0xff]  ;;  %v941_v3 = vld [vmem:[%s3172_s4 + $0xed0] sm:$0xff]  ;;  %v944_v5 = vld [vmem:[%s3172_s4 + $0xee8] sm:$0xff] }
 0x27a   : > { %2377 = vmatprep.mubr.f32.mxu1 %v922_v6  ;;  %v946_v8 = vld [vmem:[%s3172_s4 + $0xef8] sm:$0xff]  ;;  %v404_v9 = vld [vmem:[%s5349_s2 + $0x208] sm:$0xff] }
 0x27b   : > { %v2512_v15 = vadd.f32 %v2110_v10, %v398_v7  ;;  %v1409_v16 = vpop.f32.mrb[120].mxu0 }
 0x27c   : > { %v2114_v19 = vpop.f32.mrb[120].mxu1  ;;  %v1411_v20 = vpop.f32.mrb[121].mxu0  ;;  %1673 = vmatmul.mubr.f32.gmra.mrb[226].mxu0 %v919_v12 }
 0x27d   : > { %2641 = vst.msk [vmem:[%s5349_s2 + $0x1d8] sm:$0xff] %vm2581_vm1, %v2512_v15  ;;  %v2115_v21 = vadd.f32 %v2114_v19, %v1409_v16  ;;  %v2116_v22 = vpop.f32.mrb[121].mxu1  ;;  %2378 = vmatmul.mubr.f32.gmra.mrb[226].mxu1 %v921_v13  ;;  %1677 = vmatprep.mubr.f32.mxu0 %v924_v14  ;;  %v943_v14 = vld [vmem:[%s3172_s4 + $0xee0] sm:$0xff]  ;;  %v945_v15 = vld [vmem:[%s3172_s4 + $0xef0] sm:$0xff]  ;;  %v948_v16 = vld [vmem:[%s3172_s4 + $0xf08] sm:$0xff] }
 0x27e   : > { %2382 = vmatprep.mubr.f32.mxu1 %v926_v17  ;;  %v950_v19 = vld [vmem:[%s3172_s4 + $0xf18] sm:$0xff]  ;;  %v405_v20 = vld [vmem:[%s5349_s2 + $0x210] sm:$0xff] }
 0x27f   : > { %v2513_v26 = vadd.f32 %v2115_v21, %v399_v18  ;;  %v1414_v27 = vpop.f32.mrb[122].mxu0 }
 0x280   : > { %v2119_v30 = vpop.f32.mrb[122].mxu1  ;;  %v1416_v31 = vpop.f32.mrb[123].mxu0  ;;  %1678 = vmatmul.mubr.f32.gmra.mrb[228].mxu0 %v923_v23 }
 0x281   : > { %2642 = vst.msk [vmem:[%s5349_s2 + $0x1e0] sm:$0xff] %vm2581_vm1, %v2513_v26  ;;  %v2120_v32 = vadd.f32 %v2119_v30, %v1414_v27  ;;  %v2121_v33 = vpop.f32.mrb[123].mxu1  ;;  %2383 = vmatmul.mubr.f32.gmra.mrb[228].mxu1 %v925_v24  ;;  %1682 = vmatprep.mubr.f32.mxu0 %v928_v25  ;;  %v947_v25 = vld [vmem:[%s3172_s4 + $0xf00] sm:$0xff]  ;;  %v949_v26 = vld [vmem:[%s3172_s4 + $0xf10] sm:$0xff]  ;;  %v952_v27 = vld [vmem:[%s3172_s4 + $0xf28] sm:$0xff] }
 0x282   : > { %2387 = vmatprep.mubr.f32.mxu1 %v930_v28  ;;  %v954_v30 = vld [vmem:[%s3172_s4 + $0xf38] sm:$0xff] }
 0x283   : > { %v2514_v37 = vadd.f32 %v2120_v32, %v400_v29  ;;  %v1419_v38 = vpop.f32.mrb[124].mxu0  ;;  %v406_v31 = vld [vmem:[%s5349_s2 + $0x218] sm:$0xff] }
 0x284   : > { %v2124_v41 = vpop.f32.mrb[124].mxu1  ;;  %v1421_v42 = vpop.f32.mrb[125].mxu0  ;;  %1683 = vmatmul.mubr.f32.gmra.mrb[230].mxu0 %v927_v34 }
 0x285   : > { %2643 = vst.msk [vmem:[%s5349_s2 + $0x1e8] sm:$0xff] %vm2581_vm1, %v2514_v37  ;;  %v2125_v43 = vadd.f32 %v2124_v41, %v1419_v38  ;;  %v2126_v4 = vpop.f32.mrb[125].mxu1  ;;  %2388 = vmatmul.mubr.f32.gmra.mrb[230].mxu1 %v929_v35  ;;  %1687 = vmatprep.mubr.f32.mxu0 %v932_v36  ;;  %v951_v36 = vld [vmem:[%s3172_s4 + $0xf20] sm:$0xff]  ;;  %v953_v37 = vld [vmem:[%s3172_s4 + $0xf30] sm:$0xff]  ;;  %v956_v38 = vld [vmem:[%s3172_s4 + $0xf48] sm:$0xff] }
 0x286   : > { %2392 = vmatprep.mubr.f32.mxu1 %v934_v39  ;;  %v958_v41 = vld [vmem:[%s3172_s4 + $0xf58] sm:$0xff]  ;;  %v407_v42 = vld [vmem:[%s5349_s2 + $0x220] sm:$0xff] }
 0x287   : > { %v2515_v47 = vadd.f32 %v2125_v43, %v401_v40  ;;  %v1424_v48 = vpop.f32.mrb[126].mxu0 }
 0x288   : > { %v2129_v51 = vpop.f32.mrb[126].mxu1  ;;  %v1426_v52 = vpop.f32.mrb[127].mxu0  ;;  %1688 = vmatmul.mubr.f32.gmra.mrb[232].mxu0 %v931_v44 }
 0x289   : > { %2644 = vst.msk [vmem:[%s5349_s2 + $0x1f0] sm:$0xff] %vm2581_vm1, %v2515_v47  ;;  %v2130_v53 = vadd.f32 %v2129_v51, %v1424_v48  ;;  %v2131_v54 = vpop.f32.mrb[127].mxu1  ;;  %2393 = vmatmul.mubr.f32.gmra.mrb[232].mxu1 %v933_v45  ;;  %1692 = vmatprep.mubr.f32.mxu0 %v936_v46  ;;  %v955_v46 = vld [vmem:[%s3172_s4 + $0xf40] sm:$0xff]  ;;  %v957_v47 = vld [vmem:[%s3172_s4 + $0xf50] sm:$0xff]  ;;  %v960_v48 = vld [vmem:[%s3172_s4 + $0xf68] sm:$0xff] }
 0x28a   : > { %2397 = vmatprep.mubr.f32.mxu1 %v938_v49  ;;  %v962_v51 = vld [vmem:[%s3172_s4 + $0xf78] sm:$0xff]  ;;  %v408_v52 = vld [vmem:[%s5349_s2 + $0x228] sm:$0xff] }
 0x28b   : > { %v2516_v58 = vadd.f32 %v2130_v53, %v402_v50  ;;  %v1429_v59 = vpop.f32.mrb[128].mxu0 }
 0x28c   : > { %v2134_v62 = vpop.f32.mrb[128].mxu1  ;;  %v1431_v63 = vpop.f32.mrb[129].mxu0  ;;  %1693 = vmatmul.mubr.f32.gmra.mrb[234].mxu0 %v935_v55 }
 0x28d   : > { %2645 = vst.msk [vmem:[%s5349_s2 + $0x1f8] sm:$0xff] %vm2581_vm1, %v2516_v58  ;;  %v2135_v0 = vadd.f32 %v2134_v62, %v1429_v59  ;;  %v2136_v1 = vpop.f32.mrb[129].mxu1  ;;  %2398 = vmatmul.mubr.f32.gmra.mrb[234].mxu1 %v937_v56  ;;  %1697 = vmatprep.mubr.f32.mxu0 %v940_v57  ;;  %v959_v57 = vld [vmem:[%s3172_s4 + $0xf60] sm:$0xff]  ;;  %v961_v58 = vld [vmem:[%s3172_s4 + $0xf70] sm:$0xff]  ;;  %v964_v59 = vld [vmem:[%s3172_s4 + $0xf88] sm:$0xff] }
 0x28e   : > { %2402 = vmatprep.mubr.f32.mxu1 %v942_v60  ;;  %v966_v62 = vld [vmem:[%s3172_s4 + $0xf98] sm:$0xff]  ;;  %v409_v63 = vld [vmem:[%s5349_s2 + $0x230] sm:$0xff] }
 0x28f   : > { %v2517_v6 = vadd.f32 %v2135_v0, %v403_v61  ;;  %v1434_v7 = vpop.f32.mrb[130].mxu0 }
 0x290   : > { %v2139_v10 = vpop.f32.mrb[130].mxu1  ;;  %v1436_v11 = vpop.f32.mrb[131].mxu0  ;;  %1698 = vmatmul.mubr.f32.gmra.mrb[236].mxu0 %v939_v2 }
 0x291   : > { %2646 = vst.msk [vmem:[%s5349_s2 + $0x200] sm:$0xff] %vm2581_vm1, %v2517_v6  ;;  %v2140_v12 = vadd.f32 %v2139_v10, %v1434_v7  ;;  %v2141_v13 = vpop.f32.mrb[131].mxu1  ;;  %2403 = vmatmul.mubr.f32.gmra.mrb[236].mxu1 %v941_v3  ;;  %1702 = vmatprep.mubr.f32.mxu0 %v944_v5  ;;  %v963_v5 = vld [vmem:[%s3172_s4 + $0xf80] sm:$0xff]  ;;  %v965_v6 = vld [vmem:[%s3172_s4 + $0xf90] sm:$0xff]  ;;  %v968_v7 = vld [vmem:[%s3172_s4 + $0xfa8] sm:$0xff] }
 0x292   : > { %2407 = vmatprep.mubr.f32.mxu1 %v946_v8  ;;  %v970_v10 = vld [vmem:[%s3172_s4 + $0xfb8] sm:$0xff] }
 0x293   : > { %v2518_v17 = vadd.f32 %v2140_v12, %v404_v9  ;;  %v1439_v18 = vpop.f32.mrb[132].mxu0  ;;  %v410_v11 = vld [vmem:[%s5349_s2 + $0x238] sm:$0xff] }
 0x294   : > { %v2144_v21 = vpop.f32.mrb[132].mxu1  ;;  %v1441_v22 = vpop.f32.mrb[133].mxu0  ;;  %1703 = vmatmul.mubr.f32.gmra.mrb[238].mxu0 %v943_v14 }
 0x295   : > { %2647 = vst.msk [vmem:[%s5349_s2 + $0x208] sm:$0xff] %vm2581_vm1, %v2518_v17  ;;  %v2145_v23 = vadd.f32 %v2144_v21, %v1439_v18  ;;  %v2146_v24 = vpop.f32.mrb[133].mxu1  ;;  %2408 = vmatmul.mubr.f32.gmra.mrb[238].mxu1 %v945_v15  ;;  %1707 = vmatprep.mubr.f32.mxu0 %v948_v16  ;;  %v967_v16 = vld [vmem:[%s3172_s4 + $0xfa0] sm:$0xff]  ;;  %v969_v17 = vld [vmem:[%s3172_s4 + $0xfb0] sm:$0xff]  ;;  %v972_v18 = vld [vmem:[%s3172_s4 + $0xfc8] sm:$0xff] }
 0x296   : > { %2412 = vmatprep.mubr.f32.mxu1 %v950_v19  ;;  %v974_v21 = vld [vmem:[%s3172_s4 + $0xfd8] sm:$0xff]  ;;  %v411_v22 = vld [vmem:[%s5349_s2 + $0x240] sm:$0xff] }
 0x297   : > { %v2519_v28 = vadd.f32 %v2145_v23, %v405_v20  ;;  %v1444_v29 = vpop.f32.mrb[134].mxu0 }
 0x298   : > { %v2149_v32 = vpop.f32.mrb[134].mxu1  ;;  %v1446_v33 = vpop.f32.mrb[135].mxu0  ;;  %1708 = vmatmul.mubr.f32.gmra.mrb[240].mxu0 %v947_v25 }
 0x299   : > { %2648 = vst.msk [vmem:[%s5349_s2 + $0x210] sm:$0xff] %vm2581_vm1, %v2519_v28  ;;  %v2150_v34 = vadd.f32 %v2149_v32, %v1444_v29  ;;  %v2151_v35 = vpop.f32.mrb[135].mxu1  ;;  %2413 = vmatmul.mubr.f32.gmra.mrb[240].mxu1 %v949_v26  ;;  %1712 = vmatprep.mubr.f32.mxu0 %v952_v27  ;;  %v971_v27 = vld [vmem:[%s3172_s4 + $0xfc0] sm:$0xff]  ;;  %v973_v28 = vld [vmem:[%s3172_s4 + $0xfd0] sm:$0xff]  ;;  %v976_v29 = vld [vmem:[%s3172_s4 + $0xfe8] sm:$0xff] }
 0x29a   : > { %2417 = vmatprep.mubr.f32.mxu1 %v954_v30  ;;  %v978_v32 = vld [vmem:[%s3172_s4 + $0xff8] sm:$0xff]  ;;  %v412_v33 = vld [vmem:[%s5349_s2 + $0x248] sm:$0xff] }
 0x29b   : > { %v2520_v39 = vadd.f32 %v2150_v34, %v406_v31  ;;  %v1449_v40 = vpop.f32.mrb[136].mxu0 }
 0x29c   : > { %v2154_v43 = vpop.f32.mrb[136].mxu1  ;;  %v1451_v4 = vpop.f32.mrb[137].mxu0  ;;  %1713 = vmatmul.mubr.f32.gmra.mrb[242].mxu0 %v951_v36 }
 0x29d   : > { %2649 = vst.msk [vmem:[%s5349_s2 + $0x218] sm:$0xff] %vm2581_vm1, %v2520_v39  ;;  %v2155_v44 = vadd.f32 %v2154_v43, %v1449_v40  ;;  %v2156_v45 = vpop.f32.mrb[137].mxu1  ;;  %2418 = vmatmul.mubr.f32.gmra.mrb[242].mxu1 %v953_v37  ;;  %1717 = vmatprep.mubr.f32.mxu0 %v956_v38  ;;  %v975_v38 = vld [vmem:[%s3172_s4 + $0xfe0] sm:$0xff]  ;;  %v977_v39 = vld [vmem:[%s3172_s4 + $0xff0] sm:$0xff] }
 0x29e   : > { %2422 = vmatprep.mubr.f32.mxu1 %v958_v41 }
 0x29f   : > { %v2521_v49 = vadd.f32 %v2155_v44, %v407_v42  ;;  %v1454_v50 = vpop.f32.mrb[138].mxu0  ;;  %v413_v42 = vld [vmem:[%s5349_s2 + $0x250] sm:$0xff] }
 0x2a0   : > { %v2159_v53 = vpop.f32.mrb[138].mxu1  ;;  %v1456_v54 = vpop.f32.mrb[139].mxu0  ;;  %1718 = vmatmul.mubr.f32.gmra.mrb[244].mxu0 %v955_v46 }
 0x2a1   : > { %2650 = vst.msk [vmem:[%s5349_s2 + $0x220] sm:$0xff] %vm2581_vm1, %v2521_v49  ;;  %v2160_v55 = vadd.f32 %v2159_v53, %v1454_v50  ;;  %v2161_v56 = vpop.f32.mrb[139].mxu1  ;;  %2423 = vmatmul.mubr.f32.gmra.mrb[244].mxu1 %v957_v47  ;;  %1722 = vmatprep.mubr.f32.mxu0 %v960_v48  ;;  %v414_v48 = vld [vmem:[%s5349_s2 + $0x258] sm:$0xff] }
 0x2a2   : > { %2427 = vmatprep.mubr.f32.mxu1 %v962_v51 }
 0x2a3   : > { %v2522_v60 = vadd.f32 %v2160_v55, %v408_v52  ;;  %v1459_v61 = vpop.f32.mrb[140].mxu0  ;;  %v415_v55 = vld [vmem:[%s5349_s2 + $0x260] sm:$0xff] }
 0x2a4   : > { %v2164_v0 = vpop.f32.mrb[140].mxu1  ;;  %v1461_v1 = vpop.f32.mrb[141].mxu0  ;;  %1723 = vmatmul.mubr.f32.gmra.mrb[246].mxu0 %v959_v57 }
 0x2a5   : > { %2651 = vst.msk [vmem:[%s5349_s2 + $0x228] sm:$0xff] %vm2581_vm1, %v2522_v60  ;;  %v2165_v2 = vadd.f32 %v2164_v0, %v1459_v61  ;;  %v2166_v3 = vpop.f32.mrb[141].mxu1  ;;  %2428 = vmatmul.mubr.f32.gmra.mrb[246].mxu1 %v961_v58  ;;  %1727 = vmatprep.mubr.f32.mxu0 %v964_v59 }
 0x2a6   : > { %2432 = vmatprep.mubr.f32.mxu1 %v966_v62  ;;  %v416_v62 = vld [vmem:[%s5349_s2 + $0x268] sm:$0xff] }
 0x2a7   : > { %v2523_v8 = vadd.f32 %v2165_v2, %v409_v63  ;;  %v1464_v9 = vpop.f32.mrb[142].mxu0 }
 0x2a8   : > { %v2169_v12 = vpop.f32.mrb[142].mxu1  ;;  %v1466_v13 = vpop.f32.mrb[143].mxu0  ;;  %1728 = vmatmul.mubr.f32.gmra.mrb[248].mxu0 %v963_v5 }
 0x2a9   : > { %2652 = vst.msk [vmem:[%s5349_s2 + $0x230] sm:$0xff] %vm2581_vm1, %v2523_v8  ;;  %v2170_v14 = vadd.f32 %v2169_v12, %v1464_v9  ;;  %v2171_v15 = vpop.f32.mrb[143].mxu1  ;;  %2433 = vmatmul.mubr.f32.gmra.mrb[248].mxu1 %v965_v6  ;;  %1732 = vmatprep.mubr.f32.mxu0 %v968_v7  ;;  %v417_v6 = vld [vmem:[%s5349_s2 + $0x270] sm:$0xff]  ;;  %v418_v13 = vld [vmem:[%s5349_s2 + $0x278] sm:$0xff] }
 0x2aa   : > { %2437 = vmatprep.mubr.f32.mxu1 %v970_v10 }
 0x2ab   : > { %v2524_v19 = vadd.f32 %v2170_v14, %v410_v11  ;;  %v1469_v20 = vpop.f32.mrb[144].mxu0 }
 0x2ac   : > { %v2174_v23 = vpop.f32.mrb[144].mxu1  ;;  %v1471_v24 = vpop.f32.mrb[145].mxu0  ;;  %1733 = vmatmul.mubr.f32.gmra.mrb[250].mxu0 %v967_v16 }
 0x2ad   : > { %2653 = vst.msk [vmem:[%s5349_s2 + $0x238] sm:$0xff] %vm2581_vm1, %v2524_v19  ;;  %v2175_v25 = vadd.f32 %v2174_v23, %v1469_v20  ;;  %v2176_v26 = vpop.f32.mrb[145].mxu1  ;;  %2438 = vmatmul.mubr.f32.gmra.mrb[250].mxu1 %v969_v17  ;;  %1737 = vmatprep.mubr.f32.mxu0 %v972_v18  ;;  %v419_v20 = vld [vmem:[%s5349_s2 + $0x280] sm:$0xff] }
 0x2ae   : > { %2442 = vmatprep.mubr.f32.mxu1 %v974_v21 }
 0x2af   : > { %v2525_v30 = vadd.f32 %v2175_v25, %v411_v22  ;;  %v1474_v31 = vpop.f32.mrb[146].mxu0 }
 0x2b0   : > { %v2179_v34 = vpop.f32.mrb[146].mxu1  ;;  %v1476_v35 = vpop.f32.mrb[147].mxu0  ;;  %1738 = vmatmul.mubr.f32.gmra.mrb[252].mxu0 %v971_v27  ;;  %v420_v27 = vld [vmem:[%s5349_s2 + $0x288] sm:$0xff] }
 0x2b1   : > { %2654 = vst.msk [vmem:[%s5349_s2 + $0x240] sm:$0xff] %vm2581_vm1, %v2525_v30  ;;  %v2180_v36 = vadd.f32 %v2179_v34, %v1474_v31  ;;  %v2181_v37 = vpop.f32.mrb[147].mxu1  ;;  %2443 = vmatmul.mubr.f32.gmra.mrb[252].mxu1 %v973_v28  ;;  %1742 = vmatprep.mubr.f32.mxu0 %v976_v29  ;;  %v421_v34 = vld [vmem:[%s5349_s2 + $0x290] sm:$0xff] }
 0x2b2   : > { %2447 = vmatprep.mubr.f32.mxu1 %v978_v32 }
 0x2b3   : > { %v2526_v40 = vadd.f32 %v2180_v36, %v412_v33  ;;  %v1479_v41 = vpop.f32.mrb[148].mxu0 }
 0x2b4   : > { %v2184_v43 = vpop.f32.mrb[148].mxu1  ;;  %v1481_v4 = vpop.f32.mrb[149].mxu0  ;;  %1743 = vmatmul.mubr.f32.gmra.mrb[254].mxu0 %v975_v38 }
 0x2b5   : > { %2655 = vst.msk [vmem:[%s5349_s2 + $0x248] sm:$0xff] %vm2581_vm1, %v2526_v40  ;;  %v2185_v44 = vadd.f32 %v2184_v43, %v1479_v41  ;;  %v2186_v45 = vpop.f32.mrb[149].mxu1  ;;  %2448 = vmatmul.mubr.f32.gmra.mrb[254].mxu1 %v977_v39  ;;  %v422_v41 = vld [vmem:[%s5349_s2 + $0x298] sm:$0xff] }
 0x2b7   : > { %v2527_v46 = vadd.f32 %v2185_v44, %v413_v42  ;;  %v1484_v47 = vpop.f32.mrb[150].mxu0 }
 0x2b8   : > { %v2189_v49 = vpop.f32.mrb[150].mxu1  ;;  %v1486_v50 = vpop.f32.mrb[151].mxu0 }
 0x2b9   : > { %2656 = vst.msk [vmem:[%s5349_s2 + $0x250] sm:$0xff] %vm2581_vm1, %v2527_v46  ;;  %v2190_v51 = vadd.f32 %v2189_v49, %v1484_v47  ;;  %v2191_v52 = vpop.f32.mrb[151].mxu1  ;;  %v423_v47 = vld [vmem:[%s5349_s2 + $0x2a0] sm:$0xff] }
 0x2bb   : > { %v2528_v53 = vadd.f32 %v2190_v51, %v414_v48  ;;  %v1489_v54 = vpop.f32.mrb[152].mxu0 }
 0x2bc   : > { %v2194_v56 = vpop.f32.mrb[152].mxu1  ;;  %v1491_v57 = vpop.f32.mrb[153].mxu0 }
 0x2bd   : > { %2657 = vst.msk [vmem:[%s5349_s2 + $0x258] sm:$0xff] %vm2581_vm1, %v2528_v53  ;;  %v2195_v58 = vadd.f32 %v2194_v56, %v1489_v54  ;;  %v2196_v59 = vpop.f32.mrb[153].mxu1  ;;  %v424_v54 = vld [vmem:[%s5349_s2 + $0x2a8] sm:$0xff] }
 0x2bf   : > { %v2529_v60 = vadd.f32 %v2195_v58, %v415_v55  ;;  %v1494_v61 = vpop.f32.mrb[154].mxu0 }
 0x2c0   : > { %v2199_v63 = vpop.f32.mrb[154].mxu1  ;;  %v1496_v0 = vpop.f32.mrb[155].mxu0 }
 0x2c1   : > { %2658 = vst.msk [vmem:[%s5349_s2 + $0x260] sm:$0xff] %vm2581_vm1, %v2529_v60  ;;  %v2200_v1 = vadd.f32 %v2199_v63, %v1494_v61  ;;  %v2201_v2 = vpop.f32.mrb[155].mxu1  ;;  %v425_v61 = vld [vmem:[%s5349_s2 + $0x2b0] sm:$0xff] }
 0x2c3   : > { %v2530_v3 = vadd.f32 %v2200_v1, %v416_v62  ;;  %v1499_v5 = vpop.f32.mrb[156].mxu0 }
 0x2c4   : > { %v2204_v7 = vpop.f32.mrb[156].mxu1  ;;  %v1501_v8 = vpop.f32.mrb[157].mxu0 }
 0x2c5   : > { %2659 = vst.msk [vmem:[%s5349_s2 + $0x268] sm:$0xff] %vm2581_vm1, %v2530_v3  ;;  %v2205_v9 = vadd.f32 %v2204_v7, %v1499_v5  ;;  %v2206_v10 = vpop.f32.mrb[157].mxu1  ;;  %v426_v5 = vld [vmem:[%s5349_s2 + $0x2b8] sm:$0xff] }
 0x2c7   : > { %v2531_v11 = vadd.f32 %v2205_v9, %v417_v6  ;;  %v1504_v12 = vpop.f32.mrb[158].mxu0 }
 0x2c8   : > { %v2209_v14 = vpop.f32.mrb[158].mxu1  ;;  %v1506_v15 = vpop.f32.mrb[159].mxu0 }
 0x2c9   : > { %2660 = vst.msk [vmem:[%s5349_s2 + $0x270] sm:$0xff] %vm2581_vm1, %v2531_v11  ;;  %v2210_v16 = vadd.f32 %v2209_v14, %v1504_v12  ;;  %v2211_v17 = vpop.f32.mrb[159].mxu1  ;;  %v427_v12 = vld [vmem:[%s5349_s2 + $0x2c0] sm:$0xff] }
 0x2cb   : > { %v2532_v18 = vadd.f32 %v2210_v16, %v418_v13  ;;  %v1509_v19 = vpop.f32.mrb[160].mxu0 }
 0x2cc   : > { %v2214_v21 = vpop.f32.mrb[160].mxu1  ;;  %v1511_v22 = vpop.f32.mrb[161].mxu0 }
 0x2cd   : > { %2661 = vst.msk [vmem:[%s5349_s2 + $0x278] sm:$0xff] %vm2581_vm1, %v2532_v18  ;;  %v2215_v23 = vadd.f32 %v2214_v21, %v1509_v19  ;;  %v2216_v24 = vpop.f32.mrb[161].mxu1  ;;  %v428_v19 = vld [vmem:[%s5349_s2 + $0x2c8] sm:$0xff] }
 0x2cf   : > { %v2533_v25 = vadd.f32 %v2215_v23, %v419_v20  ;;  %v1514_v26 = vpop.f32.mrb[162].mxu0 }
 0x2d0   : > { %v2219_v28 = vpop.f32.mrb[162].mxu1  ;;  %v1516_v29 = vpop.f32.mrb[163].mxu0 }
 0x2d1   : > { %2662 = vst.msk [vmem:[%s5349_s2 + $0x280] sm:$0xff] %vm2581_vm1, %v2533_v25  ;;  %v2220_v30 = vadd.f32 %v2219_v28, %v1514_v26  ;;  %v2221_v31 = vpop.f32.mrb[163].mxu1  ;;  %v429_v26 = vld [vmem:[%s5349_s2 + $0x2d0] sm:$0xff] }
 0x2d3   : > { %v2534_v32 = vadd.f32 %v2220_v30, %v420_v27  ;;  %v1519_v33 = vpop.f32.mrb[164].mxu0 }
 0x2d4   : > { %v2224_v35 = vpop.f32.mrb[164].mxu1  ;;  %v1521_v36 = vpop.f32.mrb[165].mxu0 }
 0x2d5   : > { %2663 = vst.msk [vmem:[%s5349_s2 + $0x288] sm:$0xff] %vm2581_vm1, %v2534_v32  ;;  %v2225_v37 = vadd.f32 %v2224_v35, %v1519_v33  ;;  %v2226_v38 = vpop.f32.mrb[165].mxu1  ;;  %v430_v33 = vld [vmem:[%s5349_s2 + $0x2d8] sm:$0xff] }
 0x2d7   : > { %v2535_v39 = vadd.f32 %v2225_v37, %v421_v34  ;;  %v1524_v40 = vpop.f32.mrb[166].mxu0 }
 0x2d8   : > { %v2229_v42 = vpop.f32.mrb[166].mxu1  ;;  %v1526_v43 = vpop.f32.mrb[167].mxu0 }
 0x2d9   : > { %2664 = vst.msk [vmem:[%s5349_s2 + $0x290] sm:$0xff] %vm2581_vm1, %v2535_v39  ;;  %v2230_v4 = vadd.f32 %v2229_v42, %v1524_v40  ;;  %v2231_v44 = vpop.f32.mrb[167].mxu1  ;;  %v431_v40 = vld [vmem:[%s5349_s2 + $0x2e0] sm:$0xff] }
 0x2db   : > { %v2536_v45 = vadd.f32 %v2230_v4, %v422_v41  ;;  %v1529_v46 = vpop.f32.mrb[168].mxu0 }
 0x2dc   : > { %v2234_v48 = vpop.f32.mrb[168].mxu1  ;;  %v1531_v49 = vpop.f32.mrb[169].mxu0 }
 0x2dd   : > { %2665 = vst.msk [vmem:[%s5349_s2 + $0x298] sm:$0xff] %vm2581_vm1, %v2536_v45  ;;  %v2235_v50 = vadd.f32 %v2234_v48, %v1529_v46  ;;  %v2236_v51 = vpop.f32.mrb[169].mxu1  ;;  %v432_v46 = vld [vmem:[%s5349_s2 + $0x2e8] sm:$0xff] }
 0x2df   : > { %v2537_v52 = vadd.f32 %v2235_v50, %v423_v47  ;;  %v1534_v53 = vpop.f32.mrb[170].mxu0 }
 0x2e0   : > { %v2239_v55 = vpop.f32.mrb[170].mxu1  ;;  %v1536_v56 = vpop.f32.mrb[171].mxu0 }
 0x2e1   : > { %2666 = vst.msk [vmem:[%s5349_s2 + $0x2a0] sm:$0xff] %vm2581_vm1, %v2537_v52  ;;  %v2240_v57 = vadd.f32 %v2239_v55, %v1534_v53  ;;  %v2241_v58 = vpop.f32.mrb[171].mxu1  ;;  %v433_v53 = vld [vmem:[%s5349_s2 + $0x2f0] sm:$0xff] }
 0x2e3   : > { %v2538_v59 = vadd.f32 %v2240_v57, %v424_v54  ;;  %v1539_v60 = vpop.f32.mrb[172].mxu0 }
 0x2e4   : > { %v2244_v62 = vpop.f32.mrb[172].mxu1  ;;  %v1541_v63 = vpop.f32.mrb[173].mxu0 }
 0x2e5   : > { %2667 = vst.msk [vmem:[%s5349_s2 + $0x2a8] sm:$0xff] %vm2581_vm1, %v2538_v59  ;;  %v2245_v0 = vadd.f32 %v2244_v62, %v1539_v60  ;;  %v2246_v1 = vpop.f32.mrb[173].mxu1  ;;  %v434_v60 = vld [vmem:[%s5349_s2 + $0x2f8] sm:$0xff] }
 0x2e7   : > { %v2539_v2 = vadd.f32 %v2245_v0, %v425_v61  ;;  %v1544_v3 = vpop.f32.mrb[174].mxu0 }
 0x2e8   : > { %v2249_v6 = vpop.f32.mrb[174].mxu1  ;;  %v1546_v7 = vpop.f32.mrb[175].mxu0 }
 0x2e9   : > { %2668 = vst.msk [vmem:[%s5349_s2 + $0x2b0] sm:$0xff] %vm2581_vm1, %v2539_v2  ;;  %v2250_v8 = vadd.f32 %v2249_v6, %v1544_v3  ;;  %v2251_v9 = vpop.f32.mrb[175].mxu1  ;;  %v435_v3 = vld [vmem:[%s5349_s2 + $0x300] sm:$0xff] }
 0x2eb   : > { %v2540_v10 = vadd.f32 %v2250_v8, %v426_v5  ;;  %v1549_v11 = vpop.f32.mrb[176].mxu0 }
 0x2ec   : > { %v2254_v13 = vpop.f32.mrb[176].mxu1  ;;  %v1551_v14 = vpop.f32.mrb[177].mxu0 }
 0x2ed   : > { %2669 = vst.msk [vmem:[%s5349_s2 + $0x2b8] sm:$0xff] %vm2581_vm1, %v2540_v10  ;;  %v2255_v15 = vadd.f32 %v2254_v13, %v1549_v11  ;;  %v2256_v16 = vpop.f32.mrb[177].mxu1  ;;  %v436_v11 = vld [vmem:[%s5349_s2 + $0x308] sm:$0xff] }
 0x2ef   : > { %v2541_v17 = vadd.f32 %v2255_v15, %v427_v12  ;;  %v1554_v18 = vpop.f32.mrb[178].mxu0 }
 0x2f0   : > { %v2259_v20 = vpop.f32.mrb[178].mxu1  ;;  %v1556_v21 = vpop.f32.mrb[179].mxu0 }
 0x2f1   : > { %2670 = vst.msk [vmem:[%s5349_s2 + $0x2c0] sm:$0xff] %vm2581_vm1, %v2541_v17  ;;  %v2260_v22 = vadd.f32 %v2259_v20, %v1554_v18  ;;  %v2261_v23 = vpop.f32.mrb[179].mxu1  ;;  %v437_v18 = vld [vmem:[%s5349_s2 + $0x310] sm:$0xff] }
 0x2f3   : > { %v2542_v24 = vadd.f32 %v2260_v22, %v428_v19  ;;  %v1559_v25 = vpop.f32.mrb[180].mxu0 }
 0x2f4   : > { %v2264_v27 = vpop.f32.mrb[180].mxu1  ;;  %v1561_v28 = vpop.f32.mrb[181].mxu0 }
 0x2f5   : > { %2671 = vst.msk [vmem:[%s5349_s2 + $0x2c8] sm:$0xff] %vm2581_vm1, %v2542_v24  ;;  %v2265_v29 = vadd.f32 %v2264_v27, %v1559_v25  ;;  %v2266_v30 = vpop.f32.mrb[181].mxu1  ;;  %v438_v25 = vld [vmem:[%s5349_s2 + $0x318] sm:$0xff] }
 0x2f7   : > { %v2543_v31 = vadd.f32 %v2265_v29, %v429_v26  ;;  %v1564_v32 = vpop.f32.mrb[182].mxu0 }
 0x2f8   : > { %v2269_v34 = vpop.f32.mrb[182].mxu1  ;;  %v1566_v35 = vpop.f32.mrb[183].mxu0 }
 0x2f9   : > { %2672 = vst.msk [vmem:[%s5349_s2 + $0x2d0] sm:$0xff] %vm2581_vm1, %v2543_v31  ;;  %v2270_v36 = vadd.f32 %v2269_v34, %v1564_v32  ;;  %v2271_v37 = vpop.f32.mrb[183].mxu1  ;;  %v439_v32 = vld [vmem:[%s5349_s2 + $0x320] sm:$0xff] }
 0x2fb   : > { %v2544_v38 = vadd.f32 %v2270_v36, %v430_v33  ;;  %v1569_v39 = vpop.f32.mrb[184].mxu0 }
 0x2fc   : > { %v2274_v41 = vpop.f32.mrb[184].mxu1  ;;  %v1571_v42 = vpop.f32.mrb[185].mxu0 }
 0x2fd   : > { %2673 = vst.msk [vmem:[%s5349_s2 + $0x2d8] sm:$0xff] %vm2581_vm1, %v2544_v38  ;;  %v2275_v43 = vadd.f32 %v2274_v41, %v1569_v39  ;;  %v2276_v4 = vpop.f32.mrb[185].mxu1  ;;  %v440_v39 = vld [vmem:[%s5349_s2 + $0x328] sm:$0xff] }
 0x2ff   : > { %v2545_v44 = vadd.f32 %v2275_v43, %v431_v40  ;;  %v1574_v45 = vpop.f32.mrb[186].mxu0 }
 0x300   : > { %v2279_v47 = vpop.f32.mrb[186].mxu1  ;;  %v1576_v48 = vpop.f32.mrb[187].mxu0 }
 0x301   : > { %2674 = vst.msk [vmem:[%s5349_s2 + $0x2e0] sm:$0xff] %vm2581_vm1, %v2545_v44  ;;  %v2280_v49 = vadd.f32 %v2279_v47, %v1574_v45  ;;  %v2281_v50 = vpop.f32.mrb[187].mxu1  ;;  %v441_v45 = vld [vmem:[%s5349_s2 + $0x330] sm:$0xff] }
 0x303   : > { %v2546_v51 = vadd.f32 %v2280_v49, %v432_v46  ;;  %v1579_v52 = vpop.f32.mrb[188].mxu0 }
 0x304   : > { %v2284_v54 = vpop.f32.mrb[188].mxu1  ;;  %v1581_v55 = vpop.f32.mrb[189].mxu0 }
 0x305   : > { %2675 = vst.msk [vmem:[%s5349_s2 + $0x2e8] sm:$0xff] %vm2581_vm1, %v2546_v51  ;;  %v2285_v56 = vadd.f32 %v2284_v54, %v1579_v52  ;;  %v2286_v57 = vpop.f32.mrb[189].mxu1  ;;  %v442_v52 = vld [vmem:[%s5349_s2 + $0x338] sm:$0xff] }
 0x307   : > { %v2547_v58 = vadd.f32 %v2285_v56, %v433_v53  ;;  %v1584_v59 = vpop.f32.mrb[190].mxu0 }
 0x308   : > { %v2289_v61 = vpop.f32.mrb[190].mxu1  ;;  %v1586_v62 = vpop.f32.mrb[191].mxu0 }
 0x309   : > { %2676 = vst.msk [vmem:[%s5349_s2 + $0x2f0] sm:$0xff] %vm2581_vm1, %v2547_v58  ;;  %v2290_v63 = vadd.f32 %v2289_v61, %v1584_v59  ;;  %v2291_v0 = vpop.f32.mrb[191].mxu1  ;;  %v443_v59 = vld [vmem:[%s5349_s2 + $0x340] sm:$0xff] }
 0x30b   : > { %v2548_v1 = vadd.f32 %v2290_v63, %v434_v60  ;;  %v1589_v2 = vpop.f32.mrb[192].mxu0 }
 0x30c   : > { %v2294_v5 = vpop.f32.mrb[192].mxu1  ;;  %v1591_v6 = vpop.f32.mrb[193].mxu0 }
 0x30d   : > { %2677 = vst.msk [vmem:[%s5349_s2 + $0x2f8] sm:$0xff] %vm2581_vm1, %v2548_v1  ;;  %v2295_v7 = vadd.f32 %v2294_v5, %v1589_v2  ;;  %v2296_v8 = vpop.f32.mrb[193].mxu1  ;;  %v444_v2 = vld [vmem:[%s5349_s2 + $0x348] sm:$0xff] }
 0x30f   : > { %v2549_v9 = vadd.f32 %v2295_v7, %v435_v3  ;;  %v1594_v10 = vpop.f32.mrb[194].mxu0 }
 0x310   : > { %v2299_v12 = vpop.f32.mrb[194].mxu1  ;;  %v1596_v13 = vpop.f32.mrb[195].mxu0 }
 0x311   : > { %2678 = vst.msk [vmem:[%s5349_s2 + $0x300] sm:$0xff] %vm2581_vm1, %v2549_v9  ;;  %v2300_v14 = vadd.f32 %v2299_v12, %v1594_v10  ;;  %v2301_v15 = vpop.f32.mrb[195].mxu1  ;;  %v445_v10 = vld [vmem:[%s5349_s2 + $0x350] sm:$0xff] }
 0x313   : > { %v2550_v16 = vadd.f32 %v2300_v14, %v436_v11  ;;  %v1599_v17 = vpop.f32.mrb[196].mxu0 }
 0x314   : > { %v2304_v19 = vpop.f32.mrb[196].mxu1  ;;  %v1601_v20 = vpop.f32.mrb[197].mxu0 }
 0x315   : > { %2679 = vst.msk [vmem:[%s5349_s2 + $0x308] sm:$0xff] %vm2581_vm1, %v2550_v16  ;;  %v2305_v21 = vadd.f32 %v2304_v19, %v1599_v17  ;;  %v2306_v22 = vpop.f32.mrb[197].mxu1  ;;  %v446_v17 = vld [vmem:[%s5349_s2 + $0x358] sm:$0xff] }
 0x317   : > { %v2551_v23 = vadd.f32 %v2305_v21, %v437_v18  ;;  %v1604_v24 = vpop.f32.mrb[198].mxu0 }
 0x318   : > { %v2309_v26 = vpop.f32.mrb[198].mxu1  ;;  %v1606_v27 = vpop.f32.mrb[199].mxu0 }
 0x319   : > { %2680 = vst.msk [vmem:[%s5349_s2 + $0x310] sm:$0xff] %vm2581_vm1, %v2551_v23  ;;  %v2310_v28 = vadd.f32 %v2309_v26, %v1604_v24  ;;  %v2311_v29 = vpop.f32.mrb[199].mxu1  ;;  %v447_v24 = vld [vmem:[%s5349_s2 + $0x360] sm:$0xff] }
 0x31b   : > { %v2552_v30 = vadd.f32 %v2310_v28, %v438_v25  ;;  %v1609_v31 = vpop.f32.mrb[200].mxu0 }
 0x31c   : > { %v2314_v33 = vpop.f32.mrb[200].mxu1  ;;  %v1611_v34 = vpop.f32.mrb[201].mxu0 }
 0x31d   : > { %2681 = vst.msk [vmem:[%s5349_s2 + $0x318] sm:$0xff] %vm2581_vm1, %v2552_v30  ;;  %v2315_v35 = vadd.f32 %v2314_v33, %v1609_v31  ;;  %v2316_v36 = vpop.f32.mrb[201].mxu1  ;;  %v448_v31 = vld [vmem:[%s5349_s2 + $0x368] sm:$0xff] }
 0x31f   : > { %v2553_v37 = vadd.f32 %v2315_v35, %v439_v32  ;;  %v1614_v38 = vpop.f32.mrb[202].mxu0 }
 0x320   : > { %v2319_v40 = vpop.f32.mrb[202].mxu1  ;;  %v1616_v41 = vpop.f32.mrb[203].mxu0 }
 0x321   : > { %2682 = vst.msk [vmem:[%s5349_s2 + $0x320] sm:$0xff] %vm2581_vm1, %v2553_v37  ;;  %v2320_v42 = vadd.f32 %v2319_v40, %v1614_v38  ;;  %v2321_v43 = vpop.f32.mrb[203].mxu1  ;;  %v449_v38 = vld [vmem:[%s5349_s2 + $0x370] sm:$0xff] }
 0x323   : > { %v2554_v4 = vadd.f32 %v2320_v42, %v440_v39  ;;  %v1619_v44 = vpop.f32.mrb[204].mxu0 }
 0x324   : > { %v2324_v46 = vpop.f32.mrb[204].mxu1  ;;  %v1621_v47 = vpop.f32.mrb[205].mxu0 }
 0x325   : > { %2683 = vst.msk [vmem:[%s5349_s2 + $0x328] sm:$0xff] %vm2581_vm1, %v2554_v4  ;;  %v2325_v48 = vadd.f32 %v2324_v46, %v1619_v44  ;;  %v2326_v49 = vpop.f32.mrb[205].mxu1  ;;  %v450_v44 = vld [vmem:[%s5349_s2 + $0x378] sm:$0xff] }
 0x327   : > { %v2555_v50 = vadd.f32 %v2325_v48, %v441_v45  ;;  %v1624_v51 = vpop.f32.mrb[206].mxu0 }
 0x328   : > { %v2329_v53 = vpop.f32.mrb[206].mxu1  ;;  %v1626_v54 = vpop.f32.mrb[207].mxu0 }
 0x329   : > { %2684 = vst.msk [vmem:[%s5349_s2 + $0x330] sm:$0xff] %vm2581_vm1, %v2555_v50  ;;  %v2330_v55 = vadd.f32 %v2329_v53, %v1624_v51  ;;  %v2331_v56 = vpop.f32.mrb[207].mxu1  ;;  %v451_v51 = vld [vmem:[%s5349_s2 + $0x380] sm:$0xff] }
 0x32b   : > { %v2556_v57 = vadd.f32 %v2330_v55, %v442_v52  ;;  %v1629_v58 = vpop.f32.mrb[208].mxu0 }
 0x32c   : > { %v2334_v60 = vpop.f32.mrb[208].mxu1  ;;  %v1631_v61 = vpop.f32.mrb[209].mxu0 }
 0x32d   : > { %2685 = vst.msk [vmem:[%s5349_s2 + $0x338] sm:$0xff] %vm2581_vm1, %v2556_v57  ;;  %v2335_v62 = vadd.f32 %v2334_v60, %v1629_v58  ;;  %v2336_v63 = vpop.f32.mrb[209].mxu1  ;;  %v452_v58 = vld [vmem:[%s5349_s2 + $0x388] sm:$0xff] }
 0x32f   : > { %v2557_v0 = vadd.f32 %v2335_v62, %v443_v59  ;;  %v1634_v1 = vpop.f32.mrb[210].mxu0 }
 0x330   : > { %v2339_v3 = vpop.f32.mrb[210].mxu1  ;;  %v1636_v5 = vpop.f32.mrb[211].mxu0 }
 0x331   : > { %2686 = vst.msk [vmem:[%s5349_s2 + $0x340] sm:$0xff] %vm2581_vm1, %v2557_v0  ;;  %v2340_v6 = vadd.f32 %v2339_v3, %v1634_v1  ;;  %v2341_v7 = vpop.f32.mrb[211].mxu1  ;;  %v453_v1 = vld [vmem:[%s5349_s2 + $0x390] sm:$0xff] }
 0x333   : > { %v2558_v8 = vadd.f32 %v2340_v6, %v444_v2  ;;  %v1639_v9 = vpop.f32.mrb[212].mxu0 }
 0x334   : > { %v2344_v11 = vpop.f32.mrb[212].mxu1  ;;  %v1641_v12 = vpop.f32.mrb[213].mxu0 }
 0x335   : > { %2687 = vst.msk [vmem:[%s5349_s2 + $0x348] sm:$0xff] %vm2581_vm1, %v2558_v8  ;;  %v2345_v13 = vadd.f32 %v2344_v11, %v1639_v9  ;;  %v2346_v14 = vpop.f32.mrb[213].mxu1  ;;  %v454_v9 = vld [vmem:[%s5349_s2 + $0x398] sm:$0xff] }
 0x337   : > { %v2559_v15 = vadd.f32 %v2345_v13, %v445_v10  ;;  %v1644_v16 = vpop.f32.mrb[214].mxu0 }
 0x338   : > { %v2349_v18 = vpop.f32.mrb[214].mxu1  ;;  %v1646_v19 = vpop.f32.mrb[215].mxu0 }
 0x339   : > { %2688 = vst.msk [vmem:[%s5349_s2 + $0x350] sm:$0xff] %vm2581_vm1, %v2559_v15  ;;  %v2350_v20 = vadd.f32 %v2349_v18, %v1644_v16  ;;  %v2351_v21 = vpop.f32.mrb[215].mxu1  ;;  %v455_v16 = vld [vmem:[%s5349_s2 + $0x3a0] sm:$0xff] }
 0x33b   : > { %v2560_v22 = vadd.f32 %v2350_v20, %v446_v17  ;;  %v1649_v23 = vpop.f32.mrb[216].mxu0 }
 0x33c   : > { %v2354_v25 = vpop.f32.mrb[216].mxu1  ;;  %v1651_v26 = vpop.f32.mrb[217].mxu0 }
 0x33d   : > { %2689 = vst.msk [vmem:[%s5349_s2 + $0x358] sm:$0xff] %vm2581_vm1, %v2560_v22  ;;  %v2355_v27 = vadd.f32 %v2354_v25, %v1649_v23  ;;  %v2356_v28 = vpop.f32.mrb[217].mxu1  ;;  %v456_v23 = vld [vmem:[%s5349_s2 + $0x3a8] sm:$0xff] }
 0x33f   : > { %v2561_v29 = vadd.f32 %v2355_v27, %v447_v24  ;;  %v1654_v30 = vpop.f32.mrb[218].mxu0 }
 0x340   : > { %v2359_v32 = vpop.f32.mrb[218].mxu1  ;;  %v1656_v33 = vpop.f32.mrb[219].mxu0 }
 0x341   : > { %2690 = vst.msk [vmem:[%s5349_s2 + $0x360] sm:$0xff] %vm2581_vm1, %v2561_v29  ;;  %v2360_v34 = vadd.f32 %v2359_v32, %v1654_v30  ;;  %v2361_v35 = vpop.f32.mrb[219].mxu1  ;;  %v457_v30 = vld [vmem:[%s5349_s2 + $0x3b0] sm:$0xff] }
 0x343   : > { %v2562_v36 = vadd.f32 %v2360_v34, %v448_v31  ;;  %v1659_v37 = vpop.f32.mrb[220].mxu0 }
 0x344   : > { %v2364_v39 = vpop.f32.mrb[220].mxu1  ;;  %v1661_v40 = vpop.f32.mrb[221].mxu0 }
 0x345   : > { %2691 = vst.msk [vmem:[%s5349_s2 + $0x368] sm:$0xff] %vm2581_vm1, %v2562_v36  ;;  %v2365_v41 = vadd.f32 %v2364_v39, %v1659_v37  ;;  %v2366_v42 = vpop.f32.mrb[221].mxu1  ;;  %v458_v37 = vld [vmem:[%s5349_s2 + $0x3b8] sm:$0xff] }
 0x347   : > { %v2563_v43 = vadd.f32 %v2365_v41, %v449_v38  ;;  %v1664_v4 = vpop.f32.mrb[222].mxu0 }
 0x348   : > { %v2369_v45 = vpop.f32.mrb[222].mxu1  ;;  %v1666_v46 = vpop.f32.mrb[223].mxu0 }
 0x349   : > { %2692 = vst.msk [vmem:[%s5349_s2 + $0x370] sm:$0xff] %vm2581_vm1, %v2563_v43  ;;  %v2370_v47 = vadd.f32 %v2369_v45, %v1664_v4  ;;  %v2371_v48 = vpop.f32.mrb[223].mxu1  ;;  %v459_v4 = vld [vmem:[%s5349_s2 + $0x3c0] sm:$0xff] }
 0x34b   : > { %v2564_v49 = vadd.f32 %v2370_v47, %v450_v44  ;;  %v1669_v50 = vpop.f32.mrb[224].mxu0 }
 0x34c   : > { %v2374_v52 = vpop.f32.mrb[224].mxu1  ;;  %v1671_v53 = vpop.f32.mrb[225].mxu0 }
 0x34d   : > { %2693 = vst.msk [vmem:[%s5349_s2 + $0x378] sm:$0xff] %vm2581_vm1, %v2564_v49  ;;  %v2375_v54 = vadd.f32 %v2374_v52, %v1669_v50  ;;  %v2376_v55 = vpop.f32.mrb[225].mxu1  ;;  %v460_v50 = vld [vmem:[%s5349_s2 + $0x3c8] sm:$0xff] }
 0x34f   : > { %v2565_v56 = vadd.f32 %v2375_v54, %v451_v51  ;;  %v1674_v57 = vpop.f32.mrb[226].mxu0 }
 0x350   : > { %v2379_v59 = vpop.f32.mrb[226].mxu1  ;;  %v1676_v60 = vpop.f32.mrb[227].mxu0 }
 0x351   : > { %2694 = vst.msk [vmem:[%s5349_s2 + $0x380] sm:$0xff] %vm2581_vm1, %v2565_v56  ;;  %v2380_v61 = vadd.f32 %v2379_v59, %v1674_v57  ;;  %v2381_v62 = vpop.f32.mrb[227].mxu1  ;;  %v461_v57 = vld [vmem:[%s5349_s2 + $0x3d0] sm:$0xff] }
 0x353   : > { %v2566_v63 = vadd.f32 %v2380_v61, %v452_v58  ;;  %v1679_v0 = vpop.f32.mrb[228].mxu0 }
 0x354   : > { %v2384_v2 = vpop.f32.mrb[228].mxu1  ;;  %v1681_v3 = vpop.f32.mrb[229].mxu0 }
 0x355   : > { %2695 = vst.msk [vmem:[%s5349_s2 + $0x388] sm:$0xff] %vm2581_vm1, %v2566_v63  ;;  %v2385_v5 = vadd.f32 %v2384_v2, %v1679_v0  ;;  %v2386_v6 = vpop.f32.mrb[229].mxu1  ;;  %v462_v0 = vld [vmem:[%s5349_s2 + $0x3d8] sm:$0xff] }
 0x357   : > { %v2567_v7 = vadd.f32 %v2385_v5, %v453_v1  ;;  %v1684_v8 = vpop.f32.mrb[230].mxu0 }
 0x358   : > { %v2389_v10 = vpop.f32.mrb[230].mxu1  ;;  %v1686_v11 = vpop.f32.mrb[231].mxu0 }
 0x359   : > { %2696 = vst.msk [vmem:[%s5349_s2 + $0x390] sm:$0xff] %vm2581_vm1, %v2567_v7  ;;  %v2390_v12 = vadd.f32 %v2389_v10, %v1684_v8  ;;  %v2391_v13 = vpop.f32.mrb[231].mxu1  ;;  %v463_v8 = vld [vmem:[%s5349_s2 + $0x3e0] sm:$0xff] }
 0x35b   : > { %v2568_v14 = vadd.f32 %v2390_v12, %v454_v9  ;;  %v1689_v15 = vpop.f32.mrb[232].mxu0 }
 0x35c   : > { %v2394_v17 = vpop.f32.mrb[232].mxu1  ;;  %v1691_v18 = vpop.f32.mrb[233].mxu0 }
 0x35d   : > { %2697 = vst.msk [vmem:[%s5349_s2 + $0x398] sm:$0xff] %vm2581_vm1, %v2568_v14  ;;  %v2395_v19 = vadd.f32 %v2394_v17, %v1689_v15  ;;  %v2396_v20 = vpop.f32.mrb[233].mxu1  ;;  %v464_v15 = vld [vmem:[%s5349_s2 + $0x3e8] sm:$0xff] }
 0x35f   : > { %v2569_v21 = vadd.f32 %v2395_v19, %v455_v16  ;;  %v1694_v22 = vpop.f32.mrb[234].mxu0 }
 0x360   : > { %v2399_v24 = vpop.f32.mrb[234].mxu1  ;;  %v1696_v25 = vpop.f32.mrb[235].mxu0 }
 0x361   : > { %2698 = vst.msk [vmem:[%s5349_s2 + $0x3a0] sm:$0xff] %vm2581_vm1, %v2569_v21  ;;  %v2400_v26 = vadd.f32 %v2399_v24, %v1694_v22  ;;  %v2401_v27 = vpop.f32.mrb[235].mxu1  ;;  %v465_v22 = vld [vmem:[%s5349_s2 + $0x3f0] sm:$0xff] }
 0x363   : > { %v2570_v28 = vadd.f32 %v2400_v26, %v456_v23  ;;  %v1699_v29 = vpop.f32.mrb[236].mxu0 }
 0x364   : > { %v2404_v31 = vpop.f32.mrb[236].mxu1  ;;  %v1701_v32 = vpop.f32.mrb[237].mxu0 }
 0x365   : > { %2699 = vst.msk [vmem:[%s5349_s2 + $0x3a8] sm:$0xff] %vm2581_vm1, %v2570_v28  ;;  %v2405_v33 = vadd.f32 %v2404_v31, %v1699_v29  ;;  %v2406_v34 = vpop.f32.mrb[237].mxu1  ;;  %v466_v29 = vld [vmem:[%s5349_s2 + $0x3f8] sm:$0xff] }
 0x367   : > { %v2571_v35 = vadd.f32 %v2405_v33, %v457_v30  ;;  %v1704_v36 = vpop.f32.mrb[238].mxu0 }
 0x368   : > { %v2409_v38 = vpop.f32.mrb[238].mxu1  ;;  %v1706_v39 = vpop.f32.mrb[239].mxu0 }
 0x369   : > { %2700 = vst.msk [vmem:[%s5349_s2 + $0x3b0] sm:$0xff] %vm2581_vm1, %v2571_v35  ;;  %v2410_v40 = vadd.f32 %v2409_v38, %v1704_v36  ;;  %v2411_v41 = vpop.f32.mrb[239].mxu1 }
 0x36b   : > { %v2572_v42 = vadd.f32 %v2410_v40, %v458_v37  ;;  %v1709_v43 = vpop.f32.mrb[240].mxu0 }
 0x36c   : > { %v2414_v44 = vpop.f32.mrb[240].mxu1  ;;  %v1711_v45 = vpop.f32.mrb[241].mxu0 }
 0x36d   : > { %2701 = vst.msk [vmem:[%s5349_s2 + $0x3b8] sm:$0xff] %vm2581_vm1, %v2572_v42  ;;  %v2415_v46 = vadd.f32 %v2414_v44, %v1709_v43  ;;  %v2416_v47 = vpop.f32.mrb[241].mxu1 }
 0x36f   : > { %v2573_v48 = vadd.f32 %v2415_v46, %v459_v4  ;;  %v1714_v49 = vpop.f32.mrb[242].mxu0 }
 0x370   : > { %v2419_v51 = vpop.f32.mrb[242].mxu1  ;;  %v1716_v52 = vpop.f32.mrb[243].mxu0 }
 0x371   : > { %2702 = vst.msk [vmem:[%s5349_s2 + $0x3c0] sm:$0xff] %vm2581_vm1, %v2573_v48  ;;  %v2420_v53 = vadd.f32 %v2419_v51, %v1714_v49  ;;  %v2421_v54 = vpop.f32.mrb[243].mxu1 }
 0x373   : > { %v2574_v55 = vadd.f32 %v2420_v53, %v460_v50  ;;  %v1719_v56 = vpop.f32.mrb[244].mxu0 }
 0x374   : > { %v2424_v58 = vpop.f32.mrb[244].mxu1  ;;  %v1721_v59 = vpop.f32.mrb[245].mxu0 }
 0x375   : > { %2703 = vst.msk [vmem:[%s5349_s2 + $0x3c8] sm:$0xff] %vm2581_vm1, %v2574_v55  ;;  %v2425_v60 = vadd.f32 %v2424_v58, %v1719_v56  ;;  %v2426_v61 = vpop.f32.mrb[245].mxu1 }
 0x377   : > { %v2575_v62 = vadd.f32 %v2425_v60, %v461_v57  ;;  %v1724_v63 = vpop.f32.mrb[246].mxu0 }
 0x378   : > { %v2429_v1 = vpop.f32.mrb[246].mxu1  ;;  %v1726_v2 = vpop.f32.mrb[247].mxu0 }
 0x379   : > { %2704 = vst.msk [vmem:[%s5349_s2 + $0x3d0] sm:$0xff] %vm2581_vm1, %v2575_v62  ;;  %v2430_v3 = vadd.f32 %v2429_v1, %v1724_v63  ;;  %v2431_v5 = vpop.f32.mrb[247].mxu1 }
 0x37b   : > { %v2576_v6 = vadd.f32 %v2430_v3, %v462_v0  ;;  %v1729_v7 = vpop.f32.mrb[248].mxu0 }
 0x37c   : > { %v2434_v9 = vpop.f32.mrb[248].mxu1  ;;  %v1731_v10 = vpop.f32.mrb[249].mxu0 }
 0x37d   : > { %2705 = vst.msk [vmem:[%s5349_s2 + $0x3d8] sm:$0xff] %vm2581_vm1, %v2576_v6  ;;  %v2435_v11 = vadd.f32 %v2434_v9, %v1729_v7  ;;  %v2436_v12 = vpop.f32.mrb[249].mxu1 }
 0x37f   : > { %v2577_v13 = vadd.f32 %v2435_v11, %v463_v8  ;;  %v1734_v14 = vpop.f32.mrb[250].mxu0 }
 0x380   : > { %v2439_v16 = vpop.f32.mrb[250].mxu1  ;;  %v1736_v17 = vpop.f32.mrb[251].mxu0 }
 0x381   : > { %2706 = vst.msk [vmem:[%s5349_s2 + $0x3e0] sm:$0xff] %vm2581_vm1, %v2577_v13  ;;  %v2440_v18 = vadd.f32 %v2439_v16, %v1734_v14  ;;  %v2441_v19 = vpop.f32.mrb[251].mxu1 }
 0x383   : > { %v2578_v20 = vadd.f32 %v2440_v18, %v464_v15  ;;  %v1739_v21 = vpop.f32.mrb[252].mxu0 }
 0x384   : > { %v2444_v23 = vpop.f32.mrb[252].mxu1  ;;  %v1741_v24 = vpop.f32.mrb[253].mxu0 }
 0x385   : > { %2707 = vst.msk [vmem:[%s5349_s2 + $0x3e8] sm:$0xff] %vm2581_vm1, %v2578_v20  ;;  %v2445_v25 = vadd.f32 %v2444_v23, %v1739_v21  ;;  %v2446_v26 = vpop.f32.mrb[253].mxu1 }
 0x387   : > { %v2579_v27 = vadd.f32 %v2445_v25, %v465_v22  ;;  %v1744_v28 = vpop.f32.mrb[254].mxu0 }
 0x388   : > { %v2449_v30 = vpop.f32.mrb[254].mxu1  ;;  %v1746_v31 = vpop.f32.mrb[255].mxu0 }
 0x389   : > { %2708 = vst.msk [vmem:[%s5349_s2 + $0x3f0] sm:$0xff] %vm2581_vm1, %v2579_v27  ;;  %v2450_v32 = vadd.f32 %v2449_v30, %v1744_v28  ;;  %v2451_v33 = vpop.f32.mrb[255].mxu1 }
 0x38b   : > { %v2580_v34 = vadd.f32 %v2450_v32, %v466_v29 }
 0x38d   : > { %2709 = vst.msk [vmem:[%s5349_s2 + $0x3f8] sm:$0xff] %vm2581_vm1, %v2580_v34 }
 0x38e PF: > { %s15_s14 = sadd.s32 1, %s3050_s14   ;;  %s5354_s9 = smov %s3034_s10 }
 0x38f   : > { %p12_p7 = scmp.ge.s32.totalorder %s15_s14, 6   ;;  %s5355_s10 = smov %s3038_s11 }
 0x390   : > { %s5356_s11 = smov %s3122_s21  ;;  %s5357_s12 = smov %s3046_s13 }
 0x391   : > { %s5358_s13 = smov %s5360_s16  ;;  %14 = sbr.rel (!%p12_p7) target bundleno = 4 (0x4), region = 75 }
 0x398   :  { %2732 = vsyncpa [#allocation3], 1 }
 0x399   :  { %2734 = vsyncpa [#allocation3 + $0x1], 1 }

</bundles_post_ra>
